<compile_context>
chip_gen: v5e
topology: v5e:2x2
jax: 0.10.0
libtpu: 0.0.40
codegen_flags: <defaults>
</compile_context>

<pallas_src>
import jax
import jax.numpy as jnp
import numpy as np
from jax.experimental import pallas as pl
from jax.experimental.pallas import tpu as pltpu

KSIZE = 5
PAD = 2
EPS = 1e-5


# ---------------------------------------------------------------------------
# Fused Pallas kernel
# ---------------------------------------------------------------------------
def _make_fused_kernel(H, W, c):
    """Returns (kernel, M, MARGIN) for images of size HxW with num_inter=c."""
    M = H * W
    MARGIN = PAD * W + PAD          # largest |tap offset| in flat (h*W + w) coords

    def kernel(x_ref, masks_ref, wd_ref, w1_ref, w2_ref,
               wp2_ref, wp3a1_ref, wp3a2_ref, wp3b_ref,
               bd_ref, b1_ref, b2_ref, bp2_ref, bp3a_ref, bp3b_ref,
               out_ref, xbuf, x0buf):
        f32 = jnp.float32

        # ---- dense 5x5 conv (cin -> c) + folded-BN + ReLU, on the MXU ------
        xbuf[...] = jnp.zeros_like(xbuf)                    # zero halo
        xbuf[:, MARGIN:MARGIN + M] = x_ref[0]               # interior = image
        acc = jnp.zeros((c, M), f32)
        for dwi in range(KSIZE):
            dw = dwi - PAD
            part = jnp.zeros((c, M), f32)
            for dhi in range(KSIZE):
                off = (dhi - PAD) * W + dw
                xs = xbuf[:, MARGIN + off:MARGIN + off + M]  # (cin, M)
                part = part + jnp.dot(wd_ref[dhi * KSIZE + dwi], xs,
                                      preferred_element_type=f32)
            acc = acc + masks_ref[dwi] * part                # kill row-wrap terms
        x0 = jnp.maximum(acc + bd_ref[...], 0.0)             # (c, M)
        out_ref[0, 0:c, :] = x0

        # ---- two depthwise 5x5 convs sharing one padded copy of x0 ---------
        x0buf[...] = jnp.zeros_like(x0buf)
        x0buf[:, MARGIN:MARGIN + M] = x0
        acc1 = jnp.zeros((c, M), f32)
        acc2 = jnp.zeros((c, M), f32)
        for dwi in range(KSIZE):
            dw = dwi - PAD
            p1 = jnp.zeros((c, M), f32)
            p2 = jnp.zeros((c, M), f32)
            for dhi in range(KSIZE):
                off = (dhi - PAD) * W + dw
                xs = x0buf[:, MARGIN + off:MARGIN + off + M]  # (c, M)
                k = dhi * KSIZE + dwi
                p1 = p1 + xs * w1_ref[k]                      # (c,1) broadcast
                p2 = p2 + xs * w2_ref[k]
            m = masks_ref[dwi]
            acc1 = acc1 + m * p1
            acc2 = acc2 + m * p2
        gc1 = jnp.maximum(acc1 + b1_ref[...], 0.0)
        gc2 = jnp.maximum(acc2 + b2_ref[...], 0.0)
        out_ref[0, c:2 * c, :] = gc1

        # ---- 1x1 convs as MXU matmuls over channels ------------------------
        gc2 = jnp.maximum(
            jnp.dot(wp2_ref[...], gc2, preferred_element_type=f32)
            + bp2_ref[...], 0.0)
        out_ref[0, 2 * c:3 * c, :] = gc2

        # PWConv3: squeeze (2c -> c/2) on concat([gc1, gc2]) then expand.
        gc3 = (jnp.dot(wp3a1_ref[...], gc1, preferred_element_type=f32)
               + jnp.dot(wp3a2_ref[...], gc2, preferred_element_type=f32))
        gc3 = jnp.maximum(gc3 + bp3a_ref[...], 0.0)
        gc3 = jnp.maximum(
            jnp.dot(wp3b_ref[...], gc3, preferred_element_type=f32)
            + bp3b_ref[...], 0.0)
        out_ref[0, 3 * c:4 * c, :] = gc3

    return kernel, M, MARGIN


# ---------------------------------------------------------------------------
# Wrapper: NCHW in / NCHW out, BN folded into weights, single pallas_call
# ---------------------------------------------------------------------------
def module5_forward(x_nchw, p):
    N, cin, H, W = x_nchw.shape
    ntap = KSIZE * KSIZE

    wd_raw, sd, td = p["convlayer"]        # (5,5,cin,c), (c,), (c,)
    c = wd_raw.shape[-1]
    w1_raw, s1, t1 = p["conv1"]            # (5,5,c)
    w2_raw, s2, t2 = p["conv2"]
    wp2_raw, sp2, tp2 = p["pw2"]           # (c, c)
    w3a_raw, s3a, t3a = p["pw3a"]          # (2c, c/2)
    w3b_raw, s3b, t3b = p["pw3b"]          # (c/2, c)
    ch = w3a_raw.shape[-1]

    kernel, M, MARGIN = _make_fused_kernel(H, W, c)

    # Fold BN scale into weights; bias is the folded shift.
    wd = (jnp.transpose(wd_raw, (0, 1, 3, 2)).reshape(ntap, c, cin)
          * sd[None, :, None])                       # (25, c, cin)
    w1 = (w1_raw * s1).reshape(ntap, c, 1)           # (25, c, 1)
    w2 = (w2_raw * s2).reshape(ntap, c, 1)
    wp2 = sp2[:, None] * wp2_raw.T                   # (c, c)
    w3a_t = s3a[:, None] * w3a_raw.T                 # (ch, 2c)
    wp3a1 = w3a_t[:, :c]                             # applied to gc1
    wp3a2 = w3a_t[:, c:]                             # applied to gc2
    wp3b = s3b[:, None] * w3b_raw.T                  # (c, ch)

    bd, b1, b2 = td.reshape(c, 1), t1.reshape(c, 1), t2.reshape(c, 1)
    bp2, bp3a, bp3b = tp2.reshape(c, 1), t3a.reshape(ch, 1), t3b.reshape(c, 1)

    # Column-validity masks per horizontal tap offset dw in [-PAD, PAD].
    wcol = jnp.arange(M, dtype=jnp.int32) % W
    masks = jnp.stack(
        [((wcol + dw >= 0) & (wcol + dw < W)).astype(jnp.float32)
         for dw in range(-PAD, PAD + 1)]).reshape(KSIZE, 1, M)

    x_flat = x_nchw.reshape(N, cin, M).astype(jnp.float32)   # free reshape

    def full(a):
        nd = a.ndim
        return pl.BlockSpec(a.shape, lambda n, _nd=nd: (0,) * _nd)

    out_flat = pl.pallas_call(
        kernel,
        out_shape=jax.ShapeDtypeStruct((N, 4 * c, M), jnp.float32),
        grid=(N,),
        in_specs=[
            pl.BlockSpec((1, cin, M), lambda n: (n, 0, 0)),
            full(masks), full(wd), full(w1), full(w2),
            full(wp2), full(wp3a1), full(wp3a2), full(wp3b),
            full(bd), full(b1), full(b2), full(bp2), full(bp3a), full(bp3b),
        ],
        out_specs=pl.BlockSpec((1, 4 * c, M), lambda n: (n, 0, 0)),
        scratch_shapes=[
            pltpu.VMEM((cin, M + 2 * MARGIN), jnp.float32),   # padded input
            pltpu.VMEM((c, M + 2 * MARGIN), jnp.float32),     # padded x0
        ],
        compiler_params=pltpu.CompilerParams(
            dimension_semantics=("parallel",)),
    )(x_flat, masks, wd, w1, w2, wp2, wp3a1, wp3a2, wp3b,
      bd, b1, b2, bp2, bp3a, bp3b)

    return out_flat.reshape(N, 4 * c, H, W)                  # free reshape


# ---------------------------------------------------------------------------
# Deterministic parameter init (BN folded into scale/shift; eval semantics)
# ---------------------------------------------------------------------------
def _fold_bn(conv_bias, gamma, beta, mean, var):
    scale = gamma * jax.lax.rsqrt(var + EPS)
    shift = (conv_bias - mean) * scale + beta
    return scale, shift


def init_params(key, channels, outchannels):
    num_inter = outchannels // 4
    keys = iter(jax.random.split(key, 48))

    def nrm(shape, s=0.2):
        return jax.random.normal(next(keys), shape, jnp.float32) * s

    def uni(shape):
        return jax.random.uniform(next(keys), shape, jnp.float32, 0.5, 1.5)

    def conv_block(cin, cout, ksize):
        w = nrm((cin, cout)) if ksize == 1 else nrm((ksize, ksize, cin, cout))
        b = nrm((cout,), 0.1)
        scale, shift = _fold_bn(b, uni((cout,)), nrm((cout,), 0.1),
                                nrm((cout,), 0.1), uni((cout,)))
        return w, scale, shift

    def dw_block(c):
        w = nrm((KSIZE, KSIZE, c))
        b = nrm((c,), 0.1)
        scale, shift = _fold_bn(b, uni((c,)), nrm((c,), 0.1),
                                nrm((c,), 0.1), uni((c,)))
        return w, scale, shift

    return {
        "convlayer": conv_block(channels, num_inter, KSIZE),
        "conv1": dw_block(num_inter),
        "conv2": dw_block(num_inter),
        "pw2": conv_block(num_inter, num_inter, 1),
        "pw3a": conv_block(num_inter * 2, num_inter // 2, 1),
        "pw3b": conv_block(num_inter // 2, num_inter, 1),
    }


# ---------------------------------------------------------------------------
# Pure-JAX reference (lax conv) for verification
# ---------------------------------------------------------------------------
def _ref_conv(x, w_hwio, scale, shift, groups=1):
    y = jax.lax.conv_general_dilated(
        x, w_hwio, window_strides=(1, 1), padding=[(PAD, PAD), (PAD, PAD)],
        dimension_numbers=("NHWC", "HWIO", "NHWC"),
        feature_group_count=groups)
    return jnp.maximum(y * scale + shift, 0.0)


def _ref_pw(x, w, scale, shift):
    y = jnp.einsum("nhwc,cd->nhwd", x, w)
    return jnp.maximum(y * scale + shift, 0.0)


def ref_forward(x_nchw, p):
    x = jnp.transpose(x_nchw, (0, 2, 3, 1)).astype(jnp.float32)
    w0, s0, t0 = p["convlayer"]
    x = _ref_conv(x, w0, s0, t0)
    w1, s1, t1 = p["conv1"]
    gc1 = _ref_conv(x, w1.reshape(KSIZE, KSIZE, 1, -1), s1, t1,
                    groups=w1.shape[-1])
    w2, s2, t2 = p["conv2"]
    gc2 = _ref_conv(x, w2.reshape(KSIZE, KSIZE, 1, -1), s2, t2,
                    groups=w2.shape[-1])
    gc2 = _ref_pw(gc2, *p["pw2"])
    gc = jnp.concatenate([gc1, gc2], axis=-1)
    gc3 = _ref_pw(gc, *p["pw3a"])
    gc3 = _ref_pw(gc3, *p["pw3b"])
    out = jnp.concatenate([x, gc1, gc2, gc3], axis=-1)
    return jnp.transpose(out, (0, 3, 1, 2))


# ---------------------------------------------------------------------------
if __name__ == "__main__":
    N, C_IN, H, W = 2, 4, 16, 16
    OUTCHANNELS = 32                      # -> num_inter = 8

    key = jax.random.PRNGKey(0)
    k_x, k_p = jax.random.split(key)
    x = jax.random.normal(k_x, (N, C_IN, H, W), jnp.float32)
    params = init_params(k_p, C_IN, OUTCHANNELS)

    fwd = jax.jit(module5_forward)
    out = jax.block_until_ready(fwd(x, params))
    assert out.shape == (N, OUTCHANNELS, H, W), out.shape

    ref = jax.block_until_ready(ref_forward(x, params))
    np.testing.assert_allclose(np.asarray(out), np.asarray(ref),
                               rtol=2e-2, atol=2e-2)
    print("KERNEL_OK")
</pallas_src>

<mosaic_0001>
module attributes {stable_mosaic.version = 11 : i64} {
  func.func @kernel(%arg0: i32, %arg1: memref<1x4x256xf32, #tpu.memory_space<vmem>>, %arg2: memref<5x1x256xf32, #tpu.memory_space<vmem>>, %arg3: memref<25x8x4xf32, #tpu.memory_space<vmem>>, %arg4: memref<25x8x1xf32, #tpu.memory_space<vmem>>, %arg5: memref<25x8x1xf32, #tpu.memory_space<vmem>>, %arg6: memref<8x8xf32, #tpu.memory_space<vmem>>, %arg7: memref<4x8xf32, #tpu.memory_space<vmem>>, %arg8: memref<4x8xf32, #tpu.memory_space<vmem>>, %arg9: memref<8x4xf32, #tpu.memory_space<vmem>>, %arg10: memref<8x1xf32, #tpu.memory_space<vmem>>, %arg11: memref<8x1xf32, #tpu.memory_space<vmem>>, %arg12: memref<8x1xf32, #tpu.memory_space<vmem>>, %arg13: memref<8x1xf32, #tpu.memory_space<vmem>>, %arg14: memref<4x1xf32, #tpu.memory_space<vmem>>, %arg15: memref<8x1xf32, #tpu.memory_space<vmem>>, %arg16: memref<1x32x256xf32, #tpu.memory_space<vmem>>, %arg17: memref<4x324xf32, #tpu.memory_space<vmem>>, %arg18: memref<8x324xf32, #tpu.memory_space<vmem>>) attributes {dimension_semantics = [#tpu.dimension_semantics<parallel>], iteration_bounds = array<i64: 2>, scalar_prefetch = 0 : i64, scratch_operands = 2 : i64, tpu.core_type = #tpu.core_type<tc>, window_params = [{transform_indices = @transform_0, window_bounds = array<i64: 1, 4, 256>}, {pipeline_mode = #tpu.pipeline_mode<synchronous>, transform_indices = @transform_1, window_bounds = array<i64: 5, 1, 256>}, {pipeline_mode = #tpu.pipeline_mode<synchronous>, transform_indices = @transform_2, window_bounds = array<i64: 25, 8, 4>}, {pipeline_mode = #tpu.pipeline_mode<synchronous>, transform_indices = @transform_3, window_bounds = array<i64: 25, 8, 1>}, {pipeline_mode = #tpu.pipeline_mode<synchronous>, transform_indices = @transform_4, window_bounds = array<i64: 25, 8, 1>}, {pipeline_mode = #tpu.pipeline_mode<synchronous>, transform_indices = @transform_5, window_bounds = array<i64: 8, 8>}, {pipeline_mode = #tpu.pipeline_mode<synchronous>, transform_indices = @transform_6, window_bounds = array<i64: 4, 8>}, {pipeline_mode = #tpu.pipeline_mode<synchronous>, transform_indices = @transform_7, window_bounds = array<i64: 4, 8>}, {pipeline_mode = #tpu.pipeline_mode<synchronous>, transform_indices = @transform_8, window_bounds = array<i64: 8, 4>}, {pipeline_mode = #tpu.pipeline_mode<synchronous>, transform_indices = @transform_9, window_bounds = array<i64: 8, 1>}, {pipeline_mode = #tpu.pipeline_mode<synchronous>, transform_indices = @transform_10, window_bounds = array<i64: 8, 1>}, {pipeline_mode = #tpu.pipeline_mode<synchronous>, transform_indices = @transform_11, window_bounds = array<i64: 8, 1>}, {pipeline_mode = #tpu.pipeline_mode<synchronous>, transform_indices = @transform_12, window_bounds = array<i64: 8, 1>}, {pipeline_mode = #tpu.pipeline_mode<synchronous>, transform_indices = @transform_13, window_bounds = array<i64: 4, 1>}, {pipeline_mode = #tpu.pipeline_mode<synchronous>, transform_indices = @transform_14, window_bounds = array<i64: 8, 1>}, {transform_indices = @transform_15, window_bounds = array<i64: 1, 32, 256>}]} {
    %cst = arith.constant 0.000000e+00 : f32
    %0 = vector.broadcast %cst : f32 to vector<4x324xf32>
    %c0 = arith.constant 0 : index
    %c0_0 = arith.constant 0 : index
    %1 = vector.load %arg17[%c0, %c0_0] : memref<4x324xf32, #tpu.memory_space<vmem>>, vector<4x324xf32>
    tpu.vector_store %arg17[%c0, %c0_0], %0 {strides = array<i32>} : memref<4x324xf32, #tpu.memory_space<vmem>>, vector<4x324xf32>,
    %c0_1 = arith.constant 0 : index
    %c0_2 = arith.constant 0 : index
    %c0_3 = arith.constant 0 : index
    %2 = vector.load %arg1[%c0_1, %c0_2, %c0_3] : memref<1x4x256xf32, #tpu.memory_space<vmem>>, vector<1x4x256xf32>
    %3 = vector.shape_cast %2 : vector<1x4x256xf32> to vector<4x256xf32>
    %c0_4 = arith.constant 0 : index
    %c34 = arith.constant 34 : index
    %4 = vector.load %arg17[%c0_4, %c34] : memref<4x324xf32, #tpu.memory_space<vmem>>, vector<4x256xf32>
    tpu.vector_store %arg17[%c0_4, %c34], %3 {strides = array<i32>} : memref<4x324xf32, #tpu.memory_space<vmem>>, vector<4x256xf32>,
    %cst_5 = arith.constant 0.000000e+00 : f32
    %5 = vector.broadcast %cst_5 : f32 to vector<8x256xf32>
    %cst_6 = arith.constant 0.000000e+00 : f32
    %6 = vector.broadcast %cst_6 : f32 to vector<8x256xf32>
    %c0_7 = arith.constant 0 : index
    %c0_8 = arith.constant 0 : index
    %7 = vector.load %arg17[%c0_7, %c0_8] : memref<4x324xf32, #tpu.memory_space<vmem>>, vector<4x256xf32>
    %c0_9 = arith.constant 0 : index
    %c0_10 = arith.constant 0 : index
    %c0_11 = arith.constant 0 : index
    %8 = vector.load %arg3[%c0_9, %c0_10, %c0_11] : memref<25x8x4xf32, #tpu.memory_space<vmem>>, vector<1x8x4xf32>
    %9 = vector.shape_cast %8 : vector<1x8x4xf32> to vector<8x4xf32>
    %cst_12 = arith.constant dense<0.000000e+00> : vector<8x256xf32>
    %10 = tpu.matmul %9, %7, %cst_12 {dimension_numbers = #tpu.dot_dimension_numbers<[1], [0], [0], [1], [0, 0, 1, 1], [], []>} : vector<8x4xf32>, vector<4x256xf32>, vector<8x256xf32> -> vector<8x256xf32>
    %11 = arith.addf %6, %10 : vector<8x256xf32>
    %c0_13 = arith.constant 0 : index
    %c16 = arith.constant 16 : index
    %12 = vector.load %arg17[%c0_13, %c16] : memref<4x324xf32, #tpu.memory_space<vmem>>, vector<4x256xf32>
    %c5 = arith.constant 5 : index
    %c0_14 = arith.constant 0 : index
    %c0_15 = arith.constant 0 : index
    %13 = vector.load %arg3[%c5, %c0_14, %c0_15] : memref<25x8x4xf32, #tpu.memory_space<vmem>>, vector<1x8x4xf32>
    %14 = vector.shape_cast %13 : vector<1x8x4xf32> to vector<8x4xf32>
    %cst_16 = arith.constant dense<0.000000e+00> : vector<8x256xf32>
    %15 = tpu.matmul %14, %12, %cst_16 {dimension_numbers = #tpu.dot_dimension_numbers<[1], [0], [0], [1], [0, 0, 1, 1], [], []>} : vector<8x4xf32>, vector<4x256xf32>, vector<8x256xf32> -> vector<8x256xf32>
    %16 = arith.addf %11, %15 : vector<8x256xf32>
    %c0_17 = arith.constant 0 : index
    %c32 = arith.constant 32 : index
    %17 = vector.load %arg17[%c0_17, %c32] : memref<4x324xf32, #tpu.memory_space<vmem>>, vector<4x256xf32>
    %c10 = arith.constant 10 : index
    %c0_18 = arith.constant 0 : index
    %c0_19 = arith.constant 0 : index
    %18 = vector.load %arg3[%c10, %c0_18, %c0_19] : memref<25x8x4xf32, #tpu.memory_space<vmem>>, vector<1x8x4xf32>
    %19 = vector.shape_cast %18 : vector<1x8x4xf32> to vector<8x4xf32>
    %cst_20 = arith.constant dense<0.000000e+00> : vector<8x256xf32>
    %20 = tpu.matmul %19, %17, %cst_20 {dimension_numbers = #tpu.dot_dimension_numbers<[1], [0], [0], [1], [0, 0, 1, 1], [], []>} : vector<8x4xf32>, vector<4x256xf32>, vector<8x256xf32> -> vector<8x256xf32>
    %21 = arith.addf %16, %20 : vector<8x256xf32>
    %c0_21 = arith.constant 0 : index
    %c48 = arith.constant 48 : index
    %22 = vector.load %arg17[%c0_21, %c48] : memref<4x324xf32, #tpu.memory_space<vmem>>, vector<4x256xf32>
    %c15 = arith.constant 15 : index
    %c0_22 = arith.constant 0 : index
    %c0_23 = arith.constant 0 : index
    %23 = vector.load %arg3[%c15, %c0_22, %c0_23] : memref<25x8x4xf32, #tpu.memory_space<vmem>>, vector<1x8x4xf32>
    %24 = vector.shape_cast %23 : vector<1x8x4xf32> to vector<8x4xf32>
    %cst_24 = arith.constant dense<0.000000e+00> : vector<8x256xf32>
    %25 = tpu.matmul %24, %22, %cst_24 {dimension_numbers = #tpu.dot_dimension_numbers<[1], [0], [0], [1], [0, 0, 1, 1], [], []>} : vector<8x4xf32>, vector<4x256xf32>, vector<8x256xf32> -> vector<8x256xf32>
    %26 = arith.addf %21, %25 : vector<8x256xf32>
    %c0_25 = arith.constant 0 : index
    %c64 = arith.constant 64 : index
    %27 = vector.load %arg17[%c0_25, %c64] : memref<4x324xf32, #tpu.memory_space<vmem>>, vector<4x256xf32>
    %c20 = arith.constant 20 : index
    %c0_26 = arith.constant 0 : index
    %c0_27 = arith.constant 0 : index
    %28 = vector.load %arg3[%c20, %c0_26, %c0_27] : memref<25x8x4xf32, #tpu.memory_space<vmem>>, vector<1x8x4xf32>
    %29 = vector.shape_cast %28 : vector<1x8x4xf32> to vector<8x4xf32>
    %cst_28 = arith.constant dense<0.000000e+00> : vector<8x256xf32>
    %30 = tpu.matmul %29, %27, %cst_28 {dimension_numbers = #tpu.dot_dimension_numbers<[1], [0], [0], [1], [0, 0, 1, 1], [], []>} : vector<8x4xf32>, vector<4x256xf32>, vector<8x256xf32> -> vector<8x256xf32>
    %31 = arith.addf %26, %30 : vector<8x256xf32>
    %c0_29 = arith.constant 0 : index
    %c0_30 = arith.constant 0 : index
    %c0_31 = arith.constant 0 : index
    %32 = vector.load %arg2[%c0_29, %c0_30, %c0_31] : memref<5x1x256xf32, #tpu.memory_space<vmem>>, vector<1x1x256xf32>
    %33 = vector.shape_cast %32 : vector<1x1x256xf32> to vector<1x256xf32>
    %34 = vector.broadcast %33 : vector<1x256xf32> to vector<8x256xf32>
    %35 = arith.mulf %34, %31 : vector<8x256xf32>
    %36 = arith.addf %5, %35 : vector<8x256xf32>
    %cst_32 = arith.constant 0.000000e+00 : f32
    %37 = vector.broadcast %cst_32 : f32 to vector<8x256xf32>
    %c0_33 = arith.constant 0 : index
    %c1 = arith.constant 1 : index
    %38 = vector.load %arg17[%c0_33, %c1] : memref<4x324xf32, #tpu.memory_space<vmem>>, vector<4x256xf32>
    %c1_34 = arith.constant 1 : index
    %c0_35 = arith.constant 0 : index
    %c0_36 = arith.constant 0 : index
    %39 = vector.load %arg3[%c1_34, %c0_35, %c0_36] : memref<25x8x4xf32, #tpu.memory_space<vmem>>, vector<1x8x4xf32>
    %40 = vector.shape_cast %39 : vector<1x8x4xf32> to vector<8x4xf32>
    %cst_37 = arith.constant dense<0.000000e+00> : vector<8x256xf32>
    %41 = tpu.matmul %40, %38, %cst_37 {dimension_numbers = #tpu.dot_dimension_numbers<[1], [0], [0], [1], [0, 0, 1, 1], [], []>} : vector<8x4xf32>, vector<4x256xf32>, vector<8x256xf32> -> vector<8x256xf32>
    %42 = arith.addf %37, %41 : vector<8x256xf32>
    %c0_38 = arith.constant 0 : index
    %c17 = arith.constant 17 : index
    %43 = vector.load %arg17[%c0_38, %c17] : memref<4x324xf32, #tpu.memory_space<vmem>>, vector<4x256xf32>
    %c6 = arith.constant 6 : index
    %c0_39 = arith.constant 0 : index
    %c0_40 = arith.constant 0 : index
    %44 = vector.load %arg3[%c6, %c0_39, %c0_40] : memref<25x8x4xf32, #tpu.memory_space<vmem>>, vector<1x8x4xf32>
    %45 = vector.shape_cast %44 : vector<1x8x4xf32> to vector<8x4xf32>
    %cst_41 = arith.constant dense<0.000000e+00> : vector<8x256xf32>
    %46 = tpu.matmul %45, %43, %cst_41 {dimension_numbers = #tpu.dot_dimension_numbers<[1], [0], [0], [1], [0, 0, 1, 1], [], []>} : vector<8x4xf32>, vector<4x256xf32>, vector<8x256xf32> -> vector<8x256xf32>
    %47 = arith.addf %42, %46 : vector<8x256xf32>
    %c0_42 = arith.constant 0 : index
    %c33 = arith.constant 33 : index
    %48 = vector.load %arg17[%c0_42, %c33] : memref<4x324xf32, #tpu.memory_space<vmem>>, vector<4x256xf32>
    %c11 = arith.constant 11 : index
    %c0_43 = arith.constant 0 : index
    %c0_44 = arith.constant 0 : index
    %49 = vector.load %arg3[%c11, %c0_43, %c0_44] : memref<25x8x4xf32, #tpu.memory_space<vmem>>, vector<1x8x4xf32>
    %50 = vector.shape_cast %49 : vector<1x8x4xf32> to vector<8x4xf32>
    %cst_45 = arith.constant dense<0.000000e+00> : vector<8x256xf32>
    %51 = tpu.matmul %50, %48, %cst_45 {dimension_numbers = #tpu.dot_dimension_numbers<[1], [0], [0], [1], [0, 0, 1, 1], [], []>} : vector<8x4xf32>, vector<4x256xf32>, vector<8x256xf32> -> vector<8x256xf32>
    %52 = arith.addf %47, %51 : vector<8x256xf32>
    %c0_46 = arith.constant 0 : index
    %c49 = arith.constant 49 : index
    %53 = vector.load %arg17[%c0_46, %c49] : memref<4x324xf32, #tpu.memory_space<vmem>>, vector<4x256xf32>
    %c16_47 = arith.constant 16 : index
    %c0_48 = arith.constant 0 : index
    %c0_49 = arith.constant 0 : index
    %54 = vector.load %arg3[%c16_47, %c0_48, %c0_49] : memref<25x8x4xf32, #tpu.memory_space<vmem>>, vector<1x8x4xf32>
    %55 = vector.shape_cast %54 : vector<1x8x4xf32> to vector<8x4xf32>
    %cst_50 = arith.constant dense<0.000000e+00> : vector<8x256xf32>
    %56 = tpu.matmul %55, %53, %cst_50 {dimension_numbers = #tpu.dot_dimension_numbers<[1], [0], [0], [1], [0, 0, 1, 1], [], []>} : vector<8x4xf32>, vector<4x256xf32>, vector<8x256xf32> -> vector<8x256xf32>
    %57 = arith.addf %52, %56 : vector<8x256xf32>
    %c0_51 = arith.constant 0 : index
    %c65 = arith.constant 65 : index
    %58 = vector.load %arg17[%c0_51, %c65] : memref<4x324xf32, #tpu.memory_space<vmem>>, vector<4x256xf32>
    %c21 = arith.constant 21 : index
    %c0_52 = arith.constant 0 : index
    %c0_53 = arith.constant 0 : index
    %59 = vector.load %arg3[%c21, %c0_52, %c0_53] : memref<25x8x4xf32, #tpu.memory_space<vmem>>, vector<1x8x4xf32>
    %60 = vector.shape_cast %59 : vector<1x8x4xf32> to vector<8x4xf32>
    %cst_54 = arith.constant dense<0.000000e+00> : vector<8x256xf32>
    %61 = tpu.matmul %60, %58, %cst_54 {dimension_numbers = #tpu.dot_dimension_numbers<[1], [0], [0], [1], [0, 0, 1, 1], [], []>} : vector<8x4xf32>, vector<4x256xf32>, vector<8x256xf32> -> vector<8x256xf32>
    %62 = arith.addf %57, %61 : vector<8x256xf32>
    %c1_55 = arith.constant 1 : index
    %c0_56 = arith.constant 0 : index
    %c0_57 = arith.constant 0 : index
    %63 = vector.load %arg2[%c1_55, %c0_56, %c0_57] : memref<5x1x256xf32, #tpu.memory_space<vmem>>, vector<1x1x256xf32>
    %64 = vector.shape_cast %63 : vector<1x1x256xf32> to vector<1x256xf32>
    %65 = vector.broadcast %64 : vector<1x256xf32> to vector<8x256xf32>
    %66 = arith.mulf %65, %62 : vector<8x256xf32>
    %67 = arith.addf %36, %66 : vector<8x256xf32>
    %cst_58 = arith.constant 0.000000e+00 : f32
    %68 = vector.broadcast %cst_58 : f32 to vector<8x256xf32>
    %c0_59 = arith.constant 0 : index
    %c2 = arith.constant 2 : index
    %69 = vector.load %arg17[%c0_59, %c2] : memref<4x324xf32, #tpu.memory_space<vmem>>, vector<4x256xf32>
    %c2_60 = arith.constant 2 : index
    %c0_61 = arith.constant 0 : index
    %c0_62 = arith.constant 0 : index
    %70 = vector.load %arg3[%c2_60, %c0_61, %c0_62] : memref<25x8x4xf32, #tpu.memory_space<vmem>>, vector<1x8x4xf32>
    %71 = vector.shape_cast %70 : vector<1x8x4xf32> to vector<8x4xf32>
    %cst_63 = arith.constant dense<0.000000e+00> : vector<8x256xf32>
    %72 = tpu.matmul %71, %69, %cst_63 {dimension_numbers = #tpu.dot_dimension_numbers<[1], [0], [0], [1], [0, 0, 1, 1], [], []>} : vector<8x4xf32>, vector<4x256xf32>, vector<8x256xf32> -> vector<8x256xf32>
    %73 = arith.addf %68, %72 : vector<8x256xf32>
    %c0_64 = arith.constant 0 : index
    %c18 = arith.constant 18 : index
    %74 = vector.load %arg17[%c0_64, %c18] : memref<4x324xf32, #tpu.memory_space<vmem>>, vector<4x256xf32>
    %c7 = arith.constant 7 : index
    %c0_65 = arith.constant 0 : index
    %c0_66 = arith.constant 0 : index
    %75 = vector.load %arg3[%c7, %c0_65, %c0_66] : memref<25x8x4xf32, #tpu.memory_space<vmem>>, vector<1x8x4xf32>
    %76 = vector.shape_cast %75 : vector<1x8x4xf32> to vector<8x4xf32>
    %cst_67 = arith.constant dense<0.000000e+00> : vector<8x256xf32>
    %77 = tpu.matmul %76, %74, %cst_67 {dimension_numbers = #tpu.dot_dimension_numbers<[1], [0], [0], [1], [0, 0, 1, 1], [], []>} : vector<8x4xf32>, vector<4x256xf32>, vector<8x256xf32> -> vector<8x256xf32>
    %78 = arith.addf %73, %77 : vector<8x256xf32>
    %c0_68 = arith.constant 0 : index
    %c34_69 = arith.constant 34 : index
    %79 = vector.load %arg17[%c0_68, %c34_69] : memref<4x324xf32, #tpu.memory_space<vmem>>, vector<4x256xf32>
    %c12 = arith.constant 12 : index
    %c0_70 = arith.constant 0 : index
    %c0_71 = arith.constant 0 : index
    %80 = vector.load %arg3[%c12, %c0_70, %c0_71] : memref<25x8x4xf32, #tpu.memory_space<vmem>>, vector<1x8x4xf32>
    %81 = vector.shape_cast %80 : vector<1x8x4xf32> to vector<8x4xf32>
    %cst_72 = arith.constant dense<0.000000e+00> : vector<8x256xf32>
    %82 = tpu.matmul %81, %79, %cst_72 {dimension_numbers = #tpu.dot_dimension_numbers<[1], [0], [0], [1], [0, 0, 1, 1], [], []>} : vector<8x4xf32>, vector<4x256xf32>, vector<8x256xf32> -> vector<8x256xf32>
    %83 = arith.addf %78, %82 : vector<8x256xf32>
    %c0_73 = arith.constant 0 : index
    %c50 = arith.constant 50 : index
    %84 = vector.load %arg17[%c0_73, %c50] : memref<4x324xf32, #tpu.memory_space<vmem>>, vector<4x256xf32>
    %c17_74 = arith.constant 17 : index
    %c0_75 = arith.constant 0 : index
    %c0_76 = arith.constant 0 : index
    %85 = vector.load %arg3[%c17_74, %c0_75, %c0_76] : memref<25x8x4xf32, #tpu.memory_space<vmem>>, vector<1x8x4xf32>
    %86 = vector.shape_cast %85 : vector<1x8x4xf32> to vector<8x4xf32>
    %cst_77 = arith.constant dense<0.000000e+00> : vector<8x256xf32>
    %87 = tpu.matmul %86, %84, %cst_77 {dimension_numbers = #tpu.dot_dimension_numbers<[1], [0], [0], [1], [0, 0, 1, 1], [], []>} : vector<8x4xf32>, vector<4x256xf32>, vector<8x256xf32> -> vector<8x256xf32>
    %88 = arith.addf %83, %87 : vector<8x256xf32>
    %c0_78 = arith.constant 0 : index
    %c66 = arith.constant 66 : index
    %89 = vector.load %arg17[%c0_78, %c66] : memref<4x324xf32, #tpu.memory_space<vmem>>, vector<4x256xf32>
    %c22 = arith.constant 22 : index
    %c0_79 = arith.constant 0 : index
    %c0_80 = arith.constant 0 : index
    %90 = vector.load %arg3[%c22, %c0_79, %c0_80] : memref<25x8x4xf32, #tpu.memory_space<vmem>>, vector<1x8x4xf32>
    %91 = vector.shape_cast %90 : vector<1x8x4xf32> to vector<8x4xf32>
    %cst_81 = arith.constant dense<0.000000e+00> : vector<8x256xf32>
    %92 = tpu.matmul %91, %89, %cst_81 {dimension_numbers = #tpu.dot_dimension_numbers<[1], [0], [0], [1], [0, 0, 1, 1], [], []>} : vector<8x4xf32>, vector<4x256xf32>, vector<8x256xf32> -> vector<8x256xf32>
    %93 = arith.addf %88, %92 : vector<8x256xf32>
    %c2_82 = arith.constant 2 : index
    %c0_83 = arith.constant 0 : index
    %c0_84 = arith.constant 0 : index
    %94 = vector.load %arg2[%c2_82, %c0_83, %c0_84] : memref<5x1x256xf32, #tpu.memory_space<vmem>>, vector<1x1x256xf32>
    %95 = vector.shape_cast %94 : vector<1x1x256xf32> to vector<1x256xf32>
    %96 = vector.broadcast %95 : vector<1x256xf32> to vector<8x256xf32>
    %97 = arith.mulf %96, %93 : vector<8x256xf32>
    %98 = arith.addf %67, %97 : vector<8x256xf32>
    %cst_85 = arith.constant 0.000000e+00 : f32
    %99 = vector.broadcast %cst_85 : f32 to vector<8x256xf32>
    %c0_86 = arith.constant 0 : index
    %c3 = arith.constant 3 : index
    %100 = vector.load %arg17[%c0_86, %c3] : memref<4x324xf32, #tpu.memory_space<vmem>>, vector<4x256xf32>
    %c3_87 = arith.constant 3 : index
    %c0_88 = arith.constant 0 : index
    %c0_89 = arith.constant 0 : index
    %101 = vector.load %arg3[%c3_87, %c0_88, %c0_89] : memref<25x8x4xf32, #tpu.memory_space<vmem>>, vector<1x8x4xf32>
    %102 = vector.shape_cast %101 : vector<1x8x4xf32> to vector<8x4xf32>
    %cst_90 = arith.constant dense<0.000000e+00> : vector<8x256xf32>
    %103 = tpu.matmul %102, %100, %cst_90 {dimension_numbers = #tpu.dot_dimension_numbers<[1], [0], [0], [1], [0, 0, 1, 1], [], []>} : vector<8x4xf32>, vector<4x256xf32>, vector<8x256xf32> -> vector<8x256xf32>
    %104 = arith.addf %99, %103 : vector<8x256xf32>
    %c0_91 = arith.constant 0 : index
    %c19 = arith.constant 19 : index
    %105 = vector.load %arg17[%c0_91, %c19] : memref<4x324xf32, #tpu.memory_space<vmem>>, vector<4x256xf32>
    %c8 = arith.constant 8 : index
    %c0_92 = arith.constant 0 : index
    %c0_93 = arith.constant 0 : index
    %106 = vector.load %arg3[%c8, %c0_92, %c0_93] : memref<25x8x4xf32, #tpu.memory_space<vmem>>, vector<1x8x4xf32>
    %107 = vector.shape_cast %106 : vector<1x8x4xf32> to vector<8x4xf32>
    %cst_94 = arith.constant dense<0.000000e+00> : vector<8x256xf32>
    %108 = tpu.matmul %107, %105, %cst_94 {dimension_numbers = #tpu.dot_dimension_numbers<[1], [0], [0], [1], [0, 0, 1, 1], [], []>} : vector<8x4xf32>, vector<4x256xf32>, vector<8x256xf32> -> vector<8x256xf32>
    %109 = arith.addf %104, %108 : vector<8x256xf32>
    %c0_95 = arith.constant 0 : index
    %c35 = arith.constant 35 : index
    %110 = vector.load %arg17[%c0_95, %c35] : memref<4x324xf32, #tpu.memory_space<vmem>>, vector<4x256xf32>
    %c13 = arith.constant 13 : index
    %c0_96 = arith.constant 0 : index
    %c0_97 = arith.constant 0 : index
    %111 = vector.load %arg3[%c13, %c0_96, %c0_97] : memref<25x8x4xf32, #tpu.memory_space<vmem>>, vector<1x8x4xf32>
    %112 = vector.shape_cast %111 : vector<1x8x4xf32> to vector<8x4xf32>
    %cst_98 = arith.constant dense<0.000000e+00> : vector<8x256xf32>
    %113 = tpu.matmul %112, %110, %cst_98 {dimension_numbers = #tpu.dot_dimension_numbers<[1], [0], [0], [1], [0, 0, 1, 1], [], []>} : vector<8x4xf32>, vector<4x256xf32>, vector<8x256xf32> -> vector<8x256xf32>
    %114 = arith.addf %109, %113 : vector<8x256xf32>
    %c0_99 = arith.constant 0 : index
    %c51 = arith.constant 51 : index
    %115 = vector.load %arg17[%c0_99, %c51] : memref<4x324xf32, #tpu.memory_space<vmem>>, vector<4x256xf32>
    %c18_100 = arith.constant 18 : index
    %c0_101 = arith.constant 0 : index
    %c0_102 = arith.constant 0 : index
    %116 = vector.load %arg3[%c18_100, %c0_101, %c0_102] : memref<25x8x4xf32, #tpu.memory_space<vmem>>, vector<1x8x4xf32>
    %117 = vector.shape_cast %116 : vector<1x8x4xf32> to vector<8x4xf32>
    %cst_103 = arith.constant dense<0.000000e+00> : vector<8x256xf32>
    %118 = tpu.matmul %117, %115, %cst_103 {dimension_numbers = #tpu.dot_dimension_numbers<[1], [0], [0], [1], [0, 0, 1, 1], [], []>} : vector<8x4xf32>, vector<4x256xf32>, vector<8x256xf32> -> vector<8x256xf32>
    %119 = arith.addf %114, %118 : vector<8x256xf32>
    %c0_104 = arith.constant 0 : index
    %c67 = arith.constant 67 : index
    %120 = vector.load %arg17[%c0_104, %c67] : memref<4x324xf32, #tpu.memory_space<vmem>>, vector<4x256xf32>
    %c23 = arith.constant 23 : index
    %c0_105 = arith.constant 0 : index
    %c0_106 = arith.constant 0 : index
    %121 = vector.load %arg3[%c23, %c0_105, %c0_106] : memref<25x8x4xf32, #tpu.memory_space<vmem>>, vector<1x8x4xf32>
    %122 = vector.shape_cast %121 : vector<1x8x4xf32> to vector<8x4xf32>
    %cst_107 = arith.constant dense<0.000000e+00> : vector<8x256xf32>
    %123 = tpu.matmul %122, %120, %cst_107 {dimension_numbers = #tpu.dot_dimension_numbers<[1], [0], [0], [1], [0, 0, 1, 1], [], []>} : vector<8x4xf32>, vector<4x256xf32>, vector<8x256xf32> -> vector<8x256xf32>
    %124 = arith.addf %119, %123 : vector<8x256xf32>
    %c3_108 = arith.constant 3 : index
    %c0_109 = arith.constant 0 : index
    %c0_110 = arith.constant 0 : index
    %125 = vector.load %arg2[%c3_108, %c0_109, %c0_110] : memref<5x1x256xf32, #tpu.memory_space<vmem>>, vector<1x1x256xf32>
    %126 = vector.shape_cast %125 : vector<1x1x256xf32> to vector<1x256xf32>
    %127 = vector.broadcast %126 : vector<1x256xf32> to vector<8x256xf32>
    %128 = arith.mulf %127, %124 : vector<8x256xf32>
    %129 = arith.addf %98, %128 : vector<8x256xf32>
    %cst_111 = arith.constant 0.000000e+00 : f32
    %130 = vector.broadcast %cst_111 : f32 to vector<8x256xf32>
    %c0_112 = arith.constant 0 : index
    %c4 = arith.constant 4 : index
    %131 = vector.load %arg17[%c0_112, %c4] : memref<4x324xf32, #tpu.memory_space<vmem>>, vector<4x256xf32>
    %c4_113 = arith.constant 4 : index
    %c0_114 = arith.constant 0 : index
    %c0_115 = arith.constant 0 : index
    %132 = vector.load %arg3[%c4_113, %c0_114, %c0_115] : memref<25x8x4xf32, #tpu.memory_space<vmem>>, vector<1x8x4xf32>
    %133 = vector.shape_cast %132 : vector<1x8x4xf32> to vector<8x4xf32>
    %cst_116 = arith.constant dense<0.000000e+00> : vector<8x256xf32>
    %134 = tpu.matmul %133, %131, %cst_116 {dimension_numbers = #tpu.dot_dimension_numbers<[1], [0], [0], [1], [0, 0, 1, 1], [], []>} : vector<8x4xf32>, vector<4x256xf32>, vector<8x256xf32> -> vector<8x256xf32>
    %135 = arith.addf %130, %134 : vector<8x256xf32>
    %c0_117 = arith.constant 0 : index
    %c20_118 = arith.constant 20 : index
    %136 = vector.load %arg17[%c0_117, %c20_118] : memref<4x324xf32, #tpu.memory_space<vmem>>, vector<4x256xf32>
    %c9 = arith.constant 9 : index
    %c0_119 = arith.constant 0 : index
    %c0_120 = arith.constant 0 : index
    %137 = vector.load %arg3[%c9, %c0_119, %c0_120] : memref<25x8x4xf32, #tpu.memory_space<vmem>>, vector<1x8x4xf32>
    %138 = vector.shape_cast %137 : vector<1x8x4xf32> to vector<8x4xf32>
    %cst_121 = arith.constant dense<0.000000e+00> : vector<8x256xf32>
    %139 = tpu.matmul %138, %136, %cst_121 {dimension_numbers = #tpu.dot_dimension_numbers<[1], [0], [0], [1], [0, 0, 1, 1], [], []>} : vector<8x4xf32>, vector<4x256xf32>, vector<8x256xf32> -> vector<8x256xf32>
    %140 = arith.addf %135, %139 : vector<8x256xf32>
    %c0_122 = arith.constant 0 : index
    %c36 = arith.constant 36 : index
    %141 = vector.load %arg17[%c0_122, %c36] : memref<4x324xf32, #tpu.memory_space<vmem>>, vector<4x256xf32>
    %c14 = arith.constant 14 : index
    %c0_123 = arith.constant 0 : index
    %c0_124 = arith.constant 0 : index
    %142 = vector.load %arg3[%c14, %c0_123, %c0_124] : memref<25x8x4xf32, #tpu.memory_space<vmem>>, vector<1x8x4xf32>
    %143 = vector.shape_cast %142 : vector<1x8x4xf32> to vector<8x4xf32>
    %cst_125 = arith.constant dense<0.000000e+00> : vector<8x256xf32>
    %144 = tpu.matmul %143, %141, %cst_125 {dimension_numbers = #tpu.dot_dimension_numbers<[1], [0], [0], [1], [0, 0, 1, 1], [], []>} : vector<8x4xf32>, vector<4x256xf32>, vector<8x256xf32> -> vector<8x256xf32>
    %145 = arith.addf %140, %144 : vector<8x256xf32>
    %c0_126 = arith.constant 0 : index
    %c52 = arith.constant 52 : index
    %146 = vector.load %arg17[%c0_126, %c52] : memref<4x324xf32, #tpu.memory_space<vmem>>, vector<4x256xf32>
    %c19_127 = arith.constant 19 : index
    %c0_128 = arith.constant 0 : index
    %c0_129 = arith.constant 0 : index
    %147 = vector.load %arg3[%c19_127, %c0_128, %c0_129] : memref<25x8x4xf32, #tpu.memory_space<vmem>>, vector<1x8x4xf32>
    %148 = vector.shape_cast %147 : vector<1x8x4xf32> to vector<8x4xf32>
    %cst_130 = arith.constant dense<0.000000e+00> : vector<8x256xf32>
    %149 = tpu.matmul %148, %146, %cst_130 {dimension_numbers = #tpu.dot_dimension_numbers<[1], [0], [0], [1], [0, 0, 1, 1], [], []>} : vector<8x4xf32>, vector<4x256xf32>, vector<8x256xf32> -> vector<8x256xf32>
    %150 = arith.addf %145, %149 : vector<8x256xf32>
    %c0_131 = arith.constant 0 : index
    %c68 = arith.constant 68 : index
    %151 = vector.load %arg17[%c0_131, %c68] : memref<4x324xf32, #tpu.memory_space<vmem>>, vector<4x256xf32>
    %c24 = arith.constant 24 : index
    %c0_132 = arith.constant 0 : index
    %c0_133 = arith.constant 0 : index
    %152 = vector.load %arg3[%c24, %c0_132, %c0_133] : memref<25x8x4xf32, #tpu.memory_space<vmem>>, vector<1x8x4xf32>
    %153 = vector.shape_cast %152 : vector<1x8x4xf32> to vector<8x4xf32>
    %cst_134 = arith.constant dense<0.000000e+00> : vector<8x256xf32>
    %154 = tpu.matmul %153, %151, %cst_134 {dimension_numbers = #tpu.dot_dimension_numbers<[1], [0], [0], [1], [0, 0, 1, 1], [], []>} : vector<8x4xf32>, vector<4x256xf32>, vector<8x256xf32> -> vector<8x256xf32>
    %155 = arith.addf %150, %154 : vector<8x256xf32>
    %c4_135 = arith.constant 4 : index
    %c0_136 = arith.constant 0 : index
    %c0_137 = arith.constant 0 : index
    %156 = vector.load %arg2[%c4_135, %c0_136, %c0_137] : memref<5x1x256xf32, #tpu.memory_space<vmem>>, vector<1x1x256xf32>
    %157 = vector.shape_cast %156 : vector<1x1x256xf32> to vector<1x256xf32>
    %158 = vector.broadcast %157 : vector<1x256xf32> to vector<8x256xf32>
    %159 = arith.mulf %158, %155 : vector<8x256xf32>
    %160 = arith.addf %129, %159 : vector<8x256xf32>
    %c0_138 = arith.constant 0 : index
    %c0_139 = arith.constant 0 : index
    %161 = vector.load %arg10[%c0_138, %c0_139] : memref<8x1xf32, #tpu.memory_space<vmem>>, vector<8x1xf32>
    %162 = vector.broadcast %161 : vector<8x1xf32> to vector<8x256xf32>
    %163 = arith.addf %160, %162 : vector<8x256xf32>
    %cst_140 = arith.constant 0.000000e+00 : f32
    %164 = vector.broadcast %cst_140 : f32 to vector<8x256xf32>
    %165 = arith.maximumf %163, %164 : vector<8x256xf32>
    %c0_141 = arith.constant 0 : index
    %c0_142 = arith.constant 0 : index
    %c0_143 = arith.constant 0 : index
    %166 = vector.load %arg16[%c0_141, %c0_142, %c0_143] : memref<1x32x256xf32, #tpu.memory_space<vmem>>, vector<1x8x256xf32>
    %167 = vector.shape_cast %166 : vector<1x8x256xf32> to vector<8x256xf32>
    %168 = vector.shape_cast %165 : vector<8x256xf32> to vector<1x8x256xf32>
    tpu.vector_store %arg16[%c0_141, %c0_142, %c0_143], %168 {strides = array<i32>} : memref<1x32x256xf32, #tpu.memory_space<vmem>>, vector<1x8x256xf32>,
    %cst_144 = arith.constant 0.000000e+00 : f32
    %169 = vector.broadcast %cst_144 : f32 to vector<8x324xf32>
    %c0_145 = arith.constant 0 : index
    %c0_146 = arith.constant 0 : index
    %170 = vector.load %arg18[%c0_145, %c0_146] : memref<8x324xf32, #tpu.memory_space<vmem>>, vector<8x324xf32>
    tpu.vector_store %arg18[%c0_145, %c0_146], %169 {strides = array<i32>} : memref<8x324xf32, #tpu.memory_space<vmem>>, vector<8x324xf32>,
    %c0_147 = arith.constant 0 : index
    %c34_148 = arith.constant 34 : index
    %171 = vector.load %arg18[%c0_147, %c34_148] : memref<8x324xf32, #tpu.memory_space<vmem>>, vector<8x256xf32>
    tpu.vector_store %arg18[%c0_147, %c34_148], %165 {strides = array<i32>} : memref<8x324xf32, #tpu.memory_space<vmem>>, vector<8x256xf32>,
    %cst_149 = arith.constant 0.000000e+00 : f32
    %172 = vector.broadcast %cst_149 : f32 to vector<8x256xf32>
    %cst_150 = arith.constant 0.000000e+00 : f32
    %173 = vector.broadcast %cst_150 : f32 to vector<8x256xf32>
    %cst_151 = arith.constant 0.000000e+00 : f32
    %174 = vector.broadcast %cst_151 : f32 to vector<8x256xf32>
    %cst_152 = arith.constant 0.000000e+00 : f32
    %175 = vector.broadcast %cst_152 : f32 to vector<8x256xf32>
    %c0_153 = arith.constant 0 : index
    %c0_154 = arith.constant 0 : index
    %176 = vector.load %arg18[%c0_153, %c0_154] : memref<8x324xf32, #tpu.memory_space<vmem>>, vector<8x256xf32>
    %c0_155 = arith.constant 0 : index
    %c0_156 = arith.constant 0 : index
    %c0_157 = arith.constant 0 : index
    %177 = vector.load %arg4[%c0_155, %c0_156, %c0_157] : memref<25x8x1xf32, #tpu.memory_space<vmem>>, vector<1x8x1xf32>
    %178 = vector.shape_cast %177 : vector<1x8x1xf32> to vector<8x1xf32>
    %179 = vector.broadcast %178 : vector<8x1xf32> to vector<8x256xf32>
    %180 = arith.mulf %176, %179 : vector<8x256xf32>
    %181 = arith.addf %174, %180 : vector<8x256xf32>
    %c0_158 = arith.constant 0 : index
    %c0_159 = arith.constant 0 : index
    %c0_160 = arith.constant 0 : index
    %182 = vector.load %arg5[%c0_158, %c0_159, %c0_160] : memref<25x8x1xf32, #tpu.memory_space<vmem>>, vector<1x8x1xf32>
    %183 = vector.shape_cast %182 : vector<1x8x1xf32> to vector<8x1xf32>
    %184 = vector.broadcast %183 : vector<8x1xf32> to vector<8x256xf32>
    %185 = arith.mulf %176, %184 : vector<8x256xf32>
    %186 = arith.addf %175, %185 : vector<8x256xf32>
    %c0_161 = arith.constant 0 : index
    %c16_162 = arith.constant 16 : index
    %187 = vector.load %arg18[%c0_161, %c16_162] : memref<8x324xf32, #tpu.memory_space<vmem>>, vector<8x256xf32>
    %c5_163 = arith.constant 5 : index
    %c0_164 = arith.constant 0 : index
    %c0_165 = arith.constant 0 : index
    %188 = vector.load %arg4[%c5_163, %c0_164, %c0_165] : memref<25x8x1xf32, #tpu.memory_space<vmem>>, vector<1x8x1xf32>
    %189 = vector.shape_cast %188 : vector<1x8x1xf32> to vector<8x1xf32>
    %190 = vector.broadcast %189 : vector<8x1xf32> to vector<8x256xf32>
    %191 = arith.mulf %187, %190 : vector<8x256xf32>
    %192 = arith.addf %181, %191 : vector<8x256xf32>
    %c5_166 = arith.constant 5 : index
    %c0_167 = arith.constant 0 : index
    %c0_168 = arith.constant 0 : index
    %193 = vector.load %arg5[%c5_166, %c0_167, %c0_168] : memref<25x8x1xf32, #tpu.memory_space<vmem>>, vector<1x8x1xf32>
    %194 = vector.shape_cast %193 : vector<1x8x1xf32> to vector<8x1xf32>
    %195 = vector.broadcast %194 : vector<8x1xf32> to vector<8x256xf32>
    %196 = arith.mulf %187, %195 : vector<8x256xf32>
    %197 = arith.addf %186, %196 : vector<8x256xf32>
    %c0_169 = arith.constant 0 : index
    %c32_170 = arith.constant 32 : index
    %198 = vector.load %arg18[%c0_169, %c32_170] : memref<8x324xf32, #tpu.memory_space<vmem>>, vector<8x256xf32>
    %c10_171 = arith.constant 10 : index
    %c0_172 = arith.constant 0 : index
    %c0_173 = arith.constant 0 : index
    %199 = vector.load %arg4[%c10_171, %c0_172, %c0_173] : memref<25x8x1xf32, #tpu.memory_space<vmem>>, vector<1x8x1xf32>
    %200 = vector.shape_cast %199 : vector<1x8x1xf32> to vector<8x1xf32>
    %201 = vector.broadcast %200 : vector<8x1xf32> to vector<8x256xf32>
    %202 = arith.mulf %198, %201 : vector<8x256xf32>
    %203 = arith.addf %192, %202 : vector<8x256xf32>
    %c10_174 = arith.constant 10 : index
    %c0_175 = arith.constant 0 : index
    %c0_176 = arith.constant 0 : index
    %204 = vector.load %arg5[%c10_174, %c0_175, %c0_176] : memref<25x8x1xf32, #tpu.memory_space<vmem>>, vector<1x8x1xf32>
    %205 = vector.shape_cast %204 : vector<1x8x1xf32> to vector<8x1xf32>
    %206 = vector.broadcast %205 : vector<8x1xf32> to vector<8x256xf32>
    %207 = arith.mulf %198, %206 : vector<8x256xf32>
    %208 = arith.addf %197, %207 : vector<8x256xf32>
    %c0_177 = arith.constant 0 : index
    %c48_178 = arith.constant 48 : index
    %209 = vector.load %arg18[%c0_177, %c48_178] : memref<8x324xf32, #tpu.memory_space<vmem>>, vector<8x256xf32>
    %c15_179 = arith.constant 15 : index
    %c0_180 = arith.constant 0 : index
    %c0_181 = arith.constant 0 : index
    %210 = vector.load %arg4[%c15_179, %c0_180, %c0_181] : memref<25x8x1xf32, #tpu.memory_space<vmem>>, vector<1x8x1xf32>
    %211 = vector.shape_cast %210 : vector<1x8x1xf32> to vector<8x1xf32>
    %212 = vector.broadcast %211 : vector<8x1xf32> to vector<8x256xf32>
    %213 = arith.mulf %209, %212 : vector<8x256xf32>
    %214 = arith.addf %203, %213 : vector<8x256xf32>
    %c15_182 = arith.constant 15 : index
    %c0_183 = arith.constant 0 : index
    %c0_184 = arith.constant 0 : index
    %215 = vector.load %arg5[%c15_182, %c0_183, %c0_184] : memref<25x8x1xf32, #tpu.memory_space<vmem>>, vector<1x8x1xf32>
    %216 = vector.shape_cast %215 : vector<1x8x1xf32> to vector<8x1xf32>
    %217 = vector.broadcast %216 : vector<8x1xf32> to vector<8x256xf32>
    %218 = arith.mulf %209, %217 : vector<8x256xf32>
    %219 = arith.addf %208, %218 : vector<8x256xf32>
    %c0_185 = arith.constant 0 : index
    %c64_186 = arith.constant 64 : index
    %220 = vector.load %arg18[%c0_185, %c64_186] : memref<8x324xf32, #tpu.memory_space<vmem>>, vector<8x256xf32>
    %c20_187 = arith.constant 20 : index
    %c0_188 = arith.constant 0 : index
    %c0_189 = arith.constant 0 : index
    %221 = vector.load %arg4[%c20_187, %c0_188, %c0_189] : memref<25x8x1xf32, #tpu.memory_space<vmem>>, vector<1x8x1xf32>
    %222 = vector.shape_cast %221 : vector<1x8x1xf32> to vector<8x1xf32>
    %223 = vector.broadcast %222 : vector<8x1xf32> to vector<8x256xf32>
    %224 = arith.mulf %220, %223 : vector<8x256xf32>
    %225 = arith.addf %214, %224 : vector<8x256xf32>
    %c20_190 = arith.constant 20 : index
    %c0_191 = arith.constant 0 : index
    %c0_192 = arith.constant 0 : index
    %226 = vector.load %arg5[%c20_190, %c0_191, %c0_192] : memref<25x8x1xf32, #tpu.memory_space<vmem>>, vector<1x8x1xf32>
    %227 = vector.shape_cast %226 : vector<1x8x1xf32> to vector<8x1xf32>
    %228 = vector.broadcast %227 : vector<8x1xf32> to vector<8x256xf32>
    %229 = arith.mulf %220, %228 : vector<8x256xf32>
    %230 = arith.addf %219, %229 : vector<8x256xf32>
    %c0_193 = arith.constant 0 : index
    %c0_194 = arith.constant 0 : index
    %c0_195 = arith.constant 0 : index
    %231 = vector.load %arg2[%c0_193, %c0_194, %c0_195] : memref<5x1x256xf32, #tpu.memory_space<vmem>>, vector<1x1x256xf32>
    %232 = vector.shape_cast %231 : vector<1x1x256xf32> to vector<1x256xf32>
    %233 = vector.broadcast %232 : vector<1x256xf32> to vector<8x256xf32>
    %234 = arith.mulf %233, %225 : vector<8x256xf32>
    %235 = arith.addf %172, %234 : vector<8x256xf32>
    %236 = vector.broadcast %232 : vector<1x256xf32> to vector<8x256xf32>
    %237 = arith.mulf %236, %230 : vector<8x256xf32>
    %238 = arith.addf %173, %237 : vector<8x256xf32>
    %cst_196 = arith.constant 0.000000e+00 : f32
    %239 = vector.broadcast %cst_196 : f32 to vector<8x256xf32>
    %cst_197 = arith.constant 0.000000e+00 : f32
    %240 = vector.broadcast %cst_197 : f32 to vector<8x256xf32>
    %c0_198 = arith.constant 0 : index
    %c1_199 = arith.constant 1 : index
    %241 = vector.load %arg18[%c0_198, %c1_199] : memref<8x324xf32, #tpu.memory_space<vmem>>, vector<8x256xf32>
    %c1_200 = arith.constant 1 : index
    %c0_201 = arith.constant 0 : index
    %c0_202 = arith.constant 0 : index
    %242 = vector.load %arg4[%c1_200, %c0_201, %c0_202] : memref<25x8x1xf32, #tpu.memory_space<vmem>>, vector<1x8x1xf32>
    %243 = vector.shape_cast %242 : vector<1x8x1xf32> to vector<8x1xf32>
    %244 = vector.broadcast %243 : vector<8x1xf32> to vector<8x256xf32>
    %245 = arith.mulf %241, %244 : vector<8x256xf32>
    %246 = arith.addf %239, %245 : vector<8x256xf32>
    %c1_203 = arith.constant 1 : index
    %c0_204 = arith.constant 0 : index
    %c0_205 = arith.constant 0 : index
    %247 = vector.load %arg5[%c1_203, %c0_204, %c0_205] : memref<25x8x1xf32, #tpu.memory_space<vmem>>, vector<1x8x1xf32>
    %248 = vector.shape_cast %247 : vector<1x8x1xf32> to vector<8x1xf32>
    %249 = vector.broadcast %248 : vector<8x1xf32> to vector<8x256xf32>
    %250 = arith.mulf %241, %249 : vector<8x256xf32>
    %251 = arith.addf %240, %250 : vector<8x256xf32>
    %c0_206 = arith.constant 0 : index
    %c17_207 = arith.constant 17 : index
    %252 = vector.load %arg18[%c0_206, %c17_207] : memref<8x324xf32, #tpu.memory_space<vmem>>, vector<8x256xf32>
    %c6_208 = arith.constant 6 : index
    %c0_209 = arith.constant 0 : index
    %c0_210 = arith.constant 0 : index
    %253 = vector.load %arg4[%c6_208, %c0_209, %c0_210] : memref<25x8x1xf32, #tpu.memory_space<vmem>>, vector<1x8x1xf32>
    %254 = vector.shape_cast %253 : vector<1x8x1xf32> to vector<8x1xf32>
    %255 = vector.broadcast %254 : vector<8x1xf32> to vector<8x256xf32>
    %256 = arith.mulf %252, %255 : vector<8x256xf32>
    %257 = arith.addf %246, %256 : vector<8x256xf32>
    %c6_211 = arith.constant 6 : index
    %c0_212 = arith.constant 0 : index
    %c0_213 = arith.constant 0 : index
    %258 = vector.load %arg5[%c6_211, %c0_212, %c0_213] : memref<25x8x1xf32, #tpu.memory_space<vmem>>, vector<1x8x1xf32>
    %259 = vector.shape_cast %258 : vector<1x8x1xf32> to vector<8x1xf32>
    %260 = vector.broadcast %259 : vector<8x1xf32> to vector<8x256xf32>
    %261 = arith.mulf %252, %260 : vector<8x256xf32>
    %262 = arith.addf %251, %261 : vector<8x256xf32>
    %c0_214 = arith.constant 0 : index
    %c33_215 = arith.constant 33 : index
    %263 = vector.load %arg18[%c0_214, %c33_215] : memref<8x324xf32, #tpu.memory_space<vmem>>, vector<8x256xf32>
    %c11_216 = arith.constant 11 : index
    %c0_217 = arith.constant 0 : index
    %c0_218 = arith.constant 0 : index
    %264 = vector.load %arg4[%c11_216, %c0_217, %c0_218] : memref<25x8x1xf32, #tpu.memory_space<vmem>>, vector<1x8x1xf32>
    %265 = vector.shape_cast %264 : vector<1x8x1xf32> to vector<8x1xf32>
    %266 = vector.broadcast %265 : vector<8x1xf32> to vector<8x256xf32>
    %267 = arith.mulf %263, %266 : vector<8x256xf32>
    %268 = arith.addf %257, %267 : vector<8x256xf32>
    %c11_219 = arith.constant 11 : index
    %c0_220 = arith.constant 0 : index
    %c0_221 = arith.constant 0 : index
    %269 = vector.load %arg5[%c11_219, %c0_220, %c0_221] : memref<25x8x1xf32, #tpu.memory_space<vmem>>, vector<1x8x1xf32>
    %270 = vector.shape_cast %269 : vector<1x8x1xf32> to vector<8x1xf32>
    %271 = vector.broadcast %270 : vector<8x1xf32> to vector<8x256xf32>
    %272 = arith.mulf %263, %271 : vector<8x256xf32>
    %273 = arith.addf %262, %272 : vector<8x256xf32>
    %c0_222 = arith.constant 0 : index
    %c49_223 = arith.constant 49 : index
    %274 = vector.load %arg18[%c0_222, %c49_223] : memref<8x324xf32, #tpu.memory_space<vmem>>, vector<8x256xf32>
    %c16_224 = arith.constant 16 : index
    %c0_225 = arith.constant 0 : index
    %c0_226 = arith.constant 0 : index
    %275 = vector.load %arg4[%c16_224, %c0_225, %c0_226] : memref<25x8x1xf32, #tpu.memory_space<vmem>>, vector<1x8x1xf32>
    %276 = vector.shape_cast %275 : vector<1x8x1xf32> to vector<8x1xf32>
    %277 = vector.broadcast %276 : vector<8x1xf32> to vector<8x256xf32>
    %278 = arith.mulf %274, %277 : vector<8x256xf32>
    %279 = arith.addf %268, %278 : vector<8x256xf32>
    %c16_227 = arith.constant 16 : index
    %c0_228 = arith.constant 0 : index
    %c0_229 = arith.constant 0 : index
    %280 = vector.load %arg5[%c16_227, %c0_228, %c0_229] : memref<25x8x1xf32, #tpu.memory_space<vmem>>, vector<1x8x1xf32>
    %281 = vector.shape_cast %280 : vector<1x8x1xf32> to vector<8x1xf32>
    %282 = vector.broadcast %281 : vector<8x1xf32> to vector<8x256xf32>
    %283 = arith.mulf %274, %282 : vector<8x256xf32>
    %284 = arith.addf %273, %283 : vector<8x256xf32>
    %c0_230 = arith.constant 0 : index
    %c65_231 = arith.constant 65 : index
    %285 = vector.load %arg18[%c0_230, %c65_231] : memref<8x324xf32, #tpu.memory_space<vmem>>, vector<8x256xf32>
    %c21_232 = arith.constant 21 : index
    %c0_233 = arith.constant 0 : index
    %c0_234 = arith.constant 0 : index
    %286 = vector.load %arg4[%c21_232, %c0_233, %c0_234] : memref<25x8x1xf32, #tpu.memory_space<vmem>>, vector<1x8x1xf32>
    %287 = vector.shape_cast %286 : vector<1x8x1xf32> to vector<8x1xf32>
    %288 = vector.broadcast %287 : vector<8x1xf32> to vector<8x256xf32>
    %289 = arith.mulf %285, %288 : vector<8x256xf32>
    %290 = arith.addf %279, %289 : vector<8x256xf32>
    %c21_235 = arith.constant 21 : index
    %c0_236 = arith.constant 0 : index
    %c0_237 = arith.constant 0 : index
    %291 = vector.load %arg5[%c21_235, %c0_236, %c0_237] : memref<25x8x1xf32, #tpu.memory_space<vmem>>, vector<1x8x1xf32>
    %292 = vector.shape_cast %291 : vector<1x8x1xf32> to vector<8x1xf32>
    %293 = vector.broadcast %292 : vector<8x1xf32> to vector<8x256xf32>
    %294 = arith.mulf %285, %293 : vector<8x256xf32>
    %295 = arith.addf %284, %294 : vector<8x256xf32>
    %c1_238 = arith.constant 1 : index
    %c0_239 = arith.constant 0 : index
    %c0_240 = arith.constant 0 : index
    %296 = vector.load %arg2[%c1_238, %c0_239, %c0_240] : memref<5x1x256xf32, #tpu.memory_space<vmem>>, vector<1x1x256xf32>
    %297 = vector.shape_cast %296 : vector<1x1x256xf32> to vector<1x256xf32>
    %298 = vector.broadcast %297 : vector<1x256xf32> to vector<8x256xf32>
    %299 = arith.mulf %298, %290 : vector<8x256xf32>
    %300 = arith.addf %235, %299 : vector<8x256xf32>
    %301 = vector.broadcast %297 : vector<1x256xf32> to vector<8x256xf32>
    %302 = arith.mulf %301, %295 : vector<8x256xf32>
    %303 = arith.addf %238, %302 : vector<8x256xf32>
    %cst_241 = arith.constant 0.000000e+00 : f32
    %304 = vector.broadcast %cst_241 : f32 to vector<8x256xf32>
    %cst_242 = arith.constant 0.000000e+00 : f32
    %305 = vector.broadcast %cst_242 : f32 to vector<8x256xf32>
    %c0_243 = arith.constant 0 : index
    %c2_244 = arith.constant 2 : index
    %306 = vector.load %arg18[%c0_243, %c2_244] : memref<8x324xf32, #tpu.memory_space<vmem>>, vector<8x256xf32>
    %c2_245 = arith.constant 2 : index
    %c0_246 = arith.constant 0 : index
    %c0_247 = arith.constant 0 : index
    %307 = vector.load %arg4[%c2_245, %c0_246, %c0_247] : memref<25x8x1xf32, #tpu.memory_space<vmem>>, vector<1x8x1xf32>
    %308 = vector.shape_cast %307 : vector<1x8x1xf32> to vector<8x1xf32>
    %309 = vector.broadcast %308 : vector<8x1xf32> to vector<8x256xf32>
    %310 = arith.mulf %306, %309 : vector<8x256xf32>
    %311 = arith.addf %304, %310 : vector<8x256xf32>
    %c2_248 = arith.constant 2 : index
    %c0_249 = arith.constant 0 : index
    %c0_250 = arith.constant 0 : index
    %312 = vector.load %arg5[%c2_248, %c0_249, %c0_250] : memref<25x8x1xf32, #tpu.memory_space<vmem>>, vector<1x8x1xf32>
    %313 = vector.shape_cast %312 : vector<1x8x1xf32> to vector<8x1xf32>
    %314 = vector.broadcast %313 : vector<8x1xf32> to vector<8x256xf32>
    %315 = arith.mulf %306, %314 : vector<8x256xf32>
    %316 = arith.addf %305, %315 : vector<8x256xf32>
    %c0_251 = arith.constant 0 : index
    %c18_252 = arith.constant 18 : index
    %317 = vector.load %arg18[%c0_251, %c18_252] : memref<8x324xf32, #tpu.memory_space<vmem>>, vector<8x256xf32>
    %c7_253 = arith.constant 7 : index
    %c0_254 = arith.constant 0 : index
    %c0_255 = arith.constant 0 : index
    %318 = vector.load %arg4[%c7_253, %c0_254, %c0_255] : memref<25x8x1xf32, #tpu.memory_space<vmem>>, vector<1x8x1xf32>
    %319 = vector.shape_cast %318 : vector<1x8x1xf32> to vector<8x1xf32>
    %320 = vector.broadcast %319 : vector<8x1xf32> to vector<8x256xf32>
    %321 = arith.mulf %317, %320 : vector<8x256xf32>
    %322 = arith.addf %311, %321 : vector<8x256xf32>
    %c7_256 = arith.constant 7 : index
    %c0_257 = arith.constant 0 : index
    %c0_258 = arith.constant 0 : index
    %323 = vector.load %arg5[%c7_256, %c0_257, %c0_258] : memref<25x8x1xf32, #tpu.memory_space<vmem>>, vector<1x8x1xf32>
    %324 = vector.shape_cast %323 : vector<1x8x1xf32> to vector<8x1xf32>
    %325 = vector.broadcast %324 : vector<8x1xf32> to vector<8x256xf32>
    %326 = arith.mulf %317, %325 : vector<8x256xf32>
    %327 = arith.addf %316, %326 : vector<8x256xf32>
    %c0_259 = arith.constant 0 : index
    %c34_260 = arith.constant 34 : index
    %328 = vector.load %arg18[%c0_259, %c34_260] : memref<8x324xf32, #tpu.memory_space<vmem>>, vector<8x256xf32>
    %c12_261 = arith.constant 12 : index
    %c0_262 = arith.constant 0 : index
    %c0_263 = arith.constant 0 : index
    %329 = vector.load %arg4[%c12_261, %c0_262, %c0_263] : memref<25x8x1xf32, #tpu.memory_space<vmem>>, vector<1x8x1xf32>
    %330 = vector.shape_cast %329 : vector<1x8x1xf32> to vector<8x1xf32>
    %331 = vector.broadcast %330 : vector<8x1xf32> to vector<8x256xf32>
    %332 = arith.mulf %328, %331 : vector<8x256xf32>
    %333 = arith.addf %322, %332 : vector<8x256xf32>
    %c12_264 = arith.constant 12 : index
    %c0_265 = arith.constant 0 : index
    %c0_266 = arith.constant 0 : index
    %334 = vector.load %arg5[%c12_264, %c0_265, %c0_266] : memref<25x8x1xf32, #tpu.memory_space<vmem>>, vector<1x8x1xf32>
    %335 = vector.shape_cast %334 : vector<1x8x1xf32> to vector<8x1xf32>
    %336 = vector.broadcast %335 : vector<8x1xf32> to vector<8x256xf32>
    %337 = arith.mulf %328, %336 : vector<8x256xf32>
    %338 = arith.addf %327, %337 : vector<8x256xf32>
    %c0_267 = arith.constant 0 : index
    %c50_268 = arith.constant 50 : index
    %339 = vector.load %arg18[%c0_267, %c50_268] : memref<8x324xf32, #tpu.memory_space<vmem>>, vector<8x256xf32>
    %c17_269 = arith.constant 17 : index
    %c0_270 = arith.constant 0 : index
    %c0_271 = arith.constant 0 : index
    %340 = vector.load %arg4[%c17_269, %c0_270, %c0_271] : memref<25x8x1xf32, #tpu.memory_space<vmem>>, vector<1x8x1xf32>
    %341 = vector.shape_cast %340 : vector<1x8x1xf32> to vector<8x1xf32>
    %342 = vector.broadcast %341 : vector<8x1xf32> to vector<8x256xf32>
    %343 = arith.mulf %339, %342 : vector<8x256xf32>
    %344 = arith.addf %333, %343 : vector<8x256xf32>
    %c17_272 = arith.constant 17 : index
    %c0_273 = arith.constant 0 : index
    %c0_274 = arith.constant 0 : index
    %345 = vector.load %arg5[%c17_272, %c0_273, %c0_274] : memref<25x8x1xf32, #tpu.memory_space<vmem>>, vector<1x8x1xf32>
    %346 = vector.shape_cast %345 : vector<1x8x1xf32> to vector<8x1xf32>
    %347 = vector.broadcast %346 : vector<8x1xf32> to vector<8x256xf32>
    %348 = arith.mulf %339, %347 : vector<8x256xf32>
    %349 = arith.addf %338, %348 : vector<8x256xf32>
    %c0_275 = arith.constant 0 : index
    %c66_276 = arith.constant 66 : index
    %350 = vector.load %arg18[%c0_275, %c66_276] : memref<8x324xf32, #tpu.memory_space<vmem>>, vector<8x256xf32>
    %c22_277 = arith.constant 22 : index
    %c0_278 = arith.constant 0 : index
    %c0_279 = arith.constant 0 : index
    %351 = vector.load %arg4[%c22_277, %c0_278, %c0_279] : memref<25x8x1xf32, #tpu.memory_space<vmem>>, vector<1x8x1xf32>
    %352 = vector.shape_cast %351 : vector<1x8x1xf32> to vector<8x1xf32>
    %353 = vector.broadcast %352 : vector<8x1xf32> to vector<8x256xf32>
    %354 = arith.mulf %350, %353 : vector<8x256xf32>
    %355 = arith.addf %344, %354 : vector<8x256xf32>
    %c22_280 = arith.constant 22 : index
    %c0_281 = arith.constant 0 : index
    %c0_282 = arith.constant 0 : index
    %356 = vector.load %arg5[%c22_280, %c0_281, %c0_282] : memref<25x8x1xf32, #tpu.memory_space<vmem>>, vector<1x8x1xf32>
    %357 = vector.shape_cast %356 : vector<1x8x1xf32> to vector<8x1xf32>
    %358 = vector.broadcast %357 : vector<8x1xf32> to vector<8x256xf32>
    %359 = arith.mulf %350, %358 : vector<8x256xf32>
    %360 = arith.addf %349, %359 : vector<8x256xf32>
    %c2_283 = arith.constant 2 : index
    %c0_284 = arith.constant 0 : index
    %c0_285 = arith.constant 0 : index
    %361 = vector.load %arg2[%c2_283, %c0_284, %c0_285] : memref<5x1x256xf32, #tpu.memory_space<vmem>>, vector<1x1x256xf32>
    %362 = vector.shape_cast %361 : vector<1x1x256xf32> to vector<1x256xf32>
    %363 = vector.broadcast %362 : vector<1x256xf32> to vector<8x256xf32>
    %364 = arith.mulf %363, %355 : vector<8x256xf32>
    %365 = arith.addf %300, %364 : vector<8x256xf32>
    %366 = vector.broadcast %362 : vector<1x256xf32> to vector<8x256xf32>
    %367 = arith.mulf %366, %360 : vector<8x256xf32>
    %368 = arith.addf %303, %367 : vector<8x256xf32>
    %cst_286 = arith.constant 0.000000e+00 : f32
    %369 = vector.broadcast %cst_286 : f32 to vector<8x256xf32>
    %cst_287 = arith.constant 0.000000e+00 : f32
    %370 = vector.broadcast %cst_287 : f32 to vector<8x256xf32>
    %c0_288 = arith.constant 0 : index
    %c3_289 = arith.constant 3 : index
    %371 = vector.load %arg18[%c0_288, %c3_289] : memref<8x324xf32, #tpu.memory_space<vmem>>, vector<8x256xf32>
    %c3_290 = arith.constant 3 : index
    %c0_291 = arith.constant 0 : index
    %c0_292 = arith.constant 0 : index
    %372 = vector.load %arg4[%c3_290, %c0_291, %c0_292] : memref<25x8x1xf32, #tpu.memory_space<vmem>>, vector<1x8x1xf32>
    %373 = vector.shape_cast %372 : vector<1x8x1xf32> to vector<8x1xf32>
    %374 = vector.broadcast %373 : vector<8x1xf32> to vector<8x256xf32>
    %375 = arith.mulf %371, %374 : vector<8x256xf32>
    %376 = arith.addf %369, %375 : vector<8x256xf32>
    %c3_293 = arith.constant 3 : index
    %c0_294 = arith.constant 0 : index
    %c0_295 = arith.constant 0 : index
    %377 = vector.load %arg5[%c3_293, %c0_294, %c0_295] : memref<25x8x1xf32, #tpu.memory_space<vmem>>, vector<1x8x1xf32>
    %378 = vector.shape_cast %377 : vector<1x8x1xf32> to vector<8x1xf32>
    %379 = vector.broadcast %378 : vector<8x1xf32> to vector<8x256xf32>
    %380 = arith.mulf %371, %379 : vector<8x256xf32>
    %381 = arith.addf %370, %380 : vector<8x256xf32>
    %c0_296 = arith.constant 0 : index
    %c19_297 = arith.constant 19 : index
    %382 = vector.load %arg18[%c0_296, %c19_297] : memref<8x324xf32, #tpu.memory_space<vmem>>, vector<8x256xf32>
    %c8_298 = arith.constant 8 : index
    %c0_299 = arith.constant 0 : index
    %c0_300 = arith.constant 0 : index
    %383 = vector.load %arg4[%c8_298, %c0_299, %c0_300] : memref<25x8x1xf32, #tpu.memory_space<vmem>>, vector<1x8x1xf32>
    %384 = vector.shape_cast %383 : vector<1x8x1xf32> to vector<8x1xf32>
    %385 = vector.broadcast %384 : vector<8x1xf32> to vector<8x256xf32>
    %386 = arith.mulf %382, %385 : vector<8x256xf32>
    %387 = arith.addf %376, %386 : vector<8x256xf32>
    %c8_301 = arith.constant 8 : index
    %c0_302 = arith.constant 0 : index
    %c0_303 = arith.constant 0 : index
    %388 = vector.load %arg5[%c8_301, %c0_302, %c0_303] : memref<25x8x1xf32, #tpu.memory_space<vmem>>, vector<1x8x1xf32>
    %389 = vector.shape_cast %388 : vector<1x8x1xf32> to vector<8x1xf32>
    %390 = vector.broadcast %389 : vector<8x1xf32> to vector<8x256xf32>
    %391 = arith.mulf %382, %390 : vector<8x256xf32>
    %392 = arith.addf %381, %391 : vector<8x256xf32>
    %c0_304 = arith.constant 0 : index
    %c35_305 = arith.constant 35 : index
    %393 = vector.load %arg18[%c0_304, %c35_305] : memref<8x324xf32, #tpu.memory_space<vmem>>, vector<8x256xf32>
    %c13_306 = arith.constant 13 : index
    %c0_307 = arith.constant 0 : index
    %c0_308 = arith.constant 0 : index
    %394 = vector.load %arg4[%c13_306, %c0_307, %c0_308] : memref<25x8x1xf32, #tpu.memory_space<vmem>>, vector<1x8x1xf32>
    %395 = vector.shape_cast %394 : vector<1x8x1xf32> to vector<8x1xf32>
    %396 = vector.broadcast %395 : vector<8x1xf32> to vector<8x256xf32>
    %397 = arith.mulf %393, %396 : vector<8x256xf32>
    %398 = arith.addf %387, %397 : vector<8x256xf32>
    %c13_309 = arith.constant 13 : index
    %c0_310 = arith.constant 0 : index
    %c0_311 = arith.constant 0 : index
    %399 = vector.load %arg5[%c13_309, %c0_310, %c0_311] : memref<25x8x1xf32, #tpu.memory_space<vmem>>, vector<1x8x1xf32>
    %400 = vector.shape_cast %399 : vector<1x8x1xf32> to vector<8x1xf32>
    %401 = vector.broadcast %400 : vector<8x1xf32> to vector<8x256xf32>
    %402 = arith.mulf %393, %401 : vector<8x256xf32>
    %403 = arith.addf %392, %402 : vector<8x256xf32>
    %c0_312 = arith.constant 0 : index
    %c51_313 = arith.constant 51 : index
    %404 = vector.load %arg18[%c0_312, %c51_313] : memref<8x324xf32, #tpu.memory_space<vmem>>, vector<8x256xf32>
    %c18_314 = arith.constant 18 : index
    %c0_315 = arith.constant 0 : index
    %c0_316 = arith.constant 0 : index
    %405 = vector.load %arg4[%c18_314, %c0_315, %c0_316] : memref<25x8x1xf32, #tpu.memory_space<vmem>>, vector<1x8x1xf32>
    %406 = vector.shape_cast %405 : vector<1x8x1xf32> to vector<8x1xf32>
    %407 = vector.broadcast %406 : vector<8x1xf32> to vector<8x256xf32>
    %408 = arith.mulf %404, %407 : vector<8x256xf32>
    %409 = arith.addf %398, %408 : vector<8x256xf32>
    %c18_317 = arith.constant 18 : index
    %c0_318 = arith.constant 0 : index
    %c0_319 = arith.constant 0 : index
    %410 = vector.load %arg5[%c18_317, %c0_318, %c0_319] : memref<25x8x1xf32, #tpu.memory_space<vmem>>, vector<1x8x1xf32>
    %411 = vector.shape_cast %410 : vector<1x8x1xf32> to vector<8x1xf32>
    %412 = vector.broadcast %411 : vector<8x1xf32> to vector<8x256xf32>
    %413 = arith.mulf %404, %412 : vector<8x256xf32>
    %414 = arith.addf %403, %413 : vector<8x256xf32>
    %c0_320 = arith.constant 0 : index
    %c67_321 = arith.constant 67 : index
    %415 = vector.load %arg18[%c0_320, %c67_321] : memref<8x324xf32, #tpu.memory_space<vmem>>, vector<8x256xf32>
    %c23_322 = arith.constant 23 : index
    %c0_323 = arith.constant 0 : index
    %c0_324 = arith.constant 0 : index
    %416 = vector.load %arg4[%c23_322, %c0_323, %c0_324] : memref<25x8x1xf32, #tpu.memory_space<vmem>>, vector<1x8x1xf32>
    %417 = vector.shape_cast %416 : vector<1x8x1xf32> to vector<8x1xf32>
    %418 = vector.broadcast %417 : vector<8x1xf32> to vector<8x256xf32>
    %419 = arith.mulf %415, %418 : vector<8x256xf32>
    %420 = arith.addf %409, %419 : vector<8x256xf32>
    %c23_325 = arith.constant 23 : index
    %c0_326 = arith.constant 0 : index
    %c0_327 = arith.constant 0 : index
    %421 = vector.load %arg5[%c23_325, %c0_326, %c0_327] : memref<25x8x1xf32, #tpu.memory_space<vmem>>, vector<1x8x1xf32>
    %422 = vector.shape_cast %421 : vector<1x8x1xf32> to vector<8x1xf32>
    %423 = vector.broadcast %422 : vector<8x1xf32> to vector<8x256xf32>
    %424 = arith.mulf %415, %423 : vector<8x256xf32>
    %425 = arith.addf %414, %424 : vector<8x256xf32>
    %c3_328 = arith.constant 3 : index
    %c0_329 = arith.constant 0 : index
    %c0_330 = arith.constant 0 : index
    %426 = vector.load %arg2[%c3_328, %c0_329, %c0_330] : memref<5x1x256xf32, #tpu.memory_space<vmem>>, vector<1x1x256xf32>
    %427 = vector.shape_cast %426 : vector<1x1x256xf32> to vector<1x256xf32>
    %428 = vector.broadcast %427 : vector<1x256xf32> to vector<8x256xf32>
    %429 = arith.mulf %428, %420 : vector<8x256xf32>
    %430 = arith.addf %365, %429 : vector<8x256xf32>
    %431 = vector.broadcast %427 : vector<1x256xf32> to vector<8x256xf32>
    %432 = arith.mulf %431, %425 : vector<8x256xf32>
    %433 = arith.addf %368, %432 : vector<8x256xf32>
    %cst_331 = arith.constant 0.000000e+00 : f32
    %434 = vector.broadcast %cst_331 : f32 to vector<8x256xf32>
    %cst_332 = arith.constant 0.000000e+00 : f32
    %435 = vector.broadcast %cst_332 : f32 to vector<8x256xf32>
    %c0_333 = arith.constant 0 : index
    %c4_334 = arith.constant 4 : index
    %436 = vector.load %arg18[%c0_333, %c4_334] : memref<8x324xf32, #tpu.memory_space<vmem>>, vector<8x256xf32>
    %c4_335 = arith.constant 4 : index
    %c0_336 = arith.constant 0 : index
    %c0_337 = arith.constant 0 : index
    %437 = vector.load %arg4[%c4_335, %c0_336, %c0_337] : memref<25x8x1xf32, #tpu.memory_space<vmem>>, vector<1x8x1xf32>
    %438 = vector.shape_cast %437 : vector<1x8x1xf32> to vector<8x1xf32>
    %439 = vector.broadcast %438 : vector<8x1xf32> to vector<8x256xf32>
    %440 = arith.mulf %436, %439 : vector<8x256xf32>
    %441 = arith.addf %434, %440 : vector<8x256xf32>
    %c4_338 = arith.constant 4 : index
    %c0_339 = arith.constant 0 : index
    %c0_340 = arith.constant 0 : index
    %442 = vector.load %arg5[%c4_338, %c0_339, %c0_340] : memref<25x8x1xf32, #tpu.memory_space<vmem>>, vector<1x8x1xf32>
    %443 = vector.shape_cast %442 : vector<1x8x1xf32> to vector<8x1xf32>
    %444 = vector.broadcast %443 : vector<8x1xf32> to vector<8x256xf32>
    %445 = arith.mulf %436, %444 : vector<8x256xf32>
    %446 = arith.addf %435, %445 : vector<8x256xf32>
    %c0_341 = arith.constant 0 : index
    %c20_342 = arith.constant 20 : index
    %447 = vector.load %arg18[%c0_341, %c20_342] : memref<8x324xf32, #tpu.memory_space<vmem>>, vector<8x256xf32>
    %c9_343 = arith.constant 9 : index
    %c0_344 = arith.constant 0 : index
    %c0_345 = arith.constant 0 : index
    %448 = vector.load %arg4[%c9_343, %c0_344, %c0_345] : memref<25x8x1xf32, #tpu.memory_space<vmem>>, vector<1x8x1xf32>
    %449 = vector.shape_cast %448 : vector<1x8x1xf32> to vector<8x1xf32>
    %450 = vector.broadcast %449 : vector<8x1xf32> to vector<8x256xf32>
    %451 = arith.mulf %447, %450 : vector<8x256xf32>
    %452 = arith.addf %441, %451 : vector<8x256xf32>
    %c9_346 = arith.constant 9 : index
    %c0_347 = arith.constant 0 : index
    %c0_348 = arith.constant 0 : index
    %453 = vector.load %arg5[%c9_346, %c0_347, %c0_348] : memref<25x8x1xf32, #tpu.memory_space<vmem>>, vector<1x8x1xf32>
    %454 = vector.shape_cast %453 : vector<1x8x1xf32> to vector<8x1xf32>
    %455 = vector.broadcast %454 : vector<8x1xf32> to vector<8x256xf32>
    %456 = arith.mulf %447, %455 : vector<8x256xf32>
    %457 = arith.addf %446, %456 : vector<8x256xf32>
    %c0_349 = arith.constant 0 : index
    %c36_350 = arith.constant 36 : index
    %458 = vector.load %arg18[%c0_349, %c36_350] : memref<8x324xf32, #tpu.memory_space<vmem>>, vector<8x256xf32>
    %c14_351 = arith.constant 14 : index
    %c0_352 = arith.constant 0 : index
    %c0_353 = arith.constant 0 : index
    %459 = vector.load %arg4[%c14_351, %c0_352, %c0_353] : memref<25x8x1xf32, #tpu.memory_space<vmem>>, vector<1x8x1xf32>
    %460 = vector.shape_cast %459 : vector<1x8x1xf32> to vector<8x1xf32>
    %461 = vector.broadcast %460 : vector<8x1xf32> to vector<8x256xf32>
    %462 = arith.mulf %458, %461 : vector<8x256xf32>
    %463 = arith.addf %452, %462 : vector<8x256xf32>
    %c14_354 = arith.constant 14 : index
    %c0_355 = arith.constant 0 : index
    %c0_356 = arith.constant 0 : index
    %464 = vector.load %arg5[%c14_354, %c0_355, %c0_356] : memref<25x8x1xf32, #tpu.memory_space<vmem>>, vector<1x8x1xf32>
    %465 = vector.shape_cast %464 : vector<1x8x1xf32> to vector<8x1xf32>
    %466 = vector.broadcast %465 : vector<8x1xf32> to vector<8x256xf32>
    %467 = arith.mulf %458, %466 : vector<8x256xf32>
    %468 = arith.addf %457, %467 : vector<8x256xf32>
    %c0_357 = arith.constant 0 : index
    %c52_358 = arith.constant 52 : index
    %469 = vector.load %arg18[%c0_357, %c52_358] : memref<8x324xf32, #tpu.memory_space<vmem>>, vector<8x256xf32>
    %c19_359 = arith.constant 19 : index
    %c0_360 = arith.constant 0 : index
    %c0_361 = arith.constant 0 : index
    %470 = vector.load %arg4[%c19_359, %c0_360, %c0_361] : memref<25x8x1xf32, #tpu.memory_space<vmem>>, vector<1x8x1xf32>
    %471 = vector.shape_cast %470 : vector<1x8x1xf32> to vector<8x1xf32>
    %472 = vector.broadcast %471 : vector<8x1xf32> to vector<8x256xf32>
    %473 = arith.mulf %469, %472 : vector<8x256xf32>
    %474 = arith.addf %463, %473 : vector<8x256xf32>
    %c19_362 = arith.constant 19 : index
    %c0_363 = arith.constant 0 : index
    %c0_364 = arith.constant 0 : index
    %475 = vector.load %arg5[%c19_362, %c0_363, %c0_364] : memref<25x8x1xf32, #tpu.memory_space<vmem>>, vector<1x8x1xf32>
    %476 = vector.shape_cast %475 : vector<1x8x1xf32> to vector<8x1xf32>
    %477 = vector.broadcast %476 : vector<8x1xf32> to vector<8x256xf32>
    %478 = arith.mulf %469, %477 : vector<8x256xf32>
    %479 = arith.addf %468, %478 : vector<8x256xf32>
    %c0_365 = arith.constant 0 : index
    %c68_366 = arith.constant 68 : index
    %480 = vector.load %arg18[%c0_365, %c68_366] : memref<8x324xf32, #tpu.memory_space<vmem>>, vector<8x256xf32>
    %c24_367 = arith.constant 24 : index
    %c0_368 = arith.constant 0 : index
    %c0_369 = arith.constant 0 : index
    %481 = vector.load %arg4[%c24_367, %c0_368, %c0_369] : memref<25x8x1xf32, #tpu.memory_space<vmem>>, vector<1x8x1xf32>
    %482 = vector.shape_cast %481 : vector<1x8x1xf32> to vector<8x1xf32>
    %483 = vector.broadcast %482 : vector<8x1xf32> to vector<8x256xf32>
    %484 = arith.mulf %480, %483 : vector<8x256xf32>
    %485 = arith.addf %474, %484 : vector<8x256xf32>
    %c24_370 = arith.constant 24 : index
    %c0_371 = arith.constant 0 : index
    %c0_372 = arith.constant 0 : index
    %486 = vector.load %arg5[%c24_370, %c0_371, %c0_372] : memref<25x8x1xf32, #tpu.memory_space<vmem>>, vector<1x8x1xf32>
    %487 = vector.shape_cast %486 : vector<1x8x1xf32> to vector<8x1xf32>
    %488 = vector.broadcast %487 : vector<8x1xf32> to vector<8x256xf32>
    %489 = arith.mulf %480, %488 : vector<8x256xf32>
    %490 = arith.addf %479, %489 : vector<8x256xf32>
    %c4_373 = arith.constant 4 : index
    %c0_374 = arith.constant 0 : index
    %c0_375 = arith.constant 0 : index
    %491 = vector.load %arg2[%c4_373, %c0_374, %c0_375] : memref<5x1x256xf32, #tpu.memory_space<vmem>>, vector<1x1x256xf32>
    %492 = vector.shape_cast %491 : vector<1x1x256xf32> to vector<1x256xf32>
    %493 = vector.broadcast %492 : vector<1x256xf32> to vector<8x256xf32>
    %494 = arith.mulf %493, %485 : vector<8x256xf32>
    %495 = arith.addf %430, %494 : vector<8x256xf32>
    %496 = vector.broadcast %492 : vector<1x256xf32> to vector<8x256xf32>
    %497 = arith.mulf %496, %490 : vector<8x256xf32>
    %498 = arith.addf %433, %497 : vector<8x256xf32>
    %c0_376 = arith.constant 0 : index
    %c0_377 = arith.constant 0 : index
    %499 = vector.load %arg11[%c0_376, %c0_377] : memref<8x1xf32, #tpu.memory_space<vmem>>, vector<8x1xf32>
    %500 = vector.broadcast %499 : vector<8x1xf32> to vector<8x256xf32>
    %501 = arith.addf %495, %500 : vector<8x256xf32>
    %cst_378 = arith.constant 0.000000e+00 : f32
    %502 = vector.broadcast %cst_378 : f32 to vector<8x256xf32>
    %503 = arith.maximumf %501, %502 : vector<8x256xf32>
    %c0_379 = arith.constant 0 : index
    %c0_380 = arith.constant 0 : index
    %504 = vector.load %arg12[%c0_379, %c0_380] : memref<8x1xf32, #tpu.memory_space<vmem>>, vector<8x1xf32>
    %505 = vector.broadcast %504 : vector<8x1xf32> to vector<8x256xf32>
    %506 = arith.addf %498, %505 : vector<8x256xf32>
    %cst_381 = arith.constant 0.000000e+00 : f32
    %507 = vector.broadcast %cst_381 : f32 to vector<8x256xf32>
    %508 = arith.maximumf %506, %507 : vector<8x256xf32>
    %c0_382 = arith.constant 0 : index
    %c8_383 = arith.constant 8 : index
    %c0_384 = arith.constant 0 : index
    %509 = vector.load %arg16[%c0_382, %c8_383, %c0_384] : memref<1x32x256xf32, #tpu.memory_space<vmem>>, vector<1x8x256xf32>
    %510 = vector.shape_cast %509 : vector<1x8x256xf32> to vector<8x256xf32>
    %511 = vector.shape_cast %503 : vector<8x256xf32> to vector<1x8x256xf32>
    tpu.vector_store %arg16[%c0_382, %c8_383, %c0_384], %511 {strides = array<i32>} : memref<1x32x256xf32, #tpu.memory_space<vmem>>, vector<1x8x256xf32>,
    %c0_385 = arith.constant 0 : index
    %c0_386 = arith.constant 0 : index
    %512 = vector.load %arg6[%c0_385, %c0_386] : memref<8x8xf32, #tpu.memory_space<vmem>>, vector<8x8xf32>
    %cst_387 = arith.constant dense<0.000000e+00> : vector<8x256xf32>
    %513 = tpu.matmul %512, %508, %cst_387 {dimension_numbers = #tpu.dot_dimension_numbers<[1], [0], [0], [1], [0, 0, 1, 1], [], []>} : vector<8x8xf32>, vector<8x256xf32>, vector<8x256xf32> -> vector<8x256xf32>
    %c0_388 = arith.constant 0 : index
    %c0_389 = arith.constant 0 : index
    %514 = vector.load %arg13[%c0_388, %c0_389] : memref<8x1xf32, #tpu.memory_space<vmem>>, vector<8x1xf32>
    %515 = vector.broadcast %514 : vector<8x1xf32> to vector<8x256xf32>
    %516 = arith.addf %513, %515 : vector<8x256xf32>
    %cst_390 = arith.constant 0.000000e+00 : f32
    %517 = vector.broadcast %cst_390 : f32 to vector<8x256xf32>
    %518 = arith.maximumf %516, %517 : vector<8x256xf32>
    %c0_391 = arith.constant 0 : index
    %c16_392 = arith.constant 16 : index
    %c0_393 = arith.constant 0 : index
    %519 = vector.load %arg16[%c0_391, %c16_392, %c0_393] : memref<1x32x256xf32, #tpu.memory_space<vmem>>, vector<1x8x256xf32>
    %520 = vector.shape_cast %519 : vector<1x8x256xf32> to vector<8x256xf32>
    %521 = vector.shape_cast %518 : vector<8x256xf32> to vector<1x8x256xf32>
    tpu.vector_store %arg16[%c0_391, %c16_392, %c0_393], %521 {strides = array<i32>} : memref<1x32x256xf32, #tpu.memory_space<vmem>>, vector<1x8x256xf32>,
    %c0_394 = arith.constant 0 : index
    %c0_395 = arith.constant 0 : index
    %522 = vector.load %arg7[%c0_394, %c0_395] : memref<4x8xf32, #tpu.memory_space<vmem>>, vector<4x8xf32>
    %cst_396 = arith.constant dense<0.000000e+00> : vector<4x256xf32>
    %523 = tpu.matmul %522, %503, %cst_396 {dimension_numbers = #tpu.dot_dimension_numbers<[1], [0], [0], [1], [0, 0, 1, 1], [], []>} : vector<4x8xf32>, vector<8x256xf32>, vector<4x256xf32> -> vector<4x256xf32>
    %c0_397 = arith.constant 0 : index
    %c0_398 = arith.constant 0 : index
    %524 = vector.load %arg8[%c0_397, %c0_398] : memref<4x8xf32, #tpu.memory_space<vmem>>, vector<4x8xf32>
    %cst_399 = arith.constant dense<0.000000e+00> : vector<4x256xf32>
    %525 = tpu.matmul %524, %518, %cst_399 {dimension_numbers = #tpu.dot_dimension_numbers<[1], [0], [0], [1], [0, 0, 1, 1], [], []>} : vector<4x8xf32>, vector<8x256xf32>, vector<4x256xf32> -> vector<4x256xf32>
    %526 = arith.addf %523, %525 : vector<4x256xf32>
    %c0_400 = arith.constant 0 : index
    %c0_401 = arith.constant 0 : index
    %527 = vector.load %arg14[%c0_400, %c0_401] : memref<4x1xf32, #tpu.memory_space<vmem>>, vector<4x1xf32>
    %528 = vector.broadcast %527 : vector<4x1xf32> to vector<4x256xf32>
    %529 = arith.addf %526, %528 : vector<4x256xf32>
    %cst_402 = arith.constant 0.000000e+00 : f32
    %530 = vector.broadcast %cst_402 : f32 to vector<4x256xf32>
    %531 = arith.maximumf %529, %530 : vector<4x256xf32>
    %c0_403 = arith.constant 0 : index
    %c0_404 = arith.constant 0 : index
    %532 = vector.load %arg9[%c0_403, %c0_404] : memref<8x4xf32, #tpu.memory_space<vmem>>, vector<8x4xf32>
    %cst_405 = arith.constant dense<0.000000e+00> : vector<8x256xf32>
    %533 = tpu.matmul %532, %531, %cst_405 {dimension_numbers = #tpu.dot_dimension_numbers<[1], [0], [0], [1], [0, 0, 1, 1], [], []>} : vector<8x4xf32>, vector<4x256xf32>, vector<8x256xf32> -> vector<8x256xf32>
    %c0_406 = arith.constant 0 : index
    %c0_407 = arith.constant 0 : index
    %534 = vector.load %arg15[%c0_406, %c0_407] : memref<8x1xf32, #tpu.memory_space<vmem>>, vector<8x1xf32>
    %535 = vector.broadcast %534 : vector<8x1xf32> to vector<8x256xf32>
    %536 = arith.addf %533, %535 : vector<8x256xf32>
    %cst_408 = arith.constant 0.000000e+00 : f32
    %537 = vector.broadcast %cst_408 : f32 to vector<8x256xf32>
    %538 = arith.maximumf %536, %537 : vector<8x256xf32>
    %c0_409 = arith.constant 0 : index
    %c24_410 = arith.constant 24 : index
    %c0_411 = arith.constant 0 : index
    %539 = vector.load %arg16[%c0_409, %c24_410, %c0_411] : memref<1x32x256xf32, #tpu.memory_space<vmem>>, vector<1x8x256xf32>
    %540 = vector.shape_cast %539 : vector<1x8x256xf32> to vector<8x256xf32>
    %541 = vector.shape_cast %538 : vector<8x256xf32> to vector<1x8x256xf32>
    tpu.vector_store %arg16[%c0_409, %c24_410, %c0_411], %541 {strides = array<i32>} : memref<1x32x256xf32, #tpu.memory_space<vmem>>, vector<1x8x256xf32>,
    return
  }
  func.func @transform_0(%arg0: i32) -> (i32, i32, i32) {
    %c0_i32 = arith.constant 0 : i32
    %c0_i32_0 = arith.constant 0 : i32
    %c0_i32_1 = arith.constant 0 : i32
    return %arg0, %c0_i32, %c0_i32_0 : i32, i32, i32
  }
  func.func @transform_1(%arg0: i32) -> (i32, i32, i32) {
    %c0_i32 = arith.constant 0 : i32
    %c0_i32_0 = arith.constant 0 : i32
    %c0_i32_1 = arith.constant 0 : i32
    %c0_i32_2 = arith.constant 0 : i32
    return %c0_i32, %c0_i32_0, %c0_i32_1 : i32, i32, i32
  }
  func.func @transform_2(%arg0: i32) -> (i32, i32, i32) {
    %c0_i32 = arith.constant 0 : i32
    %c0_i32_0 = arith.constant 0 : i32
    %c0_i32_1 = arith.constant 0 : i32
    %c0_i32_2 = arith.constant 0 : i32
    return %c0_i32, %c0_i32_0, %c0_i32_1 : i32, i32, i32
  }
  func.func @transform_3(%arg0: i32) -> (i32, i32, i32) {
    %c0_i32 = arith.constant 0 : i32
    %c0_i32_0 = arith.constant 0 : i32
    %c0_i32_1 = arith.constant 0 : i32
    %c0_i32_2 = arith.constant 0 : i32
    return %c0_i32, %c0_i32_0, %c0_i32_1 : i32, i32, i32
  }
  func.func @transform_4(%arg0: i32) -> (i32, i32, i32) {
    %c0_i32 = arith.constant 0 : i32
    %c0_i32_0 = arith.constant 0 : i32
    %c0_i32_1 = arith.constant 0 : i32
    %c0_i32_2 = arith.constant 0 : i32
    return %c0_i32, %c0_i32_0, %c0_i32_1 : i32, i32, i32
  }
  func.func @transform_5(%arg0: i32) -> (i32, i32) {
    %c0_i32 = arith.constant 0 : i32
    %c0_i32_0 = arith.constant 0 : i32
    %c0_i32_1 = arith.constant 0 : i32
    return %c0_i32, %c0_i32_0 : i32, i32
  }
  func.func @transform_6(%arg0: i32) -> (i32, i32) {
    %c0_i32 = arith.constant 0 : i32
    %c0_i32_0 = arith.constant 0 : i32
    %c0_i32_1 = arith.constant 0 : i32
    return %c0_i32, %c0_i32_0 : i32, i32
  }
  func.func @transform_7(%arg0: i32) -> (i32, i32) {
    %c0_i32 = arith.constant 0 : i32
    %c0_i32_0 = arith.constant 0 : i32
    %c0_i32_1 = arith.constant 0 : i32
    return %c0_i32, %c0_i32_0 : i32, i32
  }
  func.func @transform_8(%arg0: i32) -> (i32, i32) {
    %c0_i32 = arith.constant 0 : i32
    %c0_i32_0 = arith.constant 0 : i32
    %c0_i32_1 = arith.constant 0 : i32
    return %c0_i32, %c0_i32_0 : i32, i32
  }
  func.func @transform_9(%arg0: i32) -> (i32, i32) {
    %c0_i32 = arith.constant 0 : i32
    %c0_i32_0 = arith.constant 0 : i32
    %c0_i32_1 = arith.constant 0 : i32
    return %c0_i32, %c0_i32_0 : i32, i32
  }
  func.func @transform_10(%arg0: i32) -> (i32, i32) {
    %c0_i32 = arith.constant 0 : i32
    %c0_i32_0 = arith.constant 0 : i32
    %c0_i32_1 = arith.constant 0 : i32
    return %c0_i32, %c0_i32_0 : i32, i32
  }
  func.func @transform_11(%arg0: i32) -> (i32, i32) {
    %c0_i32 = arith.constant 0 : i32
    %c0_i32_0 = arith.constant 0 : i32
    %c0_i32_1 = arith.constant 0 : i32
    return %c0_i32, %c0_i32_0 : i32, i32
  }
  func.func @transform_12(%arg0: i32) -> (i32, i32) {
    %c0_i32 = arith.constant 0 : i32
    %c0_i32_0 = arith.constant 0 : i32
    %c0_i32_1 = arith.constant 0 : i32
    return %c0_i32, %c0_i32_0 : i32, i32
  }
  func.func @transform_13(%arg0: i32) -> (i32, i32) {
    %c0_i32 = arith.constant 0 : i32
    %c0_i32_0 = arith.constant 0 : i32
    %c0_i32_1 = arith.constant 0 : i32
    return %c0_i32, %c0_i32_0 : i32, i32
  }
  func.func @transform_14(%arg0: i32) -> (i32, i32) {
    %c0_i32 = arith.constant 0 : i32
    %c0_i32_0 = arith.constant 0 : i32
    %c0_i32_1 = arith.constant 0 : i32
    return %c0_i32, %c0_i32_0 : i32, i32
  }
  func.func @transform_15(%arg0: i32) -> (i32, i32, i32) {
    %c0_i32 = arith.constant 0 : i32
    %c0_i32_0 = arith.constant 0 : i32
    %c0_i32_1 = arith.constant 0 : i32
    return %arg0, %c0_i32, %c0_i32_0 : i32, i32, i32
  }
}

</mosaic_0001>

<bundles_post_ra>
// kernel: module5_forward.1
= control target key start
LH: loop header
LB: loop body
LE: loop exit
PB: predicated region body
PF: predicated region fallthrough
CT: control target
= control target key end

     0   :  { %s4313_s18 = smov 0   ;;  %s5839_s0 = inlined_call_operand.vmem [shape: f32[2,4,256], index: 0, kind: input, shape index: {}]   ;;  %s5840_s1 = inlined_call_operand.vmem [shape: f32[5,1,256], index: 1, kind: input, shape index: {}]   ;;  %s5841_s2 = inlined_call_operand.vmem [shape: f32[25,8,4], index: 2, kind: input, shape index: {}]   ;;  %s5842_s3 = inlined_call_operand.vmem [shape: f32[25,8,1], index: 3, kind: input, shape index: {}]   ;;  %s5843_s4 = inlined_call_operand.vmem [shape: f32[25,8,1], index: 4, kind: input, shape index: {}]   ;;  %s5844_s5 = inlined_call_operand.vmem [shape: f32[8,8], index: 5, kind: input, shape index: {}]   ;;  %s5845_s6 = inlined_call_operand.vmem [shape: f32[4,8], index: 6, kind: input, shape index: {}]   ;;  %s5846_s7 = inlined_call_operand.vmem [shape: f32[4,8], index: 7, kind: input, shape index: {}]   ;;  %s5847_s8 = inlined_call_operand.vmem [shape: f32[8,4], index: 8, kind: input, shape index: {}]   ;;  %s5848_s9 = inlined_call_operand.vmem [shape: f32[8,1], index: 9, kind: input, shape index: {}]   ;;  %s5849_s10 = inlined_call_operand.vmem [shape: f32[8,1], index: 10, kind: input, shape index: {}]   ;;  %s5850_s11 = inlined_call_operand.vmem [shape: f32[8,1], index: 11, kind: input, shape index: {}]   ;;  %s5851_s12 = inlined_call_operand.vmem [shape: f32[8,1], index: 12, kind: input, shape index: {}]   ;;  %s5852_s13 = inlined_call_operand.vmem [shape: f32[4,1], index: 13, kind: input, shape index: {}]   ;;  %s5853_s14 = inlined_call_operand.vmem [shape: f32[8,1], index: 14, kind: input, shape index: {}]   ;;  %s5854_s15 = inlined_call_operand.vmem [shape: f32[2,32,256], index: 15, kind: output, shape index: {}]  }
   0x1 LB: > { %s3953_s19 = sadd.s32 4294967295, %s4204_s18   ;;  %p3957_p0 = scmp.ge.s32.totalorder %s4204_s18, 1  ;;  %s4204_s18 = sphi %s4313_s18, %s25_s18  }
   0x2   : > { %p437_p1 = scmp.lt.s32.totalorder %s4204_s18, 3 }
   0x4   : > { %p438_p2 = pnand %p3957_p0, %p437_p1 }
   0x6   : > { %441 = sbr.rel (%p438_p2) target bundleno = 1660 (0x67c), region = 80 }
   0xb   : > { %v2308_v0 = vld [vmem:[%s5843_s4] sm:$0xff]  ;;  %p485_p3 = scmp.lt.s32.totalorder %s3953_s19, 1  ;;  %v4206_v2 = vmov 0   ;;  %s4207_s28 = smov 34   ;;  %v4091_v4 = vld [vmem:[%s5843_s4 + $0x28] sm:$0xff]  ;;  %v4094_v7 = vld [vmem:[%s5842_s3 + $0x78] sm:$0xff] }
   0xc   : > { %v2266_v1 = vld [vmem:[%s5848_s9] sm:$0xff]  ;;  %4192 = vset.pattern.permute.xlu2 %v4206_v2  ;;  %4191 = vset.pattern.permute.xlu1 %v4206_v2  ;;  %v4090_v6 = vld [vmem:[%s5842_s3 + $0x28] sm:$0xff]  ;;  %v4093_v8 = vld [vmem:[%s5843_s4 + $0x50] sm:$0xff]  ;;  %vm496_vm0 = vcmask 551936   ;;  %v4208_v36 = vmov 0.0   ;;  %vm507_vm1 = vcmask 1043728  }
   0xd   : > { %2311 = vperm.xlu2 %4192, %v2308_v0   ;;  %2269 = vperm.xlu1 %4191, %v2266_v1   ;;  %s6002_s19 = smov (!%p485_p3, %s3953_s19), 1  ;;  %v2298_v5 = vld [vmem:[%s5842_s3] sm:$0xff]  ;;  %v4092_v9 = vld [vmem:[%s5842_s3 + $0x50] sm:$0xff]  ;;  %v4095_v12 = vld [vmem:[%s5843_s4 + $0x78] sm:$0xff]  ;;  %495 = vst [vmem:[#allocation2] sm:$0xff] %v4208_v36  ;;  %vm508_vm2 = vcmask 1047556  }
   0xe   : > { %4193 = vset.pattern.permute.xlu0 %v4206_v2  ;;  %s4154_s24 = sshll.u32 %s6002_s19, 3  ;;  %v4097_v10 = vld [vmem:[%s5843_s4 + $0xa0] sm:$0xff]  ;;  %v4100_v13 = vld [vmem:[%s5842_s3 + $0x30] sm:$0xff]  ;;  %v4099_v14 = vld [vmem:[%s5843_s4 + $0x8] sm:$0xff]  ;;  %497 = vst.msk [vmem:[#allocation2 + $0x8] sm:$0xf] %vm496_vm0, %v4208_v36 }
   0xf   : > { %s489_s27 = scalar_lea.vmem %s5839_s0, %s4154_s24  ;;  %v4096_v11 = vld [vmem:[%s5842_s3 + $0xa0] sm:$0xff]  ;;  %v4098_v15 = vld [vmem:[%s5842_s3 + $0x8] sm:$0xff]  ;;  %v4103_v16 = vld [vmem:[%s5843_s4 + $0x58] sm:$0xff]  ;;  %2278 = vst [vmem:[#allocation3] sm:$0xff] %v4208_v36  ;;  %vm503_vm3 = vcmask 277504   ;;  %vm511_vm4 = vcmask 273408  }
  0x10   : > { %v498_v3 = vld [vmem:[%s489_s27] sm:$0xff]  ;;  %v4102_v17 = vld [vmem:[%s5842_s3 + $0x58] sm:$0xff]  ;;  %v4101_v18 = vld [vmem:[%s5843_s4 + $0x30] sm:$0xff]  ;;  %s4209_s29 = smov 112   ;;  %vm539_vm6 = vcmask 1043456   ;;  %s4210_s30 = smov 96  }
  0x11   : > { %500 = vrot.lane.b32.xlu0 %v498_v3, %s4207_s28  ;;  %v4112_v19 = vld [vmem:[%s5843_s4 + $0x38] sm:$0xff]  ;;  %v4105_v20 = vld [vmem:[%s5843_s4 + $0x80] sm:$0xff]  ;;  %v4107_v22 = vld [vmem:[%s5843_s4 + $0xa8] sm:$0xff]  ;;  %s4211_s16 = smov 80   ;;  %s4212_s17 = smov 64   ;;  %vm535_vm7 = vcmask 31744  }
  0x12   : > { %v4104_v21 = vld [vmem:[%s5842_s3 + $0x80] sm:$0xff]  ;;  %v4134_v25 = vld [vmem:[%s5843_s4 + $0x48] sm:$0xff]  ;;  %v4136_v28 = vld [vmem:[%s5843_s4 + $0x70] sm:$0xff]  ;;  %s4213_s20 = smov 111   ;;  %s5883_s21 = smov 127   ;;  %vm532_vm8 = vcmask 916480  }
  0x13   : > { %v4123_v23 = vld [vmem:[%s5843_s4 + $0x40] sm:$0xff]  ;;  %v4125_v26 = vld [vmem:[%s5843_s4 + $0x68] sm:$0xff]  ;;  %v4127_v29 = vld [vmem:[%s5843_s4 + $0x90] sm:$0xff]  ;;  %s4215_s22 = smov 95   ;;  %s4216_s23 = smov 79   ;;  %vm652_vm9 = vcmask 785408  }
  0x14   : > { %v4114_v24 = vld [vmem:[%s5843_s4 + $0x60] sm:$0xff]  ;;  %v4116_v27 = vld [vmem:[%s5843_s4 + $0x88] sm:$0xff]  ;;  %v4118_v30 = vld [vmem:[%s5843_s4 + $0xb0] sm:$0xff]  ;;  %s4217_s24 = smov 63   ;;  %s4218_s25 = smov 110   ;;  %vm722_vm10 = vcmask 654336  }
  0x15   : > { %2350 = vperm.xlu2 %4192, %v4091_v4   ;;  %2301 = vperm.xlu1 %4191, %v2298_v5   ;;  %v4140_v31 = vld [vmem:[%s5843_s4 + $0xc0] sm:$0xff]  ;;  %v4138_v32 = vld [vmem:[%s5843_s4 + $0x98] sm:$0xff]  ;;  %v4110_v37 = vld [vmem:[%s5843_s4 + $0x10] sm:$0xff]  ;;  %s5881_s26 = smov 126   ;;  %s4220_s27 = smov 94   ;;  %vm792_vm11 = vcmask 523264  }
  0x16   : > { %v4129_v33 = vld [vmem:[%s5843_s4 + $0xb8] sm:$0xff]  ;;  %v4132_v34 = vld [vmem:[%s5843_s4 + $0x20] sm:$0xff]  ;;  %v4115_v42 = vld [vmem:[%s5842_s3 + $0x88] sm:$0xff]  ;;  %vm874_vm12 = vcmask 908288   ;;  %vm936_vm13 = vcmask 1039360   ;;  %vm1004_vm14 = vcmask 777216  }
  0x17   : > { %v4121_v35 = vld [vmem:[%s5843_s4 + $0x18] sm:$0xff]  ;;  %v4113_v38 = vld [vmem:[%s5842_s3 + $0x60] sm:$0xff]  ;;  %v4106_v43 = vld [vmem:[%s5842_s3 + $0xa8] sm:$0xff]  ;;  %vm1074_vm15 = vcmask 646144   ;;  %vm1144_vm0 = vcmask 515072  }
  0x18   : > { %v4111_v39 = vld [vmem:[%s5842_s3 + $0x38] sm:$0xff]  ;;  %v3673_v41 = vld [vmem:[%s5850_s11] sm:$0xff]  ;;  %v4117_v46 = vld [vmem:[%s5842_s3 + $0xb0] sm:$0xff] }
  0x19   : > { %2325 = vperm.xlu0 %4193, %v4090_v6   ;;  %v4122_v44 = vld [vmem:[%s5842_s3 + $0x40] sm:$0xff]  ;;  %v4133_v47 = vld [vmem:[%s5842_s3 + $0x48] sm:$0xff]  ;;  %vm509_vm5 = vmor %vm508_vm2, %vm507_vm1  ;;  %vm1227_vm1 = vcmask 900096   ;;  %vm1289_vm2 = vcmask 1031168  }
  0x1a   : > { %v4124_v49 = vld [vmem:[%s5842_s3 + $0x68] sm:$0xff] }
  0x1d   : > { %2425 = vperm.xlu2 %4192, %v4094_v7   ;;  %2400 = vperm.xlu1 %4191, %v4093_v8  }
  0x21   : > { %2375 = vperm.xlu0 %4193, %v4092_v9  }
  0x25   : > { %2500 = vperm.xlu2 %4192, %v4097_v10   ;;  %2475 = vperm.xlu1 %4191, %v4096_v11  }
  0x29   : > { %2450 = vperm.xlu0 %4193, %v4095_v12  }
  0x2d   : > { %2565 = vperm.xlu2 %4192, %v4100_v13   ;;  %2552 = vperm.xlu1 %4191, %v4099_v14  }
  0x31   : > { %2539 = vperm.xlu0 %4193, %v4098_v15  }
  0x35   : > { %2646 = vperm.xlu2 %4192, %v4103_v16   ;;  %2619 = vperm.xlu1 %4191, %v4102_v17  }
  0x39   : > { %2592 = vperm.xlu0 %4193, %v4101_v18  }
  0x3d   : > { %2874 = vperm.xlu2 %4192, %v4112_v19   ;;  %2700 = vperm.xlu1 %4191, %v4105_v20  }
  0x41   : > { %2673 = vperm.xlu0 %4193, %v4104_v21  }
  0x45   : > { %2754 = vperm.xlu2 %4192, %v4107_v22   ;;  %3156 = vperm.xlu1 %4191, %v4123_v23  }
  0x49   : > { %2928 = vperm.xlu0 %4193, %v4114_v24  }
  0x4d   : > { %3438 = vperm.xlu2 %4192, %v4134_v25   ;;  %3210 = vperm.xlu1 %4191, %v4125_v26  }
  0x51   : > { %2982 = vperm.xlu0 %4193, %v4116_v27  }
  0x55   : > { %3492 = vperm.xlu2 %4192, %v4136_v28   ;;  %3264 = vperm.xlu1 %4191, %v4127_v29  }
  0x59   : > { %3036 = vperm.xlu0 %4193, %v4118_v30  }
  0x5d   : > { %3600 = vperm.xlu2 %4192, %v4140_v31   ;;  %3546 = vperm.xlu1 %4191, %v4138_v32  }
  0x61   : > { %3318 = vperm.xlu0 %4193, %v4129_v33  }
  0x65   : > { %3398 = vperm.xlu2 %4192, %v4132_v34   ;;  %3116 = vperm.xlu1 %4191, %v4121_v35  }
  0x67   : > { %v4439_v40 = vpop.permute.xlu2 %2311 }
  0x68   : > { %5900 = vst [vmem:[#allocation4_spill] sm:$0xff] %v4439_v40 }
  0x69   : > { %2834 = vperm.xlu0 %4193, %v4110_v37  }
  0x6d   : > { %2901 = vperm.xlu2 %4192, %v4113_v38   ;;  %2847 = vperm.xlu1 %4191, %v4111_v39  }
  0x6f   : > { %v4453_v45 = vpop.permute.xlu2 %2350 }
  0x71   : > { %3676 = vperm.xlu0 %4193, %v3673_v41  }
  0x75   : > { %2955 = vperm.xlu2 %4192, %v4115_v42   ;;  %2727 = vperm.xlu1 %4191, %v4106_v43  }
  0x77   : > { %v4466_v50 = vpop.permute.xlu2 %2425 }
  0x79   : > { %3129 = vperm.xlu0 %4193, %v4122_v44  }
  0x7d   : > { %3009 = vperm.xlu2 %4192, %v4117_v46   ;;  %3411 = vperm.xlu1 %4191, %v4133_v47  }
  0x7f   : > { %v4461_v48 = vpop.permute.xlu1 %2269  ;;  %v4471_v55 = vpop.permute.xlu2 %2500 }
  0x81   : > { %3183 = vperm.xlu0 %4193, %v4124_v49  }
  0x83   : > { %v501_v51 = vpop.permute.xlu0 %500 }
  0x84   : > { %v502_v52 = vrot.slane %v501_v51, 4 }
  0x86   : > { %v504_v53 = vsel %vm503_vm3, %v502_v52, %v501_v51  ;;  %512 = vst.msk [vmem:[#allocation2 + $0x8] sm:$0xf] %vm511_vm4, %v502_v52  ;;  %vm1357_vm4 = vcmask 769024  }
  0x87   : > { %v4469_v54 = vpop.permute.xlu1 %2301  ;;  %510 = vst.msk [vmem:[#allocation2] sm:$0xff] %vm509_vm5, %v504_v53  ;;  %v4482_v62 = vpop.permute.xlu2 %2565  ;;  %vm1427_vm5 = vcmask 637952  }
  0x88   : > { %5901 = vst [vmem:[#allocation5_spill] sm:$0xff] %v4469_v54 }
  0x8b   : > { %v4473_v56 = vpop.permute.xlu0 %2325 }
  0x8d   : > { %v515_v57 = vld [vmem:[#allocation2 + $0x8] sm:$0xf] }
  0x8e   : > { %v4475_v58 = vld [vmem:[#allocation2] sm:$0xff]  ;;  %522 = vst [vmem:[#allocation1 + $0x10] ss:$2 sm:$0xff] %v515_v57  ;;  %v635_v2 = vld [vmem:[#allocation2 + $0x8] sm:$0xf] }
  0x8f   : > { %v4477_v59 = vpop.permute.xlu1 %2400  ;;  %520 = vst [vmem:[#allocation1] ss:$2 sm:$0xff] %v4475_v58  ;;  %v705_v4 = vld [vmem:[#allocation2 + $0x8] sm:$0xf]  ;;  %v4495_v9 = vpop.permute.xlu2 %2646 }
  0x90   : > { %v775_v11 = vld [vmem:[#allocation2 + $0x8] sm:$0xf] }
  0x91   : > { %v855_v18 = vld [vmem:[#allocation2 + $0x8] sm:$0xf] }
  0x92   : > { %v987_v30 = vld [vmem:[#allocation2 + $0x8] sm:$0xf] }
  0x93   : > { %v4480_v60 = vpop.permute.xlu0 %2375  ;;  %v1057_v36 = vld [vmem:[#allocation2 + $0x8] sm:$0xf] }
  0x94   : > { %v1127_v43 = vld [vmem:[#allocation2 + $0x8] sm:$0xf] }
  0x95   : > { %v525_v61 = vld.sshfl [vmem:[#allocation1 + $0x10] sm:$0xff pattern:$0x75316420] }
  0x96   : > { %v523_v63 = vld.sshfl [vmem:[#allocation1] sm:$0xff pattern:$0x75316420]  ;;  %v524_v0 = vld.sshfl [vmem:[#allocation1 + $0x8] sm:$0xff pattern:$0x75316420]  ;;  %530 = vrot.lane.b32.xlu1 %v525_v61, %s4209_s29 }
  0x97   : > { %v4484_v1 = vpop.permute.xlu1 %2475  ;;  %584 = vst [vmem:[#allocation1] ss:$2 sm:$0xff] %v4475_v58  ;;  %526 = vrot.lane.b32.xlu0 %v523_v63, %s4209_s29  ;;  %v4507_v16 = vpop.permute.xlu2 %2874  ;;  %v1208_v53 = vld [vmem:[#allocation2 + $0x8] sm:$0xf] }
  0x98   : > { %642 = vst [vmem:[#allocation1 + $0x10] ss:$2 sm:$0xff] %v635_v2 }
  0x9b   : > { %v4489_v3 = vpop.permute.xlu0 %2450 }
  0x9e   : > { %v585_v5 = vld.sshfl [vmem:[#allocation1] sm:$0xff pattern:$0x75316420]  ;;  %v586_v6 = vld.sshfl [vmem:[#allocation1 + $0x8] sm:$0xff pattern:$0x75316420]  ;;  %528 = vrot.lane.b32.xlu1 %v524_v0, %s4209_s29 }
  0x9f   : > { %v4491_v7 = vpop.permute.xlu1 %2552  ;;  %640 = vst [vmem:[#allocation1] ss:$2 sm:$0xff] %v4475_v58  ;;  %v645_v8 = vld.sshfl [vmem:[#allocation1 + $0x10] sm:$0xff pattern:$0x75316420]  ;;  %3967 = vmatpush.msk.msra.mxu2 %vm539_vm6, %v585_v5  ;;  %3969 = vmatpush.msk.msra.mxu3 %vm539_vm6, %v586_v6  ;;  %v4517_v23 = vpop.permute.xlu2 %2754 }
  0xa0   : > { %5902 = vst [vmem:[#allocation6_spill] sm:$0xff] %v4491_v7  ;;  %650 = vrot.lane.b32.xlu0 %v645_v8, %s4210_s30 }
  0xa1   : > { %712 = vst [vmem:[#allocation1 + $0x10] ss:$2 sm:$0xff] %v705_v4 }
  0xa3   : > { %v4500_v10 = vpop.permute.xlu0 %2539 }
  0xa4   : > { %5903 = vst [vmem:[#allocation7_spill] sm:$0xff] %v4500_v10 }
  0xa6   : > { %v643_v12 = vld.sshfl [vmem:[#allocation1] sm:$0xff pattern:$0x75316420]  ;;  %v644_v13 = vld.sshfl [vmem:[#allocation1 + $0x8] sm:$0xff pattern:$0x75316420] }
  0xa7   : > { %v4502_v14 = vpop.permute.xlu1 %2619  ;;  %710 = vst [vmem:[#allocation1] ss:$2 sm:$0xff] %v4475_v58  ;;  %646 = vrot.lane.b32.xlu2 %v643_v12, %s4210_s30  ;;  %v4528_v31 = vpop.permute.xlu2 %3438 }
  0xa8   : > { %v715_v15 = vld.sshfl [vmem:[#allocation1 + $0x10] sm:$0xff pattern:$0x75316420]  ;;  %5905 = vst [vmem:[#allocation9_spill] sm:$0xff] %v4528_v31 }
  0xa9   : > { %782 = vst [vmem:[#allocation1 + $0x10] ss:$2 sm:$0xff] %v775_v11  ;;  %720 = vrot.lane.b32.xlu0 %v715_v15, %s4211_s16 }
  0xab   : > { %v4509_v17 = vpop.permute.xlu0 %2592 }
  0xae   : > { %v713_v19 = vld.sshfl [vmem:[#allocation1] sm:$0xff pattern:$0x75316420]  ;;  %v714_v20 = vld.sshfl [vmem:[#allocation1 + $0x8] sm:$0xff pattern:$0x75316420] }
  0xaf   : > { %780 = vst [vmem:[#allocation1] ss:$2 sm:$0xff] %v4475_v58  ;;  %648 = vrot.lane.b32.xlu2 %v644_v13, %s4210_s30  ;;  %716 = vrot.lane.b32.xlu1 %v713_v19, %s4211_s16  ;;  %v4514_v22 = vpop.permute.xlu1 %2700  ;;  %v4537_v42 = vpop.permute.xlu2 %3492  ;;  %v1340_v13 = vld [vmem:[#allocation2 + $0x8] sm:$0xf] }
  0xb0   : > { %v785_v21 = vld.sshfl [vmem:[#allocation1 + $0x10] sm:$0xff pattern:$0x75316420]  ;;  %5907 = vst [vmem:[#allocation11_spill] sm:$0xff] %v4537_v42  ;;  %v4011_v42 = vld [vmem:[%s5840_s1 + $0x2] sm:$0x3] }
  0xb1   : > { %864 = vst [vmem:[#allocation1 + $0x10] ss:$2 sm:$0xff] %v855_v18  ;;  %790 = vrot.lane.b32.xlu0 %v785_v21, %s4212_s17 }
  0xb3   : > { %v4519_v24 = vpop.permute.xlu0 %2673 }
  0xb6   : > { %v783_v25 = vld.sshfl [vmem:[#allocation1] sm:$0xff pattern:$0x75316420]  ;;  %v784_v26 = vld.sshfl [vmem:[#allocation1 + $0x8] sm:$0xff pattern:$0x75316420] }
  0xb7   : > { %862 = vst [vmem:[#allocation1] ss:$2 sm:$0xff] %v4475_v58  ;;  %718 = vrot.lane.b32.xlu2 %v714_v20, %s4211_s16  ;;  %786 = vrot.lane.b32.xlu1 %v783_v25, %s4212_s17  ;;  %v4524_v28 = vpop.permute.xlu1 %3156  ;;  %v4547_v52 = vpop.permute.xlu2 %3600  ;;  %v1410_v25 = vld [vmem:[#allocation2 + $0x8] sm:$0xf] }
  0xb8   : > { %v867_v27 = vld.sshfl [vmem:[#allocation1 + $0x10] sm:$0xff pattern:$0x75316420]  ;;  %5904 = vst [vmem:[#allocation8_spill] sm:$0xff] %v4524_v28 }
  0xb9   : > { %926 = vst [vmem:[#allocation1 + $0x10] ss:$2 sm:$0xff] %v855_v18  ;;  %872 = vrot.lane.b32.xlu0 %v867_v27, %s4213_s20 }
  0xba   : > { %5910 = vst [vmem:[#allocation14_spill] sm:$0xff] %v4547_v52 }
  0xbb   : > { %v4526_v29 = vpop.permute.xlu0 %2928 }
  0xbe   : > { %v865_v32 = vld.sshfl [vmem:[#allocation1] sm:$0xff pattern:$0x75316420]  ;;  %v866_v33 = vld.sshfl [vmem:[#allocation1 + $0x8] sm:$0xff pattern:$0x75316420] }
  0xbf   : > { %924 = vst [vmem:[#allocation1] ss:$2 sm:$0xff] %v4475_v58  ;;  %788 = vrot.lane.b32.xlu2 %v784_v26, %s4212_s17  ;;  %868 = vrot.lane.b32.xlu1 %v865_v32, %s4213_s20  ;;  %v4533_v35 = vpop.permute.xlu1 %3210  ;;  %v4554_v4 = vpop.permute.xlu2 %3398 }
  0xc0   : > { %v929_v34 = vld.sshfl [vmem:[#allocation1 + $0x10] sm:$0xff pattern:$0x75316420]  ;;  %5906 = vst [vmem:[#allocation10_spill] sm:$0xff] %v4533_v35 }
  0xc1   : > { %994 = vst [vmem:[#allocation1 + $0x10] ss:$2 sm:$0xff] %v987_v30  ;;  %934 = vrot.lane.b32.xlu0 %v929_v34, %s5883_s21  ;;  %v1480_v34 = vld [vmem:[#allocation2 + $0x8] sm:$0xf] }
  0xc2   : > { %5913 = vst [vmem:[#allocation17_spill] sm:$0xff] %v4554_v4 }
  0xc3   : > { %v4535_v37 = vpop.permute.xlu0 %2982 }
  0xc6   : > { %v927_v38 = vld.sshfl [vmem:[#allocation1] sm:$0xff pattern:$0x75316420]  ;;  %v928_v39 = vld.sshfl [vmem:[#allocation1 + $0x8] sm:$0xff pattern:$0x75316420] }
  0xc7   : > { %870 = vrot.lane.b32.xlu2 %v866_v33, %s4213_s20  ;;  %930 = vrot.lane.b32.xlu1 %v927_v38, %s5883_s21  ;;  %992 = vst [vmem:[#allocation1] ss:$2 sm:$0xff] %v4475_v58  ;;  %v4541_v44 = vpop.permute.xlu1 %3264  ;;  %v4561_v15 = vpop.permute.xlu2 %2901  ;;  %s4221_s20 = smov 78  }
  0xc8   : > { %v997_v41 = vld.sshfl [vmem:[#allocation1 + $0x10] sm:$0xff pattern:$0x75316420]  ;;  %5908 = vst [vmem:[#allocation12_spill] sm:$0xff] %v4541_v44 }
  0xc9   : > { %1064 = vst [vmem:[#allocation1 + $0x10] ss:$2 sm:$0xff] %v1057_v36  ;;  %1002 = vrot.lane.b32.xlu0 %v997_v41, %s4215_s22 }
  0xca   : > { %5916 = vst [vmem:[#allocation20_spill] sm:$0xff] %v4561_v15 }
  0xcb   : > { %v4543_v51 = vpop.permute.xlu0 %3036 }
  0xcc   : > { %5909 = vst [vmem:[#allocation13_spill] sm:$0xff] %v4543_v51 }
  0xce   : > { %v995_v46 = vld.sshfl [vmem:[#allocation1] sm:$0xff pattern:$0x75316420]  ;;  %v996_v47 = vld.sshfl [vmem:[#allocation1 + $0x8] sm:$0xff pattern:$0x75316420] }
  0xcf   : > { %932 = vrot.lane.b32.xlu2 %v928_v39, %s5883_s21  ;;  %998 = vrot.lane.b32.xlu1 %v995_v46, %s4215_s22  ;;  %1062 = vst [vmem:[#allocation1] ss:$2 sm:$0xff] %v4475_v58  ;;  %v4550_v0 = vpop.permute.xlu1 %3546  ;;  %v4569_v32 = vpop.permute.xlu2 %2955  ;;  %s4155_s21 = sshll.u32 %s6002_s19, 6 }
  0xd0   : > { %v1067_v49 = vld.sshfl [vmem:[#allocation1 + $0x10] sm:$0xff pattern:$0x75316420]  ;;  %5911 = vst [vmem:[#allocation15_spill] sm:$0xff] %v4550_v0 }
  0xd1   : > { %1134 = vst [vmem:[#allocation1 + $0x10] ss:$2 sm:$0xff] %v1127_v43  ;;  %1072 = vrot.lane.b32.xlu0 %v1067_v49, %s4216_s23 }
  0xd2   : > { %5919 = vst [vmem:[#allocation23_spill] sm:$0xff] %v4569_v32 }
  0xd3   : > { %v4552_v2 = vpop.permute.xlu0 %3318 }
  0xd4   : > { %5912 = vst [vmem:[#allocation16_spill] sm:$0xff] %v4552_v2  ;;  %v844_v2 = vld [vmem:[%s5840_s1] sm:$0x3] }
  0xd6   : > { %v1065_v57 = vld.sshfl [vmem:[#allocation1] sm:$0xff pattern:$0x75316420]  ;;  %v1066_v61 = vld.sshfl [vmem:[#allocation1 + $0x8] sm:$0xff pattern:$0x75316420] }
  0xd7   : > { %1000 = vrot.lane.b32.xlu2 %v996_v47, %s4215_s22  ;;  %1068 = vrot.lane.b32.xlu1 %v1065_v57, %s4216_s23  ;;  %1132 = vst [vmem:[#allocation1] ss:$2 sm:$0xff] %v4475_v58  ;;  %v4557_v11 = vpop.permute.xlu1 %3116  ;;  %v4579_v46 = vpop.permute.xlu2 %3009  ;;  %v1561_v47 = vld [vmem:[#allocation2 + $0x8] sm:$0xf]  ;;  %s4222_s22 = smov 62  }
  0xd8   : > { %v1137_v63 = vld.sshfl [vmem:[#allocation1 + $0x10] sm:$0xff pattern:$0x75316420]  ;;  %5914 = vst [vmem:[#allocation18_spill] sm:$0xff] %v4557_v11 }
  0xd9   : > { %1142 = vrot.lane.b32.xlu0 %v1137_v63, %s4217_s24  ;;  %1217 = vst [vmem:[#allocation1 + $0x10] ss:$2 sm:$0xff] %v1208_v53 }
  0xda   : > { %5922 = vst [vmem:[#allocation26_spill] sm:$0xff] %v4579_v46 }
  0xdb   : > { %v4559_v12 = vpop.permute.xlu0 %2834 }
  0xdc   : > { %5915 = vst [vmem:[#allocation19_spill] sm:$0xff] %v4559_v12 }
  0xde   : > { %v1135_v5 = vld.sshfl [vmem:[#allocation1] sm:$0xff pattern:$0x75316420]  ;;  %v1136_v6 = vld.sshfl [vmem:[#allocation1 + $0x8] sm:$0xff pattern:$0x75316420] }
  0xdf   : > { %1070 = vrot.lane.b32.xlu2 %v1066_v61, %s4216_s23  ;;  %1138 = vrot.lane.b32.xlu1 %v1135_v5, %s4217_s24  ;;  %1215 = vst [vmem:[#allocation1] ss:$2 sm:$0xff] %v4475_v58  ;;  %v4565_v21 = vpop.permute.xlu1 %2847  ;;  %s4223_s23 = smov 109  }
  0xe0   : > { %v1220_v8 = vld.sshfl [vmem:[#allocation1 + $0x10] sm:$0xff pattern:$0x75316420]  ;;  %5917 = vst [vmem:[#allocation21_spill] sm:$0xff] %v4565_v21 }
  0xe1   : > { %1225 = vrot.lane.b32.xlu0 %v1220_v8, %s4218_s25  ;;  %1279 = vst [vmem:[#allocation1 + $0x10] ss:$2 sm:$0xff] %v1208_v53 }
  0xe3   : > { %v4567_v26 = vpop.permute.xlu0 %3676 }
  0xe4   : > { %5918 = vst [vmem:[#allocation22_spill] sm:$0xff] %v4567_v26 }
  0xe6   : > { %v1218_v18 = vld.sshfl [vmem:[#allocation1] sm:$0xff pattern:$0x75316420]  ;;  %v1219_v19 = vld.sshfl [vmem:[#allocation1 + $0x8] sm:$0xff pattern:$0x75316420] }
  0xe7   : > { %1140 = vrot.lane.b32.xlu2 %v1136_v6, %s4217_s24  ;;  %1221 = vrot.lane.b32.xlu1 %v1218_v18, %s4218_s25  ;;  %1277 = vst [vmem:[#allocation1] ss:$2 sm:$0xff] %v4475_v58  ;;  %v4573_v36 = vpop.permute.xlu1 %2727  ;;  %s4227_s24 = smov 61  }
  0xe8   : > { %v1282_v20 = vld.sshfl [vmem:[#allocation1 + $0x10] sm:$0xff pattern:$0x75316420]  ;;  %5920 = vst [vmem:[#allocation24_spill] sm:$0xff] %v4573_v36 }
  0xe9   : > { %1287 = vrot.lane.b32.xlu0 %v1282_v20, %s5881_s26  ;;  %1347 = vst [vmem:[#allocation1 + $0x10] ss:$2 sm:$0xff] %v1340_v13 }
  0xeb   : > { %v4575_v41 = vpop.permute.xlu0 %3129 }
  0xec   : > { %5921 = vst [vmem:[#allocation25_spill] sm:$0xff] %v4575_v41 }
  0xee   : > { %v1280_v27 = vld.sshfl [vmem:[#allocation1] sm:$0xff pattern:$0x75316420]  ;;  %v1281_v30 = vld.sshfl [vmem:[#allocation1 + $0x8] sm:$0xff pattern:$0x75316420] }
  0xef   : > { %1223 = vrot.lane.b32.xlu2 %v1219_v19, %s4218_s25  ;;  %1283 = vrot.lane.b32.xlu1 %v1280_v27, %s5881_s26  ;;  %1345 = vst [vmem:[#allocation1] ss:$2 sm:$0xff] %v4475_v58  ;;  %v4582_v61 = vpop.permute.xlu1 %3411  ;;  %v1693_v27 = vld [vmem:[#allocation2 + $0x8] sm:$0xf]  ;;  %s4226_s25 = smov 77  }
  0xf0   : > { %v1350_v33 = vld.sshfl [vmem:[#allocation1 + $0x10] sm:$0xff pattern:$0x75316420]  ;;  %5923 = vst [vmem:[#allocation27_spill] sm:$0xff] %v4582_v61 }
  0xf1   : > { %1355 = vrot.lane.b32.xlu0 %v1350_v33, %s4220_s27  ;;  %1417 = vst [vmem:[#allocation1 + $0x10] ss:$2 sm:$0xff] %v1410_v25  ;;  %v514_v25 = vld [vmem:[%s5841_s2] sm:$0xff] }
  0xf2   : > { %3970 = vmatmul.msk.f32.vlgmr.msra.gmra.mxu3 %vm535_vm7, %v514_v25  ;;  %3968 = vmatmul.msk.f32.vlgmr.msra.gmra.mxu2 %vm535_vm7, %v514_v25 }
  0xf3   : > { %v4584_v63 = vpop.permute.xlu0 %3183 }
  0xf4   : > { %5924 = vst [vmem:[#allocation28_spill] sm:$0xff] %v4584_v63 }
  0xf6   : > { %v1348_v38 = vld.sshfl [vmem:[#allocation1] sm:$0xff pattern:$0x75316420]  ;;  %v1349_v39 = vld.sshfl [vmem:[#allocation1 + $0x8] sm:$0xff pattern:$0x75316420] }
  0xf7   : > { %1285 = vrot.lane.b32.xlu2 %v1281_v30, %s5881_s26  ;;  %1351 = vrot.lane.b32.xlu1 %v1348_v38, %s4220_s27  ;;  %1415 = vst [vmem:[#allocation1] ss:$2 sm:$0xff] %v4475_v58  ;;  %s5964_s26 = smov 124  }
  0xf8   : > { %v1420_v43 = vld.sshfl [vmem:[#allocation1 + $0x10] sm:$0xff pattern:$0x75316420] }
  0xf9   : > { %1425 = vrot.lane.b32.xlu0 %v1420_v43, %s4221_s20  ;;  %1487 = vst [vmem:[#allocation1 + $0x10] ss:$2 sm:$0xff] %v1480_v34 }
  0xfe   : > { %v1418_v49 = vld.sshfl [vmem:[#allocation1] sm:$0xff pattern:$0x75316420]  ;;  %v1419_v53 = vld.sshfl [vmem:[#allocation1 + $0x8] sm:$0xff pattern:$0x75316420] }
  0xff   : > { %1353 = vrot.lane.b32.xlu2 %v1349_v39, %s4220_s27  ;;  %1421 = vrot.lane.b32.xlu1 %v1418_v49, %s4221_s20  ;;  %1485 = vst [vmem:[#allocation1] ss:$2 sm:$0xff] %v4475_v58  ;;  %s5857_s27 = smov 125   ;;  %v3962_v39 = vld [vmem:[%s5841_s2 + $0x28] sm:$0xff] }
 0x100   : > { %v1490_v57 = vld.sshfl [vmem:[#allocation1 + $0x10] sm:$0xff pattern:$0x75316420] }
 0x101   : > { %1495 = vrot.lane.b32.xlu0 %v1490_v57, %s4222_s22  ;;  %1570 = vst [vmem:[#allocation1 + $0x10] ss:$2 sm:$0xff] %v1561_v47  ;;  %v647_v5 = vpop.permute.xlu2 %646 }
 0x106   : > { %v1488_v6 = vld.sshfl [vmem:[#allocation1] sm:$0xff pattern:$0x75316420]  ;;  %v1489_v8 = vld.sshfl [vmem:[#allocation1 + $0x8] sm:$0xff pattern:$0x75316420] }
 0x107   : > { %1423 = vrot.lane.b32.xlu2 %v1419_v53, %s4221_s20  ;;  %1491 = vrot.lane.b32.xlu1 %v1488_v6, %s4222_s22  ;;  %1568 = vst [vmem:[#allocation1] ss:$2 sm:$0xff] %v4475_v58  ;;  %s4232_s20 = smov 60  }
 0x108   : > { %v1573_v13 = vld.sshfl [vmem:[#allocation1 + $0x10] sm:$0xff pattern:$0x75316420]  ;;  %v531_v18 = vpop.permute.xlu1 %530 }
 0x109   : > { %1578 = vrot.lane.b32.xlu0 %v1573_v13, %s4223_s23  ;;  %1632 = vst [vmem:[#allocation1 + $0x10] ss:$2 sm:$0xff] %v1561_v47  ;;  %v649_v19 = vpop.permute.xlu2 %648  ;;  %v527_v20 = vpop.permute.xlu0 %526 }
 0x10a   : > { %v653_v57 = vsel %vm652_vm9, %v647_v5, %v649_v19  ;;  %v3971_v5 = vld [vmem:[%s5841_s2 + $0x50] sm:$0xff] }
 0x10e   : > { %v1571_v30 = vld.sshfl [vmem:[#allocation1] sm:$0xff pattern:$0x75316420]  ;;  %v1572_v33 = vld.sshfl [vmem:[#allocation1 + $0x8] sm:$0xff pattern:$0x75316420] }
 0x10f   : > { %1493 = vrot.lane.b32.xlu2 %v1489_v8, %s4222_s22  ;;  %1574 = vrot.lane.b32.xlu1 %v1571_v30, %s4223_s23  ;;  %1630 = vst [vmem:[#allocation1] ss:$2 sm:$0xff] %v4475_v58  ;;  %v1763_v8 = vld [vmem:[#allocation2 + $0x8] sm:$0xf]  ;;  %s4225_s22 = smov 93   ;;  %v3976_v30 = vld [vmem:[%s5841_s2 + $0x78] sm:$0xff] }
 0x110   : > { %v1635_v34 = vld.sshfl [vmem:[#allocation1 + $0x10] sm:$0xff pattern:$0x75316420]  ;;  %v529_v38 = vpop.permute.xlu1 %528 }
 0x111   : > { %1640 = vrot.lane.b32.xlu0 %v1635_v34, %s5857_s27  ;;  %1700 = vst [vmem:[#allocation1 + $0x10] ss:$2 sm:$0xff] %v1693_v27  ;;  %v719_v43 = vpop.permute.xlu2 %718  ;;  %v533_v47 = vsel %vm532_vm8, %v527_v20, %v529_v38  ;;  %v534_v49 = vsel %vm532_vm8, %v529_v38, %v531_v18 }
 0x112   : > { %v651_v53 = vpop.permute.xlu0 %650  ;;  %3963 = vmatpush.msk.msra.mxu0 %vm539_vm6, %v533_v47  ;;  %3965 = vmatpush.msk.msra.mxu1 %vm539_vm6, %v534_v49 }
 0x113   : > { %v654_v6 = vsel %vm652_vm9, %v649_v19, %v651_v53  ;;  %3966 = vmatmul.msk.f32.vlgmr.msra.gmra.mxu1 %vm535_vm7, %v3962_v39  ;;  %3964 = vmatmul.msk.f32.vlgmr.msra.gmra.mxu0 %vm535_vm7, %v3962_v39 }
 0x114   : > { %3972 = vmatpush.msk.msrb.mxu0 %vm539_vm6, %v653_v57  ;;  %3974 = vmatpush.msk.msrb.mxu1 %vm539_vm6, %v654_v6 }
 0x116   : > { %v1633_v13 = vld.sshfl [vmem:[#allocation1] sm:$0xff pattern:$0x75316420]  ;;  %v1634_v18 = vld.sshfl [vmem:[#allocation1 + $0x8] sm:$0xff pattern:$0x75316420] }
 0x117   : > { %1576 = vrot.lane.b32.xlu2 %v1572_v33, %s4223_s23  ;;  %1636 = vrot.lane.b32.xlu1 %v1633_v13, %s5857_s27  ;;  %1698 = vst [vmem:[#allocation1] ss:$2 sm:$0xff] %v4475_v58  ;;  %v1833_v33 = vld [vmem:[#allocation2 + $0x8] sm:$0xf]  ;;  %s4228_s23 = smov 108  }
 0x118   : > { %v1703_v20 = vld.sshfl [vmem:[#allocation1 + $0x10] sm:$0xff pattern:$0x75316420] }
 0x119   : > { %1708 = vrot.lane.b32.xlu0 %v1703_v20, %s4225_s22  ;;  %1770 = vst [vmem:[#allocation1 + $0x10] ss:$2 sm:$0xff] %v1763_v8  ;;  %v789_v19 = vpop.permute.xlu2 %788  ;;  %v3981_v8 = vld [vmem:[%s5841_s2 + $0xa0] sm:$0xff]  ;;  %v1914_v13 = vld [vmem:[#allocation2 + $0x8] sm:$0xf] }
 0x11b   : > { %v721_v25 = vpop.permute.xlu0 %720  ;;  %3975 = vmatmul.msk.f32.vlgmr.msrb.gmra.mxu1 %vm535_vm7, %v3971_v5  ;;  %3973 = vmatmul.msk.f32.vlgmr.msrb.gmra.mxu0 %vm535_vm7, %v3971_v5 }
 0x11c   : > { %v724_v27 = vsel %vm722_vm10, %v719_v43, %v721_v25 }
 0x11d   : > { %3979 = vmatpush.msk.msrb.mxu3 %vm539_vm6, %v724_v27 }
 0x11e   : > { %3980 = vmatmul.msk.f32.vlgmr.msrb.gmra.mxu3 %vm535_vm7, %v3976_v30  ;;  %v1701_v34 = vld.sshfl [vmem:[#allocation1] sm:$0xff pattern:$0x75316420]  ;;  %v1702_v38 = vld.sshfl [vmem:[#allocation1 + $0x8] sm:$0xff pattern:$0x75316420] }
 0x11f   : > { %1638 = vrot.lane.b32.xlu2 %v1634_v18, %s5857_s27  ;;  %1704 = vrot.lane.b32.xlu1 %v1701_v34, %s4225_s22  ;;  %1768 = vst [vmem:[#allocation1] ss:$2 sm:$0xff] %v4475_v58  ;;  %v3987_v34 = vld [vmem:[%s5841_s2 + $0x30] sm:$0xff]  ;;  %s5956_s27 = smov 126  }
 0x120   : > { %v1773_v39 = vld.sshfl [vmem:[#allocation1 + $0x10] sm:$0xff pattern:$0x75316420] }
 0x121   : > { %1778 = vrot.lane.b32.xlu0 %v1773_v39, %s4226_s25  ;;  %1840 = vst [vmem:[#allocation1 + $0x10] ss:$2 sm:$0xff] %v1833_v33  ;;  %v717_v47 = vpop.permute.xlu1 %716  ;;  %v871_v49 = vpop.permute.xlu2 %870 }
 0x122   : > { %v723_v57 = vsel %vm722_vm10, %v717_v47, %v719_v43 }
 0x123   : > { %v791_v53 = vpop.permute.xlu0 %790  ;;  %3977 = vmatpush.msk.msrb.mxu2 %vm539_vm6, %v723_v57 }
 0x124   : > { %v794_v6 = vsel %vm792_vm11, %v789_v19, %v791_v53  ;;  %3978 = vmatmul.msk.f32.vlgmr.msrb.gmra.mxu2 %vm535_vm7, %v3976_v30 }
 0x125   : > { %3984 = vmatpush.msk.msra.mxu1 %vm539_vm6, %v794_v6 }
 0x126   : > { %3985 = vmatmul.msk.f32.vlgmr.msra.gmra.mxu1 %vm535_vm7, %v3981_v8  ;;  %v1771_v18 = vld.sshfl [vmem:[#allocation1] sm:$0xff pattern:$0x75316420]  ;;  %v1772_v20 = vld.sshfl [vmem:[#allocation1 + $0x8] sm:$0xff pattern:$0x75316420] }
 0x127   : > { %1706 = vrot.lane.b32.xlu2 %v1702_v38, %s4225_s22  ;;  %1774 = vrot.lane.b32.xlu1 %v1771_v18, %s4226_s25  ;;  %1838 = vst [vmem:[#allocation1] ss:$2 sm:$0xff] %v4475_v58  ;;  %v3986_v18 = vld [vmem:[%s5841_s2 + $0x8] sm:$0xff]  ;;  %s5855_s22 = smov 124  }
 0x128   : > { %v1843_v5 = vld.sshfl [vmem:[#allocation1 + $0x10] sm:$0xff pattern:$0x75316420] }
 0x129   : > { %1848 = vrot.lane.b32.xlu0 %v1843_v5, %s4227_s24  ;;  %1923 = vst [vmem:[#allocation1 + $0x10] ss:$2 sm:$0xff] %v1914_v13  ;;  %v787_v43 = vpop.permute.xlu1 %786  ;;  %v933_v25 = vpop.permute.xlu2 %932 }
 0x12a   : > { %v793_v27 = vsel %vm792_vm11, %v787_v43, %v789_v19 }
 0x12b   : > { %v873_v30 = vpop.permute.xlu0 %872  ;;  %3982 = vmatpush.msk.msra.mxu0 %vm539_vm6, %v793_v27 }
 0x12c   : > { %v876_v33 = vsel %vm874_vm12, %v871_v49, %v873_v30  ;;  %3983 = vmatmul.msk.f32.vlgmr.msra.gmra.mxu0 %vm535_vm7, %v3981_v8 }
 0x12d   : > { %3990 = vmatpush.msk.msra.mxu3 %vm539_vm6, %v876_v33 }
 0x12e   : > { %3991 = vmatmul.msk.f32.vlgmr.msra.gmra.mxu3 %vm535_vm7, %v3987_v34  ;;  %v1841_v38 = vld.sshfl [vmem:[#allocation1] sm:$0xff pattern:$0x75316420]  ;;  %v1842_v39 = vld.sshfl [vmem:[#allocation1 + $0x8] sm:$0xff pattern:$0x75316420] }
 0x12f   : > { %1776 = vrot.lane.b32.xlu2 %v1772_v20, %s4226_s25  ;;  %1844 = vrot.lane.b32.xlu1 %v1841_v38, %s4227_s24  ;;  %1921 = vst [vmem:[#allocation1] ss:$2 sm:$0xff] %v4475_v58  ;;  %v2046_v20 = vld [vmem:[#allocation2 + $0x8] sm:$0xf]  ;;  %s5952_s25 = smov 127  }
 0x130   : > { %v1926_v47 = vld.sshfl [vmem:[#allocation1 + $0x10] sm:$0xff pattern:$0x75316420] }
 0x131   : > { %1931 = vrot.lane.b32.xlu0 %v1926_v47, %s4228_s23  ;;  %1985 = vst [vmem:[#allocation1 + $0x10] ss:$2 sm:$0xff] %v1914_v13  ;;  %v869_v19 = vpop.permute.xlu1 %868  ;;  %v1001_v53 = vpop.permute.xlu2 %1000 }
 0x132   : > { %v875_v57 = vsel %vm874_vm12, %v869_v19, %v871_v49  ;;  %vm1497_vm12 = vcmask 506880  }
 0x133   : > { %v935_v6 = vpop.permute.xlu0 %934  ;;  %3988 = vmatpush.msk.msra.mxu2 %vm539_vm6, %v875_v57 }
 0x134   : > { %v938_v8 = vsel %vm936_vm13, %v933_v25, %v935_v6  ;;  %3989 = vmatmul.msk.f32.vlgmr.msra.gmra.mxu2 %vm535_vm7, %v3987_v34  ;;  %v3996_v34 = vld [vmem:[%s5841_s2 + $0x58] sm:$0xff] }
 0x135   : > { %3994 = vmatpush.msk.msrb.mxu1 %vm539_vm6, %v938_v8 }
 0x136   : > { %3995 = vmatmul.msk.f32.vlgmr.msrb.gmra.mxu1 %vm535_vm7, %v3986_v18  ;;  %v1924_v13 = vld.sshfl [vmem:[#allocation1] sm:$0xff pattern:$0x75316420]  ;;  %v1925_v5 = vld.sshfl [vmem:[#allocation1 + $0x8] sm:$0xff pattern:$0x75316420] }
 0x137   : > { %1846 = vrot.lane.b32.xlu2 %v1842_v39, %s4227_s24  ;;  %1927 = vrot.lane.b32.xlu1 %v1924_v13, %s4228_s23  ;;  %1983 = vst [vmem:[#allocation1] ss:$2 sm:$0xff] %v4475_v58  ;;  %v2116_v39 = vld [vmem:[#allocation2 + $0x8] sm:$0xf]  ;;  %s4230_s24 = smov 92  }
 0x138   : > { %v1988_v43 = vld.sshfl [vmem:[#allocation1 + $0x10] sm:$0xff pattern:$0x75316420] }
 0x139   : > { %1993 = vrot.lane.b32.xlu0 %v1988_v43, %s5855_s22  ;;  %2053 = vst [vmem:[#allocation1 + $0x10] ss:$2 sm:$0xff] %v2046_v20  ;;  %v931_v49 = vpop.permute.xlu1 %930  ;;  %v1071_v27 = vpop.permute.xlu2 %1070  ;;  %v4001_v20 = vld [vmem:[%s5841_s2 + $0x80] sm:$0xff] }
 0x13a   : > { %v937_v30 = vsel %vm936_vm13, %v931_v49, %v933_v25 }
 0x13b   : > { %v1003_v33 = vpop.permute.xlu0 %1002  ;;  %3992 = vmatpush.msk.msrb.mxu0 %vm539_vm6, %v937_v30 }
 0x13c   : > { %v1006_v38 = vsel %vm1004_vm14, %v1001_v53, %v1003_v33  ;;  %3993 = vmatmul.msk.f32.vlgmr.msrb.gmra.mxu0 %vm535_vm7, %v3986_v18 }
 0x13d   : > { %3999 = vmatpush.msk.msrb.mxu3 %vm539_vm6, %v1006_v38 }
 0x13e   : > { %4000 = vmatmul.msk.f32.vlgmr.msrb.gmra.mxu3 %vm535_vm7, %v3996_v34  ;;  %v1986_v47 = vld.sshfl [vmem:[#allocation1] sm:$0xff pattern:$0x75316420]  ;;  %v1987_v19 = vld.sshfl [vmem:[#allocation1 + $0x8] sm:$0xff pattern:$0x75316420] }
 0x13f   : > { %1929 = vrot.lane.b32.xlu2 %v1925_v5, %s4228_s23  ;;  %1989 = vrot.lane.b32.xlu1 %v1986_v47, %s5855_s22  ;;  %2051 = vst [vmem:[#allocation1] ss:$2 sm:$0xff] %v4475_v58  ;;  %v2186_v5 = vld [vmem:[#allocation2 + $0x8] sm:$0xf]  ;;  %s4231_s23 = smov 76  }
 0x140   : > { %v2056_v57 = vld.sshfl [vmem:[#allocation1 + $0x10] sm:$0xff pattern:$0x75316420] }
 0x141   : > { %2061 = vrot.lane.b32.xlu0 %v2056_v57, %s4230_s24  ;;  %2123 = vst [vmem:[#allocation1 + $0x10] ss:$2 sm:$0xff] %v2116_v39  ;;  %v999_v25 = vpop.permute.xlu1 %998  ;;  %v1141_v6 = vpop.permute.xlu2 %1140  ;;  %v4006_v39 = vld [vmem:[%s5841_s2 + $0xa8] sm:$0xff] }
 0x142   : > { %v1005_v8 = vsel %vm1004_vm14, %v999_v25, %v1001_v53  ;;  %vm1580_vm14 = vcmask 891904  }
 0x143   : > { %v1073_v18 = vpop.permute.xlu0 %1072  ;;  %3997 = vmatpush.msk.msrb.mxu2 %vm539_vm6, %v1005_v8 }
 0x144   : > { %v1076_v13 = vsel %vm1074_vm15, %v1071_v27, %v1073_v18  ;;  %3998 = vmatmul.msk.f32.vlgmr.msrb.gmra.mxu2 %vm535_vm7, %v3996_v34 }
 0x145   : > { %4004 = vmatpush.msk.msra.mxu1 %vm539_vm6, %v1076_v13 }
 0x146   : > { %4005 = vmatmul.msk.f32.vlgmr.msra.gmra.mxu1 %vm535_vm7, %v4001_v20  ;;  %v2054_v43 = vld.sshfl [vmem:[#allocation1] sm:$0xff pattern:$0x75316420]  ;;  %v2055_v49 = vld.sshfl [vmem:[#allocation1 + $0x8] sm:$0xff pattern:$0x75316420] }
 0x147   : > { %1991 = vrot.lane.b32.xlu2 %v1987_v19, %s5855_s22  ;;  %2057 = vrot.lane.b32.xlu1 %v2054_v43, %s4230_s24  ;;  %2121 = vst [vmem:[#allocation1] ss:$2 sm:$0xff] %v4475_v58  ;;  %v4135_v19 = vld [vmem:[%s5842_s3 + $0x70] sm:$0xff] }
 0x148   : > { %v2126_v30 = vld.sshfl [vmem:[#allocation1 + $0x10] sm:$0xff pattern:$0x75316420] }
 0x149   : > { %2131 = vrot.lane.b32.xlu0 %v2126_v30, %s4231_s23  ;;  %2193 = vst [vmem:[#allocation1 + $0x10] ss:$2 sm:$0xff] %v2186_v5  ;;  %v1069_v53 = vpop.permute.xlu1 %1068  ;;  %v1224_v33 = vpop.permute.xlu2 %1223 }
 0x14a   : > { %v1075_v34 = vsel %vm1074_vm15, %v1069_v53, %v1071_v27  ;;  %vm1642_vm15 = vcmask 1022976  }
 0x14b   : > { %v1143_v38 = vpop.permute.xlu0 %1142  ;;  %4002 = vmatpush.msk.msra.mxu0 %vm539_vm6, %v1075_v34  ;;  %v4012_v34 = vld [vmem:[%s5841_s2 + $0x10] sm:$0xff] }
 0x14c   : > { %v1146_v47 = vsel %vm1144_vm0, %v1141_v6, %v1143_v38  ;;  %4003 = vmatmul.msk.f32.vlgmr.msra.gmra.mxu0 %vm535_vm7, %v4001_v20  ;;  %v4013_v20 = vld [vmem:[%s5841_s2 + $0x38] sm:$0xff] }
 0x14d   : > { %4009 = vmatpush.msk.msra.mxu3 %vm539_vm6, %v1146_v47 }
 0x14e   : > { %4010 = vmatmul.msk.f32.vlgmr.msra.gmra.mxu3 %vm535_vm7, %v4006_v39  ;;  %v2125_v27 = vld.sshfl [vmem:[#allocation1 + $0x8] sm:$0xff pattern:$0x75316420]  ;;  %v2124_v57 = vld.sshfl [vmem:[#allocation1] sm:$0xff pattern:$0x75316420] }
 0x14f   : > { %2059 = vrot.lane.b32.xlu2 %v2055_v49, %s4230_s24  ;;  %3465 = vperm.xlu1 %4191, %v4135_v19   ;;  %2191 = vst [vmem:[#allocation1] ss:$2 sm:$0xff] %v4475_v58  ;;  %v4126_v58 = vld [vmem:[%s5842_s3 + $0x90] sm:$0xff] }
 0x150   : > { %v2196_v25 = vld.sshfl [vmem:[#allocation1 + $0x10] sm:$0xff pattern:$0x75316420] }
 0x151   : > { %2201 = vrot.lane.b32.xlu0 %v2196_v25, %s4232_s20  ;;  %v1139_v8 = vpop.permute.xlu1 %1138  ;;  %v1286_v18 = vpop.permute.xlu2 %1285 }
 0x152   : > { %v1145_v13 = vsel %vm1144_vm0, %v1139_v8, %v1141_v6  ;;  %v4022_v8 = vld [vmem:[%s5841_s2 + $0x60] sm:$0xff]  ;;  %vm1710_vm0 = vcmask 760832  }
 0x153   : > { %v1226_v5 = vpop.permute.xlu0 %1225  ;;  %4007 = vmatpush.msk.msra.mxu2 %vm539_vm6, %v1145_v13 }
 0x154   : > { %v1229_v43 = vsel %vm1227_vm1, %v1224_v33, %v1226_v5  ;;  %4008 = vmatmul.msk.f32.vlgmr.msra.gmra.mxu2 %vm535_vm7, %v4006_v39  ;;  %v4137_v39 = vld [vmem:[%s5842_s3 + $0x98] sm:$0xff] }
 0x155   : > { %4016 = vmatpush.msk.msrb.mxu1 %vm539_vm6, %v1229_v43  ;;  %v4128_v5 = vld [vmem:[%s5842_s3 + $0xb8] sm:$0xff] }
 0x156   : > { %4017 = vmatmul.msk.f32.vlgmr.msrb.gmra.mxu1 %vm535_vm7, %v4013_v20  ;;  %v2194_v47 = vld.sshfl [vmem:[#allocation1] sm:$0xff pattern:$0x75316420] }
 0x157   : > { %2129 = vrot.lane.b32.xlu2 %v2125_v27, %s4231_s23  ;;  %2127 = vrot.lane.b32.xlu1 %v2124_v57, %s4231_s23  ;;  %s4881_s23 = scalar_lea.vmem %s5854_s15, %s4155_s21  ;;  %s5960_s21 = smov 125  }
 0x159   : > { %3237 = vperm.xlu0 %4193, %v4126_v58   ;;  %v1222_v6 = vpop.permute.xlu1 %1221  ;;  %v1354_v49 = vpop.permute.xlu2 %1353 }
 0x15a   : > { %v1228_v30 = vsel %vm1227_vm1, %v1222_v6, %v1224_v33  ;;  %v2195_v33 = vld.sshfl [vmem:[#allocation1 + $0x8] sm:$0xff pattern:$0x75316420]  ;;  %vm1780_vm1 = vcmask 629760  }
 0x15b   : > { %v1288_v53 = vpop.permute.xlu0 %1287  ;;  %4014 = vmatpush.msk.msrb.mxu0 %vm539_vm6, %v1228_v30  ;;  %v4027_v30 = vld [vmem:[%s5841_s2 + $0x88] sm:$0xff] }
 0x15c   : > { %v1291_v38 = vsel %vm1289_vm2, %v1286_v18, %v1288_v53  ;;  %4015 = vmatmul.msk.f32.vlgmr.msrb.gmra.mxu0 %vm535_vm7, %v4013_v20  ;;  %v4139_v20 = vld [vmem:[%s5842_s3 + $0xc0] sm:$0xff] }
 0x15d   : > { %4020 = vmatpush.msk.msrb.mxu3 %vm539_vm6, %v1291_v38 }
 0x15e   : > { %4021 = vmatmul.msk.f32.vlgmr.msrb.gmra.mxu3 %vm535_vm7, %v4012_v34 }
 0x15f   : > { %2199 = vrot.lane.b32.xlu2 %v2195_v33, %s4232_s20  ;;  %2197 = vrot.lane.b32.xlu1 %v2194_v47, %s4232_s20 }
 0x161   : > { %3519 = vperm.xlu0 %4193, %v4137_v39   ;;  %v1284_v19 = vpop.permute.xlu1 %1283  ;;  %v1424_v27 = vpop.permute.xlu2 %1423 }
 0x162   : > { %v1290_v57 = vsel %vm1289_vm2, %v1284_v19, %v1286_v18 }
 0x163   : > { %v1356_v25 = vpop.permute.xlu0 %1355  ;;  %4018 = vmatpush.msk.msrb.mxu2 %vm539_vm6, %v1290_v57 }
 0x164   : > { %v1359_v13 = vsel %vm1357_vm4, %v1354_v49, %v1356_v25  ;;  %4019 = vmatmul.msk.f32.vlgmr.msrb.gmra.mxu2 %vm535_vm7, %v4012_v34 }
 0x165   : > { %4025 = vmatpush.msk.msra.mxu1 %vm539_vm6, %v1359_v13 }
 0x166   : > { %4026 = vmatmul.msk.f32.vlgmr.msra.gmra.mxu1 %vm535_vm7, %v4022_v8 }
 0x167   : > { %3291 = vperm.xlu2 %4192, %v4128_v5   ;;  %3573 = vperm.xlu1 %4191, %v4139_v20  }
 0x169   : > { %v1352_v18 = vpop.permute.xlu1 %1351  ;;  %v1494_v43 = vpop.permute.xlu2 %1493 }
 0x16a   : > { %v1358_v58 = vsel %vm1357_vm4, %v1352_v18, %v1354_v49  ;;  %v4032_v49 = vld [vmem:[%s5841_s2 + $0xb0] sm:$0xff]  ;;  %vm1850_vm4 = vcmask 498688  }
 0x16b   : > { %v1426_v6 = vpop.permute.xlu0 %1425  ;;  %4023 = vmatpush.msk.msra.mxu0 %vm539_vm6, %v1358_v58 }
 0x16c   : > { %v1429_v53 = vsel %vm1427_vm5, %v1424_v27, %v1426_v6  ;;  %4024 = vmatmul.msk.f32.vlgmr.msra.gmra.mxu0 %vm535_vm7, %v4022_v8 }
 0x16d   : > { %4030 = vmatpush.msk.msra.mxu3 %vm539_vm6, %v1429_v53 }
 0x16e   : > { %4031 = vmatmul.msk.f32.vlgmr.msra.gmra.mxu3 %vm535_vm7, %v4027_v30 }
 0x171   : > { %v1422_v34 = vpop.permute.xlu1 %1421  ;;  %v1577_v38 = vpop.permute.xlu2 %1576 }
 0x172   : > { %v1428_v39 = vsel %vm1427_vm5, %v1422_v34, %v1424_v27  ;;  %v4039_v27 = vld [vmem:[%s5841_s2 + $0x40] sm:$0xff]  ;;  %vm1933_vm5 = vcmask 883712  }
 0x173   : > { %v1496_v33 = vpop.permute.xlu0 %1495  ;;  %4028 = vmatpush.msk.msra.mxu2 %vm539_vm6, %v1428_v39  ;;  %v4048_v39 = vld [vmem:[%s5841_s2 + $0x68] sm:$0xff] }
 0x174   : > { %v1499_v47 = vsel %vm1497_vm12, %v1494_v43, %v1496_v33  ;;  %4029 = vmatmul.msk.f32.vlgmr.msra.gmra.mxu2 %vm535_vm7, %v4027_v30 }
 0x175   : > { %4035 = vmatpush.msk.msrb.mxu1 %vm539_vm6, %v1499_v47 }
 0x176   : > { %4036 = vmatmul.msk.f32.vlgmr.msrb.gmra.mxu1 %vm535_vm7, %v4032_v49 }
 0x179   : > { %v1492_v19 = vpop.permute.xlu1 %1491  ;;  %v1639_v57 = vpop.permute.xlu2 %1638 }
 0x17a   : > { %v1498_v25 = vsel %vm1497_vm12, %v1492_v19, %v1494_v43  ;;  %v4038_v43 = vld [vmem:[%s5841_s2 + $0x18] sm:$0xff]  ;;  %vm1995_vm12 = vcmask 1014784  }
 0x17b   : > { %v1579_v8 = vpop.permute.xlu0 %1578  ;;  %4033 = vmatpush.msk.msrb.mxu0 %vm539_vm6, %v1498_v25 }
 0x17c   : > { %v1582_v13 = vsel %vm1580_vm14, %v1577_v38, %v1579_v8  ;;  %4034 = vmatmul.msk.f32.vlgmr.msrb.gmra.mxu0 %vm535_vm7, %v4032_v49 }
 0x17d   : > { %4042 = vmatpush.msk.msrb.mxu3 %vm539_vm6, %v1582_v13 }
 0x17e   : > { %4043 = vmatmul.msk.f32.vlgmr.msrb.gmra.mxu3 %vm535_vm7, %v4039_v27 }
 0x181   : > { %v1575_v5 = vpop.permute.xlu1 %1574  ;;  %v1707_v20 = vpop.permute.xlu2 %1706 }
 0x182   : > { %v1581_v18 = vsel %vm1580_vm14, %v1575_v5, %v1577_v38  ;;  %vm2063_vm14 = vcmask 752640  }
 0x183   : > { %v1641_v58 = vpop.permute.xlu0 %1640  ;;  %4040 = vmatpush.msk.msrb.mxu2 %vm539_vm6, %v1581_v18 }
 0x184   : > { %v1644_v6 = vsel %vm1642_vm15, %v1639_v57, %v1641_v58  ;;  %4041 = vmatmul.msk.f32.vlgmr.msrb.gmra.mxu2 %vm535_vm7, %v4039_v27  ;;  %v4058_v58 = vld [vmem:[%s5841_s2 + $0xb8] sm:$0xff] }
 0x185   : > { %4046 = vmatpush.msk.msra.mxu1 %vm539_vm6, %v1644_v6  ;;  %v631_v6 = vpop.f32.mrf.mxu3 }
 0x186   : > { %4047 = vmatmul.msk.f32.vlgmr.msra.gmra.mxu1 %vm535_vm7, %v4038_v43 }
 0x189   : > { %v1637_v30 = vpop.permute.xlu1 %1636  ;;  %v1777_v53 = vpop.permute.xlu2 %1776 }
 0x18a   : > { %v1643_v34 = vsel %vm1642_vm15, %v1637_v30, %v1639_v57  ;;  %v4053_v57 = vld [vmem:[%s5841_s2 + $0x90] sm:$0xff] }
 0x18b   : > { %v1709_v38 = vpop.permute.xlu0 %1708  ;;  %4044 = vmatpush.msk.msra.mxu0 %vm539_vm6, %v1643_v34 }
 0x18c   : > { %v1712_v33 = vsel %vm1710_vm0, %v1707_v20, %v1709_v38  ;;  %4045 = vmatmul.msk.f32.vlgmr.msra.gmra.mxu0 %vm535_vm7, %v4038_v43 }
 0x18d   : > { %4051 = vmatpush.msk.msra.mxu3 %vm539_vm6, %v1712_v33 }
 0x18e   : > { %4052 = vmatmul.msk.f32.vlgmr.msra.gmra.mxu3 %vm535_vm7, %v4048_v39 }
 0x190   : > { %v581_v13 = vpop.f32.mrf.mxu1  ;;  %v561_v33 = vpop.f32.mrf.mxu0 }
 0x191   : > { %v1705_v49 = vpop.permute.xlu1 %1704  ;;  %v1847_v47 = vpop.permute.xlu2 %1846  ;;  %v632_v30 = vadd.f32 %v631_v6, %v581_v13  ;;  %v4064_v6 = vld [vmem:[%s5841_s2 + $0x20] sm:$0xff] }
 0x192   : > { %v1711_v19 = vsel %vm1710_vm0, %v1705_v49, %v1707_v20  ;;  %vm2133_vm0 = vcmask 621568  }
 0x193   : > { %v1779_v25 = vpop.permute.xlu0 %1778  ;;  %4049 = vmatpush.msk.msra.mxu2 %vm539_vm6, %v1711_v19 }
 0x194   : > { %v1782_v8 = vsel %vm1780_vm1, %v1777_v53, %v1779_v25  ;;  %4050 = vmatmul.msk.f32.vlgmr.msra.gmra.mxu2 %vm535_vm7, %v4048_v39  ;;  %v4065_v39 = vld [vmem:[%s5841_s2 + $0x48] sm:$0xff] }
 0x195   : > { %4056 = vmatpush.msk.msrb.mxu1 %vm539_vm6, %v1782_v8 }
 0x196   : > { %4057 = vmatmul.msk.f32.vlgmr.msrb.gmra.mxu1 %vm535_vm7, %v4053_v57 }
 0x198   : > { %v699_v19 = vpop.f32.mrf.mxu1 }
 0x199   : > { %v1775_v27 = vpop.permute.xlu1 %1774  ;;  %v1930_v18 = vpop.permute.xlu2 %1929 }
 0x19a   : > { %v1781_v5 = vsel %vm1780_vm1, %v1775_v27, %v1777_v53  ;;  %vm2203_vm1 = vcmask 490496  }
 0x19b   : > { %v1849_v20 = vpop.permute.xlu0 %1848  ;;  %4054 = vmatpush.msk.msrb.mxu0 %vm539_vm6, %v1781_v5 }
 0x19c   : > { %v1852_v43 = vsel %vm1850_vm4, %v1847_v47, %v1849_v20  ;;  %4055 = vmatmul.msk.f32.vlgmr.msrb.gmra.mxu0 %vm535_vm7, %v4053_v57  ;;  %v703_v57 = vadd.f32 %v699_v19, %v632_v30 }
 0x19d   : > { %4061 = vmatpush.msk.msrb.mxu3 %vm539_vm6, %v1852_v43 }
 0x19e   : > { %4062 = vmatmul.msk.f32.vlgmr.msrb.gmra.mxu3 %vm535_vm7, %v4058_v58 }
 0x1a1   : > { %v1845_v53 = vpop.permute.xlu1 %1844  ;;  %v1992_v25 = vpop.permute.xlu2 %1991 }
 0x1a2   : > { %v1851_v34 = vsel %vm1850_vm4, %v1845_v53, %v1847_v47  ;;  %v611_v47 = vpop.f32.mrf.mxu2  ;;  %v769_v8 = vpop.f32.mrf.mxu3  ;;  %vm2280_vm4 = vcmask 556032  }
 0x1a3   : > { %v1932_v38 = vpop.permute.xlu0 %1931  ;;  %4059 = vmatpush.msk.msrb.mxu2 %vm539_vm6, %v1851_v34  ;;  %v612_v27 = vadd.f32 %v611_v47, %v561_v33  ;;  %v773_v13 = vadd.f32 %v769_v8, %v703_v57  ;;  %v679_v53 = vpop.f32.mrf.mxu0  ;;  %v4074_v8 = vld [vmem:[%s5841_s2 + $0x70] sm:$0xff] }
 0x1a4   : > { %v1935_v49 = vsel %vm1933_vm5, %v1930_v18, %v1932_v38  ;;  %4060 = vmatmul.msk.f32.vlgmr.msrb.gmra.mxu2 %vm535_vm7, %v4058_v58  ;;  %v839_v30 = vpop.f32.mrf.mxu1 }
 0x1a5   : > { %4068 = vmatpush.msk.msra.mxu1 %vm539_vm6, %v1935_v49  ;;  %v702_v58 = vadd.f32 %v679_v53, %v612_v27  ;;  %v4821_v38 = vadd.f32 %v839_v30, %v773_v13  ;;  %v4079_v53 = vld [vmem:[%s5841_s2 + $0x98] sm:$0xff] }
 0x1a6   : > { %4069 = vmatmul.msk.f32.vlgmr.msra.gmra.mxu1 %vm535_vm7, %v4065_v39 }
 0x1a9   : > { %v1928_v5 = vpop.permute.xlu1 %1927  ;;  %v2060_v33 = vpop.permute.xlu2 %2059 }
 0x1aa   : > { %v1934_v20 = vsel %vm1933_vm5, %v1928_v5, %v1930_v18  ;;  %v749_v18 = vpop.f32.mrf.mxu2  ;;  %vm2292_vm5 = vcmask 1047824  }
 0x1ab   : > { %v1994_v43 = vpop.permute.xlu0 %1993  ;;  %4066 = vmatpush.msk.msra.mxu0 %vm539_vm6, %v1934_v20  ;;  %v772_v49 = vadd.f32 %v749_v18, %v702_v58  ;;  %v819_v27 = vpop.f32.mrf.mxu0  ;;  %v4084_v18 = vld [vmem:[%s5841_s2 + $0xc0] sm:$0xff] }
 0x1ac   : > { %v1997_v34 = vsel %vm1995_vm12, %v1992_v25, %v1994_v43  ;;  %4067 = vmatmul.msk.f32.vlgmr.msra.gmra.mxu0 %vm535_vm7, %v4065_v39 }
 0x1ad   : > { %4072 = vmatpush.msk.msra.mxu3 %vm539_vm6, %v1997_v34  ;;  %v4829_v39 = vadd.f32 %v819_v27, %v772_v49 }
 0x1ae   : > { %4073 = vmatmul.msk.f32.vlgmr.msra.gmra.mxu3 %vm535_vm7, %v4064_v6 }
 0x1b1   : > { %v1990_v19 = vpop.permute.xlu1 %1989  ;;  %v2130_v13 = vpop.permute.xlu2 %2129 }
 0x1b2   : > { %v1996_v57 = vsel %vm1995_vm12, %v1990_v19, %v1992_v25 }
 0x1b3   : > { %v2062_v47 = vpop.permute.xlu0 %2061  ;;  %4070 = vmatpush.msk.msra.mxu2 %vm539_vm6, %v1996_v57  ;;  %v983_v27 = vpop.f32.mrf.mxu1 }
 0x1b4   : > { %v2065_v5 = vsel %vm2063_vm14, %v2060_v33, %v2062_v47  ;;  %4071 = vmatmul.msk.f32.vlgmr.msra.gmra.mxu2 %vm535_vm7, %v4064_v6 }
 0x1b5   : > { %4077 = vmatpush.msk.msrb.mxu1 %vm539_vm6, %v2065_v5 }
 0x1b6   : > { %4078 = vmatmul.msk.f32.vlgmr.msrb.gmra.mxu1 %vm535_vm7, %v4074_v8 }
 0x1b9   : > { %v2058_v25 = vpop.permute.xlu1 %2057  ;;  %v2200_v58 = vpop.permute.xlu2 %2199 }
 0x1ba   : > { %v2064_v20 = vsel %vm2063_vm14, %v2058_v25, %v2060_v33 }
 0x1bb   : > { %v2132_v43 = vpop.permute.xlu0 %2131  ;;  %4075 = vmatpush.msk.msrb.mxu0 %vm539_vm6, %v2064_v20  ;;  %v901_v20 = vpop.f32.mrf.mxu2 }
 0x1bc   : > { %v2135_v34 = vsel %vm2133_vm0, %v2130_v13, %v2132_v43  ;;  %4076 = vmatmul.msk.f32.vlgmr.msrb.gmra.mxu0 %vm535_vm7, %v4074_v8  ;;  %v921_v8 = vpop.f32.mrf.mxu3  ;;  %v963_v43 = vpop.f32.mrf.mxu0 }
 0x1bd   : > { %4082 = vmatpush.msk.msrb.mxu3 %vm539_vm6, %v2135_v34  ;;  %v984_v41 = vadd.f32 %v983_v27, %v921_v8  ;;  %v4037_v27 = vld [vmem:[%s5840_s1 + $0x4] sm:$0x3] }
 0x1be   : > { %4083 = vmatmul.msk.f32.vlgmr.msrb.gmra.mxu3 %vm535_vm7, %v4079_v53 }
 0x1c1   : > { %v4842_v6 = vpop.permute.xlu1 %3465 }
 0x1c2   : > { %5925 = vst [vmem:[#allocation29_spill] sm:$0xff] %v4842_v6 }
 0x1c3   : > { %v2202_v30 = vpop.permute.xlu0 %2201  ;;  %v1121_v25 = vpop.f32.mrf.mxu1 }
 0x1c4   : > { %v2205_v33 = vsel %vm2203_vm1, %v2200_v58, %v2202_v30  ;;  %v1051_v5 = vpop.f32.mrf.mxu3 }
 0x1c5   : > { %4087 = vmatpush.msk.msra.mxu1 %vm539_vm6, %v2205_v33  ;;  %v1055_v12 = vadd.f32 %v1051_v5, %v984_v41  ;;  %v4063_v5 = vld [vmem:[%s5840_s1 + $0x6] sm:$0x3] }
 0x1c6   : > { %4088 = vmatmul.msk.f32.vlgmr.msra.gmra.mxu1 %vm535_vm7, %v4084_v18  ;;  %v1906_v51 = vperm.slane %v4063_v5, 1 }
 0x1c7   : > { %v1031_v33 = vpop.f32.mrf.mxu2  ;;  %v1125_v52 = vadd.f32 %v1121_v25, %v1055_v12  ;;  %v1200_v12 = vperm.slane %v4011_v42, 1 }
 0x1c9   : > { %v2128_v49 = vpop.permute.xlu1 %2127 }
 0x1ca   : > { %v2134_v19 = vsel %vm2133_vm0, %v2128_v49, %v2130_v13  ;;  %v1101_v13 = vpop.f32.mrf.mxu0 }
 0x1cb   : > { %4080 = vmatpush.msk.msrb.mxu2 %vm539_vm6, %v2134_v19 }
 0x1cc   : > { %4081 = vmatmul.msk.f32.vlgmr.msrb.gmra.mxu2 %vm535_vm7, %v4079_v53 }
 0x1d1   : > { %v2198_v57 = vpop.permute.xlu1 %2197  ;;  %v1191_v34 = vpop.f32.mrf.mxu3 }
 0x1d2   : > { %v2204_v47 = vsel %vm2203_vm1, %v2198_v57, %v2200_v58 }
 0x1d3   : > { %4085 = vmatpush.msk.msra.mxu0 %vm539_vm6, %v2204_v47  ;;  %v1274_v30 = vpop.f32.mrf.mxu1 }
 0x1d4   : > { %4086 = vmatmul.msk.f32.vlgmr.msra.gmra.mxu0 %vm535_vm7, %v4084_v18 }
 0x1d7   : > { %v4854_v26 = vpop.f32.mrf.mxu2 }
 0x1d9   : > { %v1254_v53 = vpop.f32.mrf.mxu0 }
 0x1e1   : > { %v1336_v49 = vpop.f32.mrf.mxu3 }
 0x1e2   : > { %v1337_v40 = vadd.f32 %v1336_v49, %v1274_v30  ;;  %v1553_v49 = vperm.slane %v4037_v27, 1 }
 0x1e3   : > { %v1404_v19 = vpop.f32.mrf.mxu1 }
 0x1e4   : > { %v1408_v21 = vadd.f32 %v1404_v19, %v1337_v40  ;;  %v1195_v40 = vadd.f32 %v1191_v34, %v1125_v52 }
 0x1e7   : > { %v1316_v47 = vpop.f32.mrf.mxu2 }
 0x1e8   : > { %v1317_v35 = vadd.f32 %v1316_v47, %v1254_v53 }
 0x1e9   : > { %v1384_v6 = vpop.f32.mrf.mxu0 }
 0x1f1   : > { %v1474_v58 = vpop.f32.mrf.mxu3 }
 0x1f2   : > { %v1478_v44 = vadd.f32 %v1474_v58, %v1408_v21  ;;  %v1204_v58 = vmul.f32 %v1200_v12, %v1195_v40  ;;  %v846_v40 = vperm.slane %v844_v2, 0 }
 0x1f3   : > { %v1544_v57 = vpop.f32.mrf.mxu1 }
 0x1f4   : > { %v1548_v30 = vadd.f32 %v1544_v57, %v1478_v44 }
 0x1f6   : > { %v1557_v52 = vmul.f32 %v1553_v49, %v1548_v30 }
 0x1f7   : > { %v1454_v61 = vpop.f32.mrf.mxu2 }
 0x1f9   : > { %v4856_v63 = vpop.f32.mrf.mxu0 }
 0x201   : > { %v1627_v18 = vpop.f32.mrf.mxu3 }
 0x203   : > { %v1689_v46 = vpop.f32.mrf.mxu1 }
 0x204   : > { %v1690_v7 = vadd.f32 %v1689_v46, %v1627_v18  ;;  %v847_v46 = vperm.slane %v844_v2, 1 }
 0x206   : > { %v851_v21 = vmul.f32 %v847_v46, %v4821_v38 }
 0x207   : > { %v1607_v36 = vpop.f32.mrf.mxu2 }
 0x208   : > { %v1206_v44 = vadd.f32 %v1204_v58, %v851_v21 }
 0x209   : > { %v1669_v54 = vpop.f32.mrf.mxu0 }
 0x20a   : > { %v1670_v34 = vadd.f32 %v1669_v54, %v1607_v36 }
 0x211   : > { %v1757_v32 = vpop.f32.mrf.mxu3 }
 0x212   : > { %v1761_v15 = vadd.f32 %v1757_v32, %v1690_v7  ;;  %v964_v32 = vadd.f32 %v963_v43, %v901_v20 }
 0x213   : > { %v1827_v10 = vpop.f32.mrf.mxu1 }
 0x214   : > { %v1831_v7 = vadd.f32 %v1827_v10, %v1761_v15  ;;  %v1054_v31 = vadd.f32 %v1031_v33, %v964_v32  ;;  %v4089_v10 = vld [vmem:[%s5840_s1 + $0x8] sm:$0x3]  ;;  %v1559_v33 = vadd.f32 %v1557_v52, %v1206_v44  ;;  %v4194_v44 = vld [vmem:[#allocation3] sm:$0xff] }
 0x215   : > { %v2259_v38 = vperm.slane %v4089_v10, 1  ;;  %2281 = vst.msk [vmem:[#allocation3 + $0x10] sm:$0xff] %vm2280_vm4, %v4194_v44 }
 0x217   : > { %v1737_v0 = vpop.f32.mrf.mxu2 }
 0x218   : > { %v1760_v47 = vadd.f32 %v1737_v0, %v1670_v34 }
 0x219   : > { %v1807_v8 = vpop.f32.mrf.mxu0 }
 0x21a   : > { %v1830_v49 = vadd.f32 %v1807_v8, %v1760_v47 }
 0x221   : > { %v1897_v4 = vpop.f32.mrf.mxu3 }
 0x222   : > { %v1901_v18 = vadd.f32 %v1897_v4, %v1831_v7  ;;  %v1407_v4 = vadd.f32 %v1384_v6, %v1317_v35  ;;  %v1905_v6 = vperm.slane %v4063_v5, 0 }
 0x223   : > { %v1980_v11 = vpop.f32.mrf.mxu1 }
 0x224   : > { %v1477_v30 = vadd.f32 %v1454_v61, %v1407_v4 }
 0x226   : > { %v1547_v0 = vadd.f32 %v4856_v63, %v1477_v30 }
 0x227   : > { %v1877_v15 = vpop.f32.mrf.mxu2 }
 0x228   : > { %v1900_v61 = vadd.f32 %v1877_v15, %v1830_v49 }
 0x229   : > { %v1960_v43 = vpop.f32.mrf.mxu0 }
 0x22a   : > { %v1909_v21 = vmul.f32 %v1905_v6, %v1900_v61 }
 0x231   : > { %v2042_v41 = vpop.f32.mrf.mxu3 }
 0x232   : > { %v2043_v19 = vadd.f32 %v2042_v41, %v1980_v11  ;;  %v1910_v11 = vmul.f32 %v1906_v51, %v1901_v18  ;;  %v1124_v41 = vadd.f32 %v1101_v13, %v1054_v31  ;;  %v2258_v18 = vperm.slane %v4089_v10, 0 }
 0x233   : > { %v2110_v25 = vpop.f32.mrf.mxu1 }
 0x234   : > { %v2114_v20 = vadd.f32 %v2110_v25, %v2043_v19  ;;  %v1912_v12 = vadd.f32 %v1910_v11, %v1559_v33  ;;  %v1194_v32 = vadd.f32 %v4854_v26, %v1124_v41  ;;  %v1199_v25 = vperm.slane %v4011_v42, 0  ;;  %v4889_v11 = vpop.permute.xlu0 %3237 }
 0x235   : > { %v1552_v42 = vperm.slane %v4037_v27, 0  ;;  %5926 = vst [vmem:[#allocation30_spill] sm:$0xff] %v4889_v11  ;;  %v5955_v11 = vld [vmem:[#allocation18_spill] sm:$0xff] }
 0x236   : > { %v1203_v35 = vmul.f32 %v1199_v25, %v1194_v32 }
 0x237   : > { %v2022_v54 = vpop.f32.mrf.mxu2  ;;  %v1556_v13 = vmul.f32 %v1552_v42, %v1547_v0 }
 0x238   : > { %v2023_v2 = vadd.f32 %v2022_v54, %v1960_v43 }
 0x239   : > { %v2090_v51 = vpop.f32.mrf.mxu0 }
 0x23a   : > { %v2113_v8 = vadd.f32 %v2090_v51, %v2023_v2 }
 0x241   : > { %v2180_v28 = vpop.f32.mrf.mxu3 }
 0x242   : > { %v2184_v57 = vadd.f32 %v2180_v28, %v2114_v20  ;;  %v850_v28 = vmul.f32 %v846_v40, %v4829_v39 }
 0x243   : > { %v2250_v46 = vpop.f32.mrf.mxu1 }
 0x244   : > { %v2254_v53 = vadd.f32 %v2250_v46, %v2184_v57  ;;  %v1205_v39 = vadd.f32 %v1203_v35, %v850_v28  ;;  %v4891_v57 = vpop.permute.xlu2 %3291 }
 0x245   : > { %5927 = vst [vmem:[#allocation31_spill] sm:$0xff] %v4891_v57 }
 0x246   : > { %v2263_v7 = vmul.f32 %v2259_v38, %v2254_v53  ;;  %v1558_v20 = vadd.f32 %v1556_v13, %v1205_v39  ;;  %v4893_v38 = vpop.permute.xlu0 %3519 }
 0x247   : > { %5928 = vst [vmem:[#allocation32_spill] sm:$0xff] %v4893_v38 }
 0x248   : > { %v2265_v36 = vadd.f32 %v2263_v7, %v1912_v12  ;;  %v1911_v63 = vadd.f32 %v1909_v21, %v1558_v20 }
 0x24a   : > { %v2273_v31 = vadd.f32 %v4461_v48, %v2265_v36 }
 0x24c   : > { %v2275_v26 = vmax.f32 %v2273_v31, 0.0 }
 0x24e   : > { %2286 = vrot.lane.b32.xlu0 %v2275_v26, %s4207_s28  ;;  %2277 = vst [vmem:[%s4881_s23 + $0x8] sm:$0xff] %v2275_v26 }
 0x24f   : > { %v2160_v19 = vpop.f32.mrf.mxu2 }
 0x250   : > { %v2183_v58 = vadd.f32 %v2160_v19, %v2113_v8 }
 0x251   : > { %v2230_v52 = vpop.f32.mrf.mxu0 }
 0x252   : > { %v2253_v34 = vadd.f32 %v2230_v52, %v2183_v58 }
 0x254   : > { %v2262_v27 = vmul.f32 %v2258_v18, %v2253_v34 }
 0x256   : > { %v2264_v43 = vadd.f32 %v2262_v27, %v1911_v63  ;;  %v5929_v27 = vld [vmem:[#allocation8_spill] sm:$0xff] }
 0x258   : > { %v2272_v15 = vadd.f32 %v4461_v48, %v2264_v43 }
 0x25a   : > { %v2274_v5 = vmax.f32 %v2272_v15, 0.0 }
 0x25c   : > { %2284 = vrot.lane.b32.xlu2 %v2274_v5, %s4207_s28  ;;  %2276 = vst [vmem:[%s4881_s23] sm:$0xff] %v2274_v5  ;;  %v5930_v5 = vld [vmem:[#allocation10_spill] sm:$0xff] }
 0x2b6   : > { %v2285_v10 = vpop.permute.xlu2 %2284 }
 0x2b7   : > { %2293 = vst.msk [vmem:[#allocation3] sm:$0xff] %vm2292_vm5, %v2285_v10 }
 0x2be   : > { %v4896_v48 = vld [vmem:[#allocation3] sm:$0xff] }
 0x2bf   : > { %v2328_v46 = vmul.f32 %v4473_v56, %v4896_v48  ;;  %v2353_v33 = vmul.f32 %v4453_v45, %v4896_v48  ;;  %v2428_v7 = vmul.f32 %v4466_v50, %v4896_v48  ;;  %v2403_v32 = vmul.f32 %v4477_v59, %v4896_v48 }
 0x2c0   : > { %v2287_v41 = vpop.permute.xlu0 %2286  ;;  %v2378_v25 = vmul.f32 %v4480_v60, %v4896_v48  ;;  %v2503_v49 = vmul.f32 %v4471_v55, %v4896_v48  ;;  %v2478_v28 = vmul.f32 %v4484_v1, %v4896_v48  ;;  %v2453_v51 = vmul.f32 %v4489_v3, %v4896_v48 }
 0x2c1   : > { %2295 = vst.msk [vmem:[#allocation3 + $0x10] sm:$0xff] %vm503_vm3, %v2287_v41  ;;  %v4899_v4 = vsel %vm503_vm3, %v2285_v10, %v2287_v41  ;;  %2334 = vrot.lane.b32.xlu1 %v2328_v46, %s4209_s29  ;;  %2359 = vrot.lane.b32.xlu0 %v2353_v33, %s4209_s29  ;;  %v2568_v31 = vmul.f32 %v4482_v62, %v4896_v48  ;;  %v5931_v33 = vld [vmem:[#allocation9_spill] sm:$0xff]  ;;  %vm3692_vm3 = vcmask 64512  }
 0x2c2   : > { %2294 = vst [vmem:[#allocation3 + $0x8] sm:$0xff] %v4899_v4  ;;  %v2595_v26 = vmul.f32 %v4509_v17, %v4896_v48  ;;  %v2649_v61 = vmul.f32 %v4495_v9, %v4896_v48  ;;  %v2622_v6 = vmul.f32 %v4502_v14, %v4896_v48  ;;  %v2676_v19 = vmul.f32 %v4519_v24, %v4896_v48 }
 0x2c3   : > { %v2703_v21 = vmul.f32 %v4514_v22, %v4896_v48  ;;  %v2877_v18 = vmul.f32 %v4507_v16, %v4896_v48  ;;  %v2757_v52 = vmul.f32 %v4517_v23, %v4896_v48  ;;  %v2931_v20 = vmul.f32 %v4526_v29, %v4896_v48 }
 0x2c4   : > { %v2985_v63 = vmul.f32 %v4535_v37, %v4896_v48  ;;  %v3159_v43 = vmul.f32 %v5929_v27, %v4896_v48  ;;  %v3213_v44 = vmul.f32 %v5930_v5, %v4896_v48 }
 0x2c8   : > { %v4908_v53 = vld [vmem:[#allocation3 + $0x10] sm:$0xff] }
 0x2c9   : > { %v2380_v47 = vmul.f32 %v4480_v60, %v4908_v53  ;;  %v2355_v40 = vmul.f32 %v4453_v45, %v4908_v53  ;;  %v2330_v12 = vmul.f32 %v4473_v56, %v4908_v53  ;;  %v2455_v30 = vmul.f32 %v4489_v3, %v4908_v53 }
 0x2ca   : > { %v2430_v54 = vmul.f32 %v4466_v50, %v4908_v53  ;;  %v2405_v36 = vmul.f32 %v4477_v59, %v4908_v53  ;;  %v2505_v35 = vmul.f32 %v4471_v55, %v4908_v53  ;;  %v2480_v0 = vmul.f32 %v4484_v1, %v4908_v53 }
 0x2cb   : > { %2388 = vrot.lane.b32.xlu0 %v2380_v47, %s4210_s30  ;;  %2363 = vrot.lane.b32.xlu2 %v2355_v40, %s4209_s29  ;;  %v2597_v42 = vmul.f32 %v4509_v17, %v4908_v53  ;;  %v2570_v2 = vmul.f32 %v4482_v62, %v4908_v53  ;;  %v2624_v39 = vmul.f32 %v4502_v14, %v4908_v53 }
 0x2cc   : > { %2338 = vrot.lane.b32.xlu1 %v2330_v12, %s4209_s29  ;;  %v2678_v13 = vmul.f32 %v4519_v24, %v4908_v53  ;;  %v2651_v8 = vmul.f32 %v4495_v9, %v4908_v53  ;;  %v2879_v58 = vmul.f32 %v4507_v16, %v4908_v53  ;;  %v2705_v34 = vmul.f32 %v4514_v22, %v4908_v53 }
 0x2cd   : > { %v2933_v15 = vmul.f32 %v4526_v29, %v4908_v53  ;;  %v2759_v10 = vmul.f32 %v4517_v23, %v4908_v53  ;;  %v3161_v41 = vmul.f32 %v5929_v27, %v4908_v53  ;;  %v3441_v47 = vmul.f32 %v5931_v33, %v4896_v48 }
 0x2ce   : > { %v2987_v40 = vmul.f32 %v4535_v37, %v4908_v53  ;;  %v2354_v12 = vmul.f32 %v4453_v45, %v4899_v4 }
 0x2d3   : > { %2434 = vrot.lane.b32.xlu0 %v2428_v7, %s4211_s16  ;;  %2409 = vrot.lane.b32.xlu2 %v2403_v32, %s4210_s30  ;;  %v5028_v7 = vpop.permute.xlu1 %3573 }
 0x2d4   : > { %2384 = vrot.lane.b32.xlu1 %v2378_v25, %s4210_s30  ;;  %5932 = vst [vmem:[#allocation8_spill] sm:$0xff] %v5028_v7  ;;  %v5933_v25 = vld [vmem:[#allocation13_spill] sm:$0xff] }
 0x2db   : > { %2463 = vrot.lane.b32.xlu0 %v2455_v30, %s4211_s16  ;;  %2438 = vrot.lane.b32.xlu2 %v2430_v54, %s4211_s16  ;;  %v3039_v30 = vmul.f32 %v5933_v25, %v4896_v48  ;;  %v3215_v54 = vmul.f32 %v5930_v5, %v4908_v53 }
 0x2dc   : > { %2413 = vrot.lane.b32.xlu1 %v2405_v36, %s4210_s30  ;;  %v2429_v36 = vmul.f32 %v4466_v50, %v4899_v4  ;;  %v2504_v50 = vmul.f32 %v4471_v55, %v4899_v4  ;;  %v2569_v55 = vmul.f32 %v4482_v62, %v4899_v4  ;;  %v2650_v62 = vmul.f32 %v4495_v9, %v4899_v4  ;;  %v5938_v9 = vld [vmem:[#allocation20_spill] sm:$0xff] }
 0x2e3   : > { %2509 = vrot.lane.b32.xlu0 %v2503_v49, %s4212_s17  ;;  %2484 = vrot.lane.b32.xlu2 %v2478_v28, %s4212_s17 }
 0x2e4   : > { %2459 = vrot.lane.b32.xlu1 %v2453_v51, %s4211_s16  ;;  %v5934_v51 = vld [vmem:[#allocation12_spill] sm:$0xff] }
 0x2eb   : > { %2574 = vrot.lane.b32.xlu0 %v2568_v31, %s4209_s29  ;;  %2513 = vrot.lane.b32.xlu2 %v2505_v35, %s4212_s17  ;;  %v3267_v31 = vmul.f32 %v5934_v51, %v4896_v48  ;;  %v3443_v35 = vmul.f32 %v5931_v33, %v4908_v53 }
 0x2ec   : > { %2488 = vrot.lane.b32.xlu1 %v2480_v0, %s4212_s17 }
 0x2f3   : > { %2605 = vrot.lane.b32.xlu0 %v2597_v42, %s4209_s29  ;;  %2578 = vrot.lane.b32.xlu2 %v2570_v2, %s4209_s29 }
 0x2f4   : > { %2601 = vrot.lane.b32.xlu1 %v2595_v26, %s4209_s29  ;;  %v5935_v26 = vld [vmem:[#allocation11_spill] sm:$0xff] }
 0x2fb   : > { %2655 = vrot.lane.b32.xlu0 %v2649_v61, %s4210_s30  ;;  %2628 = vrot.lane.b32.xlu2 %v2622_v6, %s4210_s30  ;;  %v3495_v61 = vmul.f32 %v5935_v26, %v4896_v48  ;;  %v3041_v6 = vmul.f32 %v5933_v25, %v4908_v53 }
 0x2fc   : > { %2632 = vrot.lane.b32.xlu1 %v2624_v39, %s4210_s30 }
 0x303   : > { %2686 = vrot.lane.b32.xlu0 %v2678_v13, %s4211_s16  ;;  %2659 = vrot.lane.b32.xlu2 %v2651_v8, %s4210_s30 }
 0x304   : > { %2682 = vrot.lane.b32.xlu1 %v2676_v19, %s4211_s16  ;;  %v5936_v19 = vld [vmem:[#allocation16_spill] sm:$0xff] }
 0x30b   : > { %2887 = vrot.lane.b32.xlu0 %v2879_v58, %s4209_s29  ;;  %2709 = vrot.lane.b32.xlu2 %v2703_v21, %s4211_s16  ;;  %v3321_v21 = vmul.f32 %v5936_v19, %v4896_v48  ;;  %v3269_v58 = vmul.f32 %v5934_v51, %v4908_v53 }
 0x30c   : > { %2883 = vrot.lane.b32.xlu1 %v2877_v18, %s4209_s29 }
 0x313   : > { %2763 = vrot.lane.b32.xlu0 %v2757_v52, %s4212_s17  ;;  %2937 = vrot.lane.b32.xlu2 %v2931_v20, %s4210_s30 }
 0x314   : > { %2713 = vrot.lane.b32.xlu1 %v2705_v34, %s4211_s16  ;;  %v5937_v34 = vld [vmem:[#allocation15_spill] sm:$0xff] }
 0x31b   : > { %2991 = vrot.lane.b32.xlu0 %v2985_v63, %s4211_s16  ;;  %3165 = vrot.lane.b32.xlu2 %v3159_v43, %s4209_s29  ;;  %v3549_v63 = vmul.f32 %v5937_v34, %v4896_v48  ;;  %v3497_v43 = vmul.f32 %v5935_v26, %v4908_v53 }
 0x31c   : > { %2941 = vrot.lane.b32.xlu1 %v2933_v15, %s4210_s30  ;;  %v2904_v15 = vmul.f32 %v5938_v9, %v4896_v48 }
 0x323   : > { %3219 = vrot.lane.b32.xlu0 %v3213_v44, %s4210_s30  ;;  %2767 = vrot.lane.b32.xlu2 %v2759_v10, %s4212_s17 }
 0x324   : > { %3169 = vrot.lane.b32.xlu1 %v3161_v41, %s4209_s29 }
 0x325   : > { %v5018_v46 = vpop.permute.xlu2 %2363 }
 0x32b   : > { %3447 = vrot.lane.b32.xlu0 %v3441_v47, %s4209_s29  ;;  %2995 = vrot.lane.b32.xlu2 %v2987_v40, %s4211_s16  ;;  %v5939_v47 = vld [vmem:[#allocation14_spill] sm:$0xff] }
 0x32c   : > { %2361 = vrot.lane.b32.xlu1 %v2354_v12, %s4209_s29  ;;  %v3603_v40 = vmul.f32 %v5939_v47, %v4896_v48  ;;  %v3323_v12 = vmul.f32 %v5936_v19, %v4908_v53 }
 0x32d   : > { %v5031_v32 = vpop.permute.xlu2 %2409 }
 0x333   : > { %3045 = vrot.lane.b32.xlu0 %v3039_v30, %s4212_s17  ;;  %3223 = vrot.lane.b32.xlu2 %v3215_v54, %s4210_s30  ;;  %v5041_v45 = vpop.permute.xlu0 %2359  ;;  %v5044_v49 = vpop.permute.xlu1 %2334  ;;  %v2758_v30 = vmul.f32 %v4517_v23, %v4899_v4  ;;  %v2986_v23 = vmul.f32 %v4535_v37, %v4899_v4  ;;  %v3214_v37 = vmul.f32 %v5930_v5, %v4899_v4 }
 0x334   : > { %2436 = vrot.lane.b32.xlu1 %v2429_v36, %s4211_s16  ;;  %v3442_v5 = vmul.f32 %v5931_v33, %v4899_v4  ;;  %v3040_v33 = vmul.f32 %v5933_v25, %v4899_v4  ;;  %v3268_v25 = vmul.f32 %v5934_v51, %v4899_v4  ;;  %v3496_v51 = vmul.f32 %v5935_v26, %v4899_v4 }
 0x335   : > { %v5046_v28 = vpop.permute.xlu2 %2438  ;;  %v3322_v26 = vmul.f32 %v5936_v19, %v4899_v4  ;;  %v3550_v19 = vmul.f32 %v5937_v34, %v4899_v4 }
 0x33b   : > { %3273 = vrot.lane.b32.xlu0 %v3267_v31, %s4211_s16  ;;  %3451 = vrot.lane.b32.xlu2 %v3443_v35, %s4209_s29  ;;  %v2404_v35 = vmul.f32 %v4477_v59, %v4899_v4  ;;  %v2479_v59 = vmul.f32 %v4484_v1, %v4899_v4  ;;  %v2329_v1 = vmul.f32 %v4473_v56, %v4899_v4 }
 0x33c   : > { %2511 = vrot.lane.b32.xlu1 %v2504_v50, %s4212_s17  ;;  %v3551_v50 = vmul.f32 %v5937_v34, %v4908_v53  ;;  %v2379_v56 = vmul.f32 %v4480_v60, %v4899_v4  ;;  %v2454_v60 = vmul.f32 %v4489_v3, %v4899_v4  ;;  %v2596_v3 = vmul.f32 %v4509_v17, %v4899_v4  ;;  %v5943_v17 = vld [vmem:[#allocation21_spill] sm:$0xff]  ;;  %v5947_v34 = vld [vmem:[#allocation6_spill] sm:$0xff] }
 0x33d   : > { %v5057_v0 = vpop.permute.xlu2 %2484  ;;  %v5059_v42 = vpop.permute.xlu0 %2388 }
 0x33e   : > { %v5061_v2 = vpop.permute.xlu1 %2338 }
 0x343   : > { %3501 = vrot.lane.b32.xlu0 %v3495_v61, %s4210_s30  ;;  %3049 = vrot.lane.b32.xlu2 %v3041_v6, %s4212_s17 }
 0x344   : > { %2576 = vrot.lane.b32.xlu1 %v2569_v55, %s4209_s29 }
 0x345   : > { %v5072_v39 = vpop.permute.xlu2 %2513  ;;  %v5074_v13 = vpop.permute.xlu0 %2434 }
 0x346   : > { %v5076_v8 = vpop.permute.xlu1 %2384 }
 0x34b   : > { %3327 = vrot.lane.b32.xlu0 %v3321_v21, %s4212_s17  ;;  %3277 = vrot.lane.b32.xlu2 %v3269_v58, %s4211_s16  ;;  %v3605_v21 = vmul.f32 %v5939_v47, %v4908_v53 }
 0x34c   : > { %2657 = vrot.lane.b32.xlu1 %v2650_v62, %s4210_s30 }
 0x34d   : > { %v5087_v18 = vpop.permute.xlu2 %2578  ;;  %v5089_v52 = vpop.permute.xlu0 %2463 }
 0x34e   : > { %v5091_v20 = vpop.permute.xlu1 %2413 }
 0x353   : > { %3555 = vrot.lane.b32.xlu0 %v3549_v63, %s4211_s16  ;;  %3505 = vrot.lane.b32.xlu2 %v3497_v43, %s4210_s30  ;;  %v2623_v43 = vmul.f32 %v4502_v14, %v4899_v4  ;;  %v2704_v14 = vmul.f32 %v4514_v22, %v4899_v4  ;;  %v2932_v22 = vmul.f32 %v4526_v29, %v4899_v4 }
 0x354   : > { %2910 = vrot.lane.b32.xlu1 %v2904_v15, %s4210_s30  ;;  %v3160_v29 = vmul.f32 %v5929_v27, %v4899_v4  ;;  %v2677_v27 = vmul.f32 %v4519_v24, %v4899_v4  ;;  %v2878_v24 = vmul.f32 %v4507_v16, %v4899_v4  ;;  %v3604_v16 = vmul.f32 %v5939_v47, %v4899_v4 }
 0x355   : > { %v5102_v44 = vpop.permute.xlu2 %2628  ;;  %v5104_v10 = vpop.permute.xlu0 %2509  ;;  %v2851_v47 = vmul.f32 %v5943_v17, %v4899_v4 }
 0x356   : > { %v5106_v41 = vpop.permute.xlu1 %2459 }
 0x35b   : > { %3609 = vrot.lane.b32.xlu0 %v3603_v40, %s4212_s17  ;;  %3331 = vrot.lane.b32.xlu2 %v3323_v12, %s4212_s17 }
 0x35c   : > { %2765 = vrot.lane.b32.xlu1 %v2758_v30, %s4212_s17 }
 0x35d   : > { %v5117_v54 = vpop.permute.xlu2 %2659  ;;  %v5119_v36 = vpop.permute.xlu0 %2574 }
 0x35e   : > { %v5121_v31 = vpop.permute.xlu1 %2488 }
 0x363   : > { %3559 = vrot.lane.b32.xlu2 %v3551_v50, %s4211_s16  ;;  %2411 = vrot.lane.b32.xlu0 %v2404_v35, %s4210_s30 }
 0x364   : > { %2993 = vrot.lane.b32.xlu1 %v2986_v23, %s4211_s16 }
 0x365   : > { %v5132_v61 = vpop.permute.xlu2 %2709  ;;  %v5134_v6 = vpop.permute.xlu0 %2605 }
 0x366   : > { %v5136_v55 = vpop.permute.xlu1 %2601 }
 0x36b   : > { %3613 = vrot.lane.b32.xlu2 %v3605_v21, %s4212_s17  ;;  %2486 = vrot.lane.b32.xlu0 %v2479_v59, %s4212_s17 }
 0x36c   : > { %3221 = vrot.lane.b32.xlu1 %v3214_v37, %s4210_s30 }
 0x36d   : > { %v5147_v58 = vpop.permute.xlu2 %2937  ;;  %v5149_v62 = vpop.permute.xlu0 %2655 }
 0x36e   : > { %v5151_v63 = vpop.permute.xlu1 %2632 }
 0x373   : > { %2630 = vrot.lane.b32.xlu0 %v2623_v43, %s4210_s30  ;;  %2336 = vrot.lane.b32.xlu2 %v2329_v1, %s4209_s29 }
 0x374   : > { %3449 = vrot.lane.b32.xlu1 %v3442_v5, %s4209_s29  ;;  %v2850_v5 = vmul.f32 %v5943_v17, %v4896_v48 }
 0x375   : > { %v5162_v15 = vpop.permute.xlu2 %3165  ;;  %v5164_v40 = vpop.permute.xlu0 %2686 }
 0x376   : > { %5940 = vst [vmem:[#allocation10_spill] sm:$0xff] %v5162_v15  ;;  %v5166_v12 = vpop.permute.xlu1 %2682 }
 0x37b   : > { %2711 = vrot.lane.b32.xlu0 %v2704_v14, %s4211_s16  ;;  %2386 = vrot.lane.b32.xlu2 %v2379_v56, %s4210_s30 }
 0x37c   : > { %3047 = vrot.lane.b32.xlu1 %v3040_v33, %s4212_s17 }
 0x37d   : > { %v5177_v30 = vpop.permute.xlu2 %2767  ;;  %v5179_v35 = vpop.permute.xlu0 %2887 }
 0x37e   : > { %v5181_v50 = vpop.permute.xlu1 %2883 }
 0x383   : > { %2939 = vrot.lane.b32.xlu0 %v2932_v22, %s4210_s30  ;;  %2461 = vrot.lane.b32.xlu2 %v2454_v60, %s4211_s16  ;;  %v4120_v60 = vld [vmem:[%s5842_s3 + $0x18] sm:$0xff] }
 0x384   : > { %3275 = vrot.lane.b32.xlu1 %v3268_v25, %s4211_s16 }
 0x385   : > { %v5192_v23 = vpop.permute.xlu2 %2995  ;;  %v5194_v59 = vpop.permute.xlu0 %2763 }
 0x386   : > { %v5196_v21 = vpop.permute.xlu1 %2713 }
 0x38b   : > { %3167 = vrot.lane.b32.xlu0 %v3160_v29, %s4209_s29  ;;  %2603 = vrot.lane.b32.xlu2 %v2596_v3, %s4209_s29  ;;  %v4109_v29 = vld [vmem:[%s5842_s3 + $0x10] sm:$0xff] }
 0x38c   : > { %3503 = vrot.lane.b32.xlu1 %v3496_v51, %s4210_s30  ;;  %v2557_v51 = vmul.f32 %v5947_v34, %v4908_v53 }
 0x38d   : > { %v5207_v37 = vpop.permute.xlu2 %3223  ;;  %v5209_v1 = vpop.permute.xlu0 %2991 }
 0x38e   : > { %5941 = vst [vmem:[#allocation9_spill] sm:$0xff] %v5207_v37  ;;  %v5211_v43 = vpop.permute.xlu1 %2941 }
 0x38f   : > { %5942 = vst [vmem:[#allocation13_spill] sm:$0xff] %v5209_v1 }
 0x393   : > { %2856 = vrot.lane.b32.xlu0 %v2850_v5, %s4209_s29  ;;  %2684 = vrot.lane.b32.xlu2 %v2677_v27, %s4211_s16 }
 0x394   : > { %3329 = vrot.lane.b32.xlu1 %v3322_v26, %s4212_s17 }
 0x395   : > { %v5222_v56 = vpop.permute.xlu2 %3451  ;;  %v5224_v14 = vpop.permute.xlu0 %3219 }
 0x396   : > { %5944 = vst [vmem:[#allocation12_spill] sm:$0xff] %v5222_v56  ;;  %v5226_v33 = vpop.permute.xlu1 %3169 }
 0x397   : > { %5945 = vst [vmem:[#allocation11_spill] sm:$0xff] %v5224_v14 }
 0x39b   : > { %3103 = vperm.xlu0 %4193, %v4120_v60   ;;  %2885 = vrot.lane.b32.xlu2 %v2878_v24, %s4209_s29  ;;  %v2614_v60 = vadd.f32 %v5134_v6, %v2557_v51  ;;  %v2852_v24 = vmul.f32 %v5943_v17, %v4908_v53  ;;  %v5951_v51 = vld [vmem:[#allocation19_spill] sm:$0xff] }
 0x39c   : > { %3557 = vrot.lane.b32.xlu1 %v3550_v19, %s4211_s16  ;;  %v2839_v57 = vmul.f32 %v5951_v51, %v4908_v53 }
 0x39d   : > { %v5237_v22 = vpop.permute.xlu2 %3049  ;;  %v5239_v25 = vpop.permute.xlu0 %3447  ;;  %v2668_v19 = vadd.f32 %v5117_v54, %v2614_v60 }
 0x39e   : > { %5946 = vst [vmem:[#allocation16_spill] sm:$0xff] %v5239_v25  ;;  %v2362_v3 = vpop.permute.xlu1 %2361  ;;  %v2896_v25 = vadd.f32 %v5179_v35, %v2839_v57 }
 0x3a0   : > { %v2950_v60 = vadd.f32 %v5211_v43, %v2896_v25 }
 0x3a2   : > { %v3004_v14 = vadd.f32 %v5192_v23, %v2950_v60 }
 0x3a3   : > { %2821 = vperm.xlu2 %4192, %v4109_v29   ;;  %v2722_v29 = vadd.f32 %v5196_v21, %v2668_v19 }
 0x3a4   : > { %3611 = vrot.lane.b32.xlu1 %v3604_v16, %s4212_s17  ;;  %v3058_v57 = vadd.f32 %v5237_v22, %v3004_v14 }
 0x3a5   : > { %v5249_v5 = vpop.permute.xlu2 %3277  ;;  %v5251_v27 = vpop.permute.xlu0 %3045  ;;  %v2776_v17 = vadd.f32 %v5177_v30, %v2722_v29 }
 0x3a6   : > { %5948 = vst [vmem:[#allocation15_spill] sm:$0xff] %v5251_v27  ;;  %v5253_v26 = vpop.permute.xlu1 %2436 }
 0x3ab   : > { %2860 = vrot.lane.b32.xlu2 %v2852_v24, %s4209_s29 }
 0x3ac   : > { %2858 = vrot.lane.b32.xlu1 %v2851_v47, %s4209_s29 }
 0x3ad   : > { %v5264_v16 = vpop.permute.xlu2 %3505  ;;  %v5266_v7 = vpop.permute.xlu0 %3273 }
 0x3ae   : > { %5949 = vst [vmem:[#allocation14_spill] sm:$0xff] %v5264_v16  ;;  %v5268_v38 = vpop.permute.xlu1 %2511 }
 0x3af   : > { %5950 = vst [vmem:[#allocation21_spill] sm:$0xff] %v5266_v7  ;;  %v3121_v7 = vmul.f32 %v5955_v11, %v4908_v53  ;;  %v5959_v11 = vld [vmem:[#allocation17_spill] sm:$0xff] }
 0x3b0   : > { %v3403_v1 = vmul.f32 %v5959_v11, %v4908_v53 }
 0x3b1   : > { %v3178_v15 = vadd.f32 %v5226_v33, %v3121_v7 }
 0x3b2   : > { %v3460_v7 = vadd.f32 %v5222_v56, %v3403_v1 }
 0x3b3   : > { %2807 = vrot.lane.b32.xlu2 %v2776_v17, %s5952_s25  ;;  %v3232_v25 = vadd.f32 %v5207_v37, %v3178_v15 }
 0x3b4   : > { %v3514_v14 = vadd.f32 %v5264_v16, %v3460_v7  ;;  %v2365_v7 = vsel %vm532_vm8, %v5041_v45, %v2362_v3 }
 0x3b5   : > { %v5276_v24 = vpop.permute.xlu2 %3331  ;;  %v5278_v47 = vpop.permute.xlu0 %3501  ;;  %v3286_v27 = vadd.f32 %v5249_v5, %v3232_v25 }
 0x3b6   : > { %5953 = vst [vmem:[#allocation6_spill] sm:$0xff] %v5276_v24  ;;  %v5280_v19 = vpop.permute.xlu1 %2576 }
 0x3b7   : > { %5954 = vst [vmem:[#allocation19_spill] sm:$0xff] %v5278_v47  ;;  %v3340_v60 = vadd.f32 %v5276_v24, %v3286_v27 }
 0x3bb   : > { %3089 = vrot.lane.b32.xlu2 %v3058_v57, %s5956_s27 }
 0x3bd   : > { %v5289_v29 = vpop.permute.xlu2 %3559  ;;  %v5291_v17 = vpop.permute.xlu0 %3327 }
 0x3be   : > { %5957 = vst [vmem:[#allocation33_spill] sm:$0xff] %v5289_v29  ;;  %v5293_v47 = vpop.permute.xlu1 %2657  ;;  %v3568_v37 = vadd.f32 %v5289_v29, %v3514_v14  ;;  %v5967_v29 = vld [vmem:[#allocation5_spill] sm:$0xff] }
 0x3bf   : > { %5958 = vst [vmem:[#allocation34_spill] sm:$0xff] %v5291_v17  ;;  %v2305_v45 = vmul.f32 %v5967_v29, %v4899_v4 }
 0x3c3   : > { %3371 = vrot.lane.b32.xlu2 %v3340_v60, %s5960_s21  ;;  %v2905_v60 = vmul.f32 %v5938_v9, %v4899_v4  ;;  %v2304_v9 = vmul.f32 %v4896_v48, %v5967_v29 }
 0x3c5   : > { %v5302_v15 = vpop.permute.xlu2 %3613  ;;  %v5304_v57 = vpop.permute.xlu0 %3555 }
 0x3c6   : > { %5961 = vst [vmem:[#allocation35_spill] sm:$0xff] %v5302_v15  ;;  %v5306_v17 = vpop.permute.xlu1 %2910  ;;  %v3622_v25 = vadd.f32 %v5302_v15, %v3568_v37 }
 0x3c7   : > { %5962 = vst [vmem:[#allocation36_spill] sm:$0xff] %v5304_v57 }
 0x3c8   : > { %5963 = vst [vmem:[#allocation37_spill] sm:$0xff] %v5306_v17  ;;  %v2366_v17 = vsel %vm532_vm8, %v2362_v3, %v5018_v46 }
 0x3cb   : > { %3653 = vrot.lane.b32.xlu2 %v3622_v25, %s5964_s26  ;;  %v5966_v25 = vld [vmem:[#allocation4_spill] sm:$0xff] }
 0x3cc   : > { %v2314_v15 = vmul.f32 %v4896_v48, %v5966_v25 }
 0x3cd   : > { %v2337_v11 = vpop.permute.xlu2 %2336  ;;  %v5311_v27 = vpop.permute.xlu0 %3609 }
 0x3ce   : > { %5965 = vst [vmem:[#allocation38_spill] sm:$0xff] %v5311_v27  ;;  %v5313_v1 = vpop.permute.xlu1 %2765  ;;  %v2340_v14 = vsel %vm532_vm8, %v5044_v49, %v2337_v11  ;;  %v2341_v37 = vsel %vm532_vm8, %v2337_v11, %v5061_v2  ;;  %v2315_v27 = vmul.f32 %v5966_v25, %v4899_v4  ;;  %v2369_v46 = vadd.f32 %v2365_v7, %v2314_v15 }
 0x3cf   : > { %v2344_v49 = vadd.f32 %v2340_v14, %v2304_v9  ;;  %v2345_v57 = vadd.f32 %v2341_v37, %v2305_v45  ;;  %v2440_v9 = vsel %vm722_vm10, %v5074_v13, %v5253_v26 }
 0x3d0   : > { %v2370_v3 = vadd.f32 %v2366_v17, %v2315_v27  ;;  %v2441_v27 = vsel %vm722_vm10, %v5253_v26, %v5046_v28 }
 0x3d3   : > { %2912 = vrot.lane.b32.xlu2 %v2905_v60, %s4210_s30 }
 0x3d5   : > { %v2387_v16 = vpop.permute.xlu2 %2386  ;;  %v2412_v11 = vpop.permute.xlu0 %2411 }
 0x3d6   : > { %v5334_v2 = vpop.permute.xlu1 %2993  ;;  %v2390_v56 = vsel %vm652_vm9, %v5076_v8, %v2387_v16  ;;  %v2391_v25 = vsel %vm652_vm9, %v2387_v16, %v5059_v42  ;;  %v2415_v24 = vsel %vm652_vm9, %v5031_v32, %v2412_v11  ;;  %v2416_v29 = vsel %vm652_vm9, %v2412_v11, %v5091_v20  ;;  %v5968_v42 = vld [vmem:[#allocation25_spill] sm:$0xff]  ;;  %v5355_v20 = vld [vmem:[%s5840_s1] sm:$0x3] }
 0x3d7   : > { %v2394_v15 = vadd.f32 %v2390_v56, %v2344_v49  ;;  %v2395_v17 = vadd.f32 %v2391_v25, %v2345_v57  ;;  %v2419_v8 = vadd.f32 %v2415_v24, %v2369_v46  ;;  %v2420_v60 = vadd.f32 %v2416_v29, %v2370_v3 }
 0x3d8   : > { %v3133_v16 = vmul.f32 %v5968_v42, %v4899_v4  ;;  %v2523_v13 = vperm.slane %v5355_v20, 0  ;;  %v2524_v57 = vperm.slane %v5355_v20, 1  ;;  %v2515_v49 = vsel %vm792_vm11, %v5104_v10, %v5268_v38 }
 0x3d9   : > { %v2444_v7 = vadd.f32 %v2440_v9, %v2394_v15  ;;  %v2445_v32 = vadd.f32 %v2441_v27, %v2395_v17  ;;  %v2516_v11 = vsel %vm792_vm11, %v5268_v38, %v5072_v39  ;;  %v2581_v10 = vsel %vm532_vm8, %v5280_v19, %v5087_v18  ;;  %v5970_v17 = vld [vmem:[#allocation7_spill] sm:$0xff] }
 0x3da   : > { %v2542_v9 = vmul.f32 %v5970_v17, %v4896_v48  ;;  %v2543_v27 = vmul.f32 %v5970_v17, %v4899_v4 }
 0x3db   : > { %3140 = vrot.lane.b32.xlu2 %v3133_v16, %s4209_s29 }
 0x3dd   : > { %v2462_v56 = vpop.permute.xlu2 %2461  ;;  %v2487_v28 = vpop.permute.xlu0 %2486 }
 0x3de   : > { %v5360_v26 = vpop.permute.xlu1 %3221  ;;  %v2465_v24 = vsel %vm722_vm10, %v5106_v41, %v2462_v56  ;;  %v2466_v14 = vsel %vm722_vm10, %v2462_v56, %v5089_v52  ;;  %v2490_v37 = vsel %vm792_vm11, %v5057_v0, %v2487_v28  ;;  %v2491_v45 = vsel %vm792_vm11, %v2487_v28, %v5121_v31  ;;  %v5969_v52 = vld [vmem:[#allocation24_spill] sm:$0xff] }
 0x3df   : > { %v2469_v46 = vadd.f32 %v2465_v24, %v2419_v8  ;;  %v2470_v3 = vadd.f32 %v2466_v14, %v2420_v60  ;;  %v2494_v41 = vadd.f32 %v2490_v37, %v2444_v7  ;;  %v2495_v25 = vadd.f32 %v2491_v45, %v2445_v32 }
 0x3e0   : > { %v2730_v29 = vmul.f32 %v5969_v52, %v4896_v48  ;;  %v2580_v31 = vsel %vm532_vm8, %v5119_v36, %v5280_v19  ;;  %v2586_v8 = vadd.f32 %v2581_v10, %v2543_v27  ;;  %v2555_v24 = vmul.f32 %v5947_v34, %v4896_v48 }
 0x3e1   : > { %v5378_v15 = vadd.f32 %v2515_v49, %v2469_v46  ;;  %v5380_v0 = vadd.f32 %v2516_v11, %v2470_v3  ;;  %v5390_v38 = vmul.f32 %v2523_v13, %v2494_v41  ;;  %v5394_v39 = vmul.f32 %v2524_v57, %v2495_v25  ;;  %v5971_v46 = vld [vmem:[#allocation23_spill] sm:$0xff] }
 0x3e2   : > { %v2585_v36 = vadd.f32 %v2580_v31, %v2542_v9  ;;  %v2556_v14 = vmul.f32 %v5947_v34, %v4899_v4 }
 0x3e3   : > { %2736 = vrot.lane.b32.xlu2 %v2730_v29, %s4212_s17 }
 0x3e5   : > { %v2604_v60 = vpop.permute.xlu2 %2603  ;;  %v2631_v19 = vpop.permute.xlu0 %2630 }
 0x3e6   : > { %v5401_v16 = vpop.permute.xlu1 %3449  ;;  %v2607_v7 = vsel %vm532_vm8, %v5136_v55, %v2604_v60  ;;  %v2608_v32 = vsel %vm532_vm8, %v2604_v60, %v5134_v6  ;;  %v2634_v56 = vsel %vm652_vm9, %v5102_v44, %v2631_v19  ;;  %v2635_v28 = vsel %vm652_vm9, %v2631_v19, %v5151_v63 }
 0x3e7   : > { %v2639_v37 = vadd.f32 %v2634_v56, %v2585_v36  ;;  %v2640_v45 = vadd.f32 %v2635_v28, %v2586_v8  ;;  %v2958_v55 = vmul.f32 %v5971_v46, %v4896_v48  ;;  %v2612_v3 = vadd.f32 %v2607_v7, %v2555_v24  ;;  %v5972_v8 = vld [vmem:[#allocation28_spill] sm:$0xff] }
 0x3e8   : > { %v2613_v49 = vadd.f32 %v2608_v32, %v2556_v14  ;;  %v2661_v44 = vsel %vm652_vm9, %v5149_v62, %v5293_v47  ;;  %v2662_v6 = vsel %vm652_vm9, %v5293_v47, %v5117_v54  ;;  %v3186_v60 = vmul.f32 %v5972_v8, %v4896_v48 }
 0x3e9   : > { %v2666_v41 = vadd.f32 %v2661_v44, %v2612_v3  ;;  %v2838_v32 = vmul.f32 %v5951_v51, %v4899_v4  ;;  %v5974_v44 = vld [vmem:[#allocation13_spill] sm:$0xff] }
 0x3ea   : > { %v2667_v34 = vadd.f32 %v2662_v6, %v2613_v49 }
 0x3eb   : > { %2964 = vrot.lane.b32.xlu2 %v2958_v55, %s4211_s16  ;;  %v5973_v55 = vld [vmem:[#allocation27_spill] sm:$0xff] }
 0x3ed   : > { %v2685_v11 = vpop.permute.xlu2 %2684  ;;  %v2712_v25 = vpop.permute.xlu0 %2711 }
 0x3ee   : > { %v3048_v29 = vpop.permute.xlu1 %3047  ;;  %v2688_v31 = vsel %vm722_vm10, %v5166_v12, %v2685_v11  ;;  %v2689_v10 = vsel %vm722_vm10, %v2685_v11, %v5164_v40  ;;  %v2715_v9 = vsel %vm722_vm10, %v5132_v61, %v2712_v25  ;;  %v2716_v62 = vsel %vm722_vm10, %v2712_v25, %v5196_v21 }
 0x3ef   : > { %v5432_v27 = vadd.f32 %v2688_v31, %v2639_v37  ;;  %v5434_v54 = vadd.f32 %v2689_v10, %v2640_v45  ;;  %v2720_v47 = vadd.f32 %v2715_v9, %v2666_v41  ;;  %v2721_v36 = vadd.f32 %v2716_v62, %v2667_v34  ;;  %v5976_v10 = vld [vmem:[#allocation18_spill] sm:$0xff] }
 0x3f0   : > { %v2769_v12 = vsel %vm792_vm11, %v5194_v59, %v5313_v1  ;;  %v2770_v61 = vsel %vm792_vm11, %v5313_v1, %v5177_v30  ;;  %v2837_v21 = vmul.f32 %v5951_v51, %v4896_v48  ;;  %v3414_v51 = vmul.f32 %v5973_v55, %v4896_v48 }
 0x3f1   : > { %v2774_v19 = vadd.f32 %v2769_v12, %v2720_v47  ;;  %v2775_v7 = vadd.f32 %v2770_v61, %v2721_v36  ;;  %v3052_v41 = vsel %vm792_vm11, %v3048_v29, %v5237_v22  ;;  %v3119_v9 = vmul.f32 %v5976_v10, %v4896_v48 }
 0x3f3   : > { %3192 = vrot.lane.b32.xlu2 %v3186_v60, %s4210_s30  ;;  %2805 = vrot.lane.b32.xlu1 %v2775_v7, %s5952_s25 }
 0x3f4   : > { %2803 = vrot.lane.b32.xlu0 %v2774_v19, %s5952_s25  ;;  %v5979_v19 = vld [vmem:[#allocation11_spill] sm:$0xff] }
 0x3f5   : > { %v2886_v56 = vpop.permute.xlu2 %2885  ;;  %v2940_v59 = vpop.permute.xlu0 %2939  ;;  %v3225_v7 = vsel %vm652_vm9, %v5979_v19, %v5360_v26  ;;  %v5991_v19 = vld [vmem:[#allocation36_spill] sm:$0xff] }
 0x3f6   : > { %v3276_v28 = vpop.permute.xlu1 %3275  ;;  %v2889_v30 = vsel %vm532_vm8, %v5181_v50, %v2886_v56  ;;  %v2890_v1 = vsel %vm532_vm8, %v2886_v56, %v5179_v35  ;;  %v2943_v37 = vsel %vm652_vm9, %v5147_v58, %v2940_v59  ;;  %v2944_v45 = vsel %vm652_vm9, %v2940_v59, %v5211_v43  ;;  %v5975_v58 = vld [vmem:[#allocation15_spill] sm:$0xff] }
 0x3f7   : > { %v2894_v24 = vadd.f32 %v2889_v30, %v2837_v21  ;;  %v2895_v14 = vadd.f32 %v2890_v1, %v2838_v32  ;;  %v2997_v50 = vsel %vm722_vm10, %v5974_v44, %v5334_v2  ;;  %v2998_v35 = vsel %vm722_vm10, %v5334_v2, %v5192_v23  ;;  %v5977_v2 = vld [vmem:[#allocation10_spill] sm:$0xff]  ;;  %v5980_v21 = vld [vmem:[#allocation9_spill] sm:$0xff] }
 0x3f8   : > { %v3051_v43 = vsel %vm792_vm11, %v5975_v58, %v3048_v29  ;;  %v3120_v23 = vmul.f32 %v5976_v10, %v4899_v4  ;;  %v5978_v29 = vld [vmem:[#allocation26_spill] sm:$0xff]  ;;  %v3226_v32 = vsel %vm652_vm9, %v5360_v26, %v5980_v21  ;;  %v5981_v30 = vld [vmem:[#allocation21_spill] sm:$0xff] }
 0x3f9   : > { %v2948_v3 = vadd.f32 %v2943_v37, %v2894_v24  ;;  %v2949_v49 = vadd.f32 %v2944_v45, %v2895_v14  ;;  %v3012_v61 = vmul.f32 %v5978_v29, %v4896_v48  ;;  %v3279_v1 = vsel %vm722_vm10, %v5981_v30, %v3276_v28  ;;  %v5983_v44 = vld [vmem:[#allocation6_spill] sm:$0xff] }
 0x3fa   : > { %v3280_v24 = vsel %vm722_vm10, %v3276_v28, %v5249_v5  ;;  %v5985_v28 = vld [vmem:[#allocation16_spill] sm:$0xff] }
 0x3fb   : > { %v3002_v6 = vadd.f32 %v2997_v50, %v2948_v3  ;;  %v3003_v11 = vadd.f32 %v2998_v35, %v2949_v49  ;;  %3420 = vrot.lane.b32.xlu2 %v3414_v51, %s4209_s29  ;;  %v5982_v49 = vld [vmem:[#allocation34_spill] sm:$0xff] }
 0x3fd   : > { %v3056_v34 = vadd.f32 %v3051_v43, %v3002_v6  ;;  %v3057_v25 = vadd.f32 %v3052_v41, %v3003_v11  ;;  %v2822_v31 = vpop.permute.xlu2 %2821  ;;  %v3168_v62 = vpop.permute.xlu0 %3167  ;;  %v5984_v11 = vld [vmem:[#allocation30_spill] sm:$0xff]  ;;  %v3453_v43 = vsel %vm532_vm8, %v5985_v28, %v5401_v16  ;;  %v5986_v41 = vld [vmem:[#allocation12_spill] sm:$0xff]  ;;  %v3132_v28 = vmul.f32 %v5968_v42, %v4896_v48 }
 0x3fe   : > { %v3504_v47 = vpop.permute.xlu1 %3503  ;;  %v3171_v36 = vsel %vm532_vm8, %v5977_v2, %v3168_v62  ;;  %v3172_v60 = vsel %vm532_vm8, %v3168_v62, %v5226_v33  ;;  %v2826_v33 = vmul.f32 %v2822_v31, %v4908_v53  ;;  %v3240_v58 = vmul.f32 %v5984_v11, %v4896_v48  ;;  %v5988_v62 = vld [vmem:[#allocation29_spill] sm:$0xff]  ;;  %v5989_v2 = vld [vmem:[#allocation19_spill] sm:$0xff] }
 0x3ff   : > { %v3176_v12 = vadd.f32 %v3171_v36, %v3119_v9  ;;  %3087 = vrot.lane.b32.xlu1 %v3057_v25, %s5956_s27  ;;  %v3177_v22 = vadd.f32 %v3172_v60, %v3120_v23  ;;  %3085 = vrot.lane.b32.xlu0 %v3056_v34, %s5956_s27  ;;  %v3454_v34 = vsel %vm532_vm8, %v5401_v16, %v5986_v41  ;;  %v5987_v25 = vld [vmem:[#allocation17_spill] sm:$0xff]  ;;  %v5990_v60 = vld [vmem:[#allocation14_spill] sm:$0xff] }
 0x400   : > { %v3401_v10 = vmul.f32 %v5987_v25, %v4896_v48  ;;  %v3402_v9 = vmul.f32 %v5987_v25, %v4899_v4  ;;  %v3468_v23 = vmul.f32 %v5988_v62, %v4896_v48  ;;  %v3507_v36 = vsel %vm652_vm9, %v5989_v2, %v3504_v47 }
 0x401   : > { %v3230_v56 = vadd.f32 %v3225_v7, %v3176_v12  ;;  %v3231_v59 = vadd.f32 %v3226_v32, %v3177_v22  ;;  %v3508_v12 = vsel %vm652_vm9, %v3504_v47, %v5990_v60  ;;  %v5992_v7 = vld [vmem:[#allocation33_spill] sm:$0xff]  ;;  %v2732_v60 = vmul.f32 %v5969_v52, %v4908_v53 }
 0x402   : > { %v3458_v22 = vadd.f32 %v3453_v43, %v3401_v10  ;;  %v5996_v43 = vld [vmem:[#allocation20_spill] sm:$0xff] }
 0x403   : > { %3018 = vrot.lane.b32.xlu2 %v3012_v61, %s4212_s17  ;;  %v3284_v45 = vadd.f32 %v3279_v1, %v3230_v56  ;;  %v3285_v51 = vadd.f32 %v3280_v24, %v3231_v59  ;;  %v3459_v61 = vadd.f32 %v3454_v34, %v3402_v9  ;;  %v5993_v1 = vld [vmem:[#allocation38_spill] sm:$0xff]  ;;  %v2906_v41 = vmul.f32 %v5996_v43, %v4908_v53  ;;  %v5997_v10 = vld [vmem:[#allocation32_spill] sm:$0xff] }
 0x404   : > { %v3512_v32 = vadd.f32 %v3507_v36, %v3458_v22  ;;  %v3522_v9 = vmul.f32 %v5997_v10, %v4896_v48  ;;  %v2731_v36 = vmul.f32 %v5969_v52, %v4899_v4  ;;  %v3188_v52 = vmul.f32 %v5972_v8, %v4908_v53 }
 0x405   : > { %v2861_v14 = vpop.permute.xlu2 %2860  ;;  %v3513_v56 = vadd.f32 %v3508_v12, %v3459_v61  ;;  %v3187_v12 = vmul.f32 %v5972_v8, %v4899_v4  ;;  %v3415_v22 = vmul.f32 %v5973_v55, %v4899_v4  ;;  %v3013_v61 = vmul.f32 %v5978_v29, %v4899_v4 }
 0x406   : > { %v3330_v37 = vpop.permute.xlu1 %3329  ;;  %v5496_v3 = vadd.f32 %v2861_v14, %v2826_v33  ;;  %v3014_v8 = vmul.f32 %v5978_v29, %v4908_v53  ;;  %v3470_v29 = vmul.f32 %v5988_v62, %v4908_v53 }
 0x407   : > { %v3333_v26 = vsel %vm792_vm11, %v5982_v49, %v3330_v37  ;;  %v3334_v50 = vsel %vm792_vm11, %v3330_v37, %v5983_v44  ;;  %v5994_v37 = vld [vmem:[#allocation35_spill] sm:$0xff]  ;;  %v2824_v44 = vmul.f32 %v2822_v31, %v4896_v48 }
 0x408   : > { %v3338_v35 = vadd.f32 %v3333_v26, %v3284_v45  ;;  %v3339_v6 = vadd.f32 %v3334_v50, %v3285_v51  ;;  %v5995_v49 = vld [vmem:[#allocation31_spill] sm:$0xff]  ;;  %v2825_v50 = vmul.f32 %v2822_v31, %v4899_v4 }
 0x409   : > { %v3294_v26 = vmul.f32 %v5995_v49, %v4896_v48  ;;  %v4131_v31 = vld [vmem:[%s5842_s3 + $0x20] sm:$0xff] }
 0x40a   : > { %3369 = vrot.lane.b32.xlu1 %v3339_v6, %s5960_s21  ;;  %3367 = vrot.lane.b32.xlu0 %v3338_v35, %s5960_s21  ;;  %v2857_v35 = vpop.permute.xlu0 %2856 }
 0x40b   : > { %3246 = vrot.lane.b32.xlu2 %v3240_v58, %s4211_s16 }
 0x40e   : > { %v3558_v5 = vpop.permute.xlu1 %3557 }
 0x40f   : > { %v3561_v16 = vsel %vm722_vm10, %v5991_v19, %v3558_v5  ;;  %v3562_v21 = vsel %vm722_vm10, %v3558_v5, %v5992_v7  ;;  %v2808_v19 = vpop.permute.xlu2 %2807 }
 0x410   : > { %v3566_v59 = vadd.f32 %v3561_v16, %v3512_v32  ;;  %v3567_v33 = vadd.f32 %v3562_v21, %v3513_v56  ;;  %v3241_v16 = vmul.f32 %v5984_v11, %v4899_v4  ;;  %v3469_v21 = vmul.f32 %v5988_v62, %v4899_v4 }
 0x411   : > { %v3295_v32 = vmul.f32 %v5995_v49, %v4899_v4  ;;  %v3523_v62 = vmul.f32 %v5997_v10, %v4899_v4 }
 0x413   : > { %3474 = vrot.lane.b32.xlu2 %v3468_v23, %s4210_s30  ;;  %v5998_v23 = vld [vmem:[#allocation8_spill] sm:$0xff] }
 0x414   : > { %v3576_v2 = vmul.f32 %v5998_v23, %v4896_v48  ;;  %v2960_v48 = vmul.f32 %v5971_v46, %v4908_v53 }
 0x416   : > { %v3612_v30 = vpop.permute.xlu1 %3611 }
 0x417   : > { %v3615_v24 = vsel %vm792_vm11, %v5993_v1, %v3612_v30  ;;  %v3616_v47 = vsel %vm792_vm11, %v3612_v30, %v5994_v37  ;;  %v3090_v7 = vpop.permute.xlu2 %3089  ;;  %v3577_v37 = vmul.f32 %v5998_v23, %v4899_v4 }
 0x418   : > { %v3620_v45 = vadd.f32 %v3615_v24, %v3566_v59  ;;  %v3621_v51 = vadd.f32 %v3616_v47, %v3567_v33  ;;  %v5611_v59 = vpop.permute.xlu0 %3103  ;;  %v3524_v33 = vmul.f32 %v5997_v10, %v4908_v53  ;;  %v3578_v47 = vmul.f32 %v5998_v23, %v4908_v53 }
 0x41a   : > { %3651 = vrot.lane.b32.xlu1 %v3621_v51, %s5964_s26  ;;  %3649 = vrot.lane.b32.xlu0 %v3620_v45, %s5964_s26 }
 0x41b   : > { %3300 = vrot.lane.b32.xlu2 %v3294_v26, %s4212_s17  ;;  %v5630_v26 = vld [vmem:[%s5840_s1 + $0x2] sm:$0x3] }
 0x41e   : > { %v2859_v6 = vpop.permute.xlu1 %2858 }
 0x41f   : > { %v2862_v58 = vsel %vm532_vm8, %v2857_v35, %v2859_v6  ;;  %v2863_v5 = vsel %vm532_vm8, %v2859_v6, %v2861_v14  ;;  %v3134_v14 = vmul.f32 %v5968_v42, %v4908_v53  ;;  %v2959_v42 = vmul.f32 %v5971_v46, %v4899_v4  ;;  %v3372_v56 = vpop.permute.xlu2 %3371  ;;  %v5636_v4 = vld [vmem:[%s5840_s1 + $0x4] sm:$0x3]  ;;  %v5644_v6 = vld [vmem:[%s5840_s1 + $0x6] sm:$0x3] }
 0x420   : > { %v5545_v34 = vadd.f32 %v2862_v58, %v2824_v44  ;;  %v5547_v25 = vadd.f32 %v2863_v5, %v2825_v50  ;;  %v3416_v46 = vmul.f32 %v5973_v55, %v4908_v53  ;;  %v3242_v55 = vmul.f32 %v5984_v11, %v4908_v53 }
 0x421   : > { %v3296_v11 = vmul.f32 %v5995_v49, %v4908_v53  ;;  %v2780_v44 = vperm.slane %v5630_v26, 1  ;;  %v2779_v50 = vperm.slane %v5630_v26, 0  ;;  %v3062_v58 = vperm.slane %v5636_v4, 1 }
 0x422   : > { %3138 = vrot.lane.b32.xlu1 %v3132_v28, %s4209_s29  ;;  %2914 = vrot.lane.b32.xlu0 %v2906_v41, %s4210_s30  ;;  %v3061_v5 = vperm.slane %v5636_v4, 0  ;;  %v3343_v23 = vperm.slane %v5644_v6, 0 }
 0x423   : > { %3528 = vrot.lane.b32.xlu2 %v3522_v9, %s4211_s16 }
 0x427   : > { %v3654_v30 = vpop.permute.xlu2 %3653 }
 0x42a   : > { %3385 = vperm.xlu1 %4191, %v4131_v31   ;;  %3142 = vrot.lane.b32.xlu0 %v3134_v14, %s4209_s29  ;;  %v3344_v14 = vperm.slane %v5644_v6, 1 }
 0x42b   : > { %3582 = vrot.lane.b32.xlu2 %v3576_v2, %s4212_s17  ;;  %v5659_v2 = vld [vmem:[%s5840_s1 + $0x8] sm:$0x3] }
 0x42f   : > { %v5625_v49 = vpop.permute.xlu2 %2912 }
 0x432   : > { %2740 = vrot.lane.b32.xlu1 %v2732_v60, %s4212_s17  ;;  %2738 = vrot.lane.b32.xlu0 %v2731_v36, %s4212_s17  ;;  %v2532_v60 = vmul.f32 %v2524_v57, %v5380_v0 }
 0x437   : > { %v5661_v36 = vpop.permute.xlu2 %3140 }
 0x43a   : > { %2968 = vrot.lane.b32.xlu1 %v2960_v48, %s4211_s16  ;;  %2966 = vrot.lane.b32.xlu0 %v2959_v42, %s4211_s16 }
 0x442   : > { %3196 = vrot.lane.b32.xlu1 %v3188_v52, %s4210_s30  ;;  %3194 = vrot.lane.b32.xlu0 %v3187_v12, %s4210_s30  ;;  %v2531_v12 = vmul.f32 %v2523_v13, %v5378_v15 }
 0x44a   : > { %3424 = vrot.lane.b32.xlu1 %v3416_v46, %s4209_s29  ;;  %3422 = vrot.lane.b32.xlu0 %v3415_v22, %s4209_s29 }
 0x452   : > { %3022 = vrot.lane.b32.xlu1 %v3014_v8, %s4212_s17  ;;  %3020 = vrot.lane.b32.xlu0 %v3013_v61, %s4212_s17  ;;  %v3626_v61 = vperm.slane %v5659_v2, 1 }
 0x45a   : > { %3250 = vrot.lane.b32.xlu1 %v3242_v55, %s4211_s16  ;;  %3248 = vrot.lane.b32.xlu0 %v3241_v16, %s4211_s16 }
 0x462   : > { %3478 = vrot.lane.b32.xlu1 %v3470_v29, %s4210_s30  ;;  %3476 = vrot.lane.b32.xlu0 %v3469_v21, %s4210_s30 }
 0x465   : > { %v2806_v1 = vpop.permute.xlu1 %2805 }
 0x466   : > { %v2804_v24 = vpop.permute.xlu0 %2803  ;;  %v2810_v53 = vsel %vm936_vm13, %v2806_v1, %v2808_v19  ;;  %v3625_v19 = vperm.slane %v5659_v2, 0 }
 0x467   : > { %v2809_v35 = vsel %vm936_vm13, %v2804_v24, %v2806_v1  ;;  %v2814_v41 = vmul.f32 %v2810_v53, %v2780_v44  ;;  %v5999_v1 = vld [vmem:[#allocation22_spill] sm:$0xff] }
 0x468   : > { %v2813_v31 = vmul.f32 %v2809_v35, %v2779_v50 }
 0x469   : > { %v2816_v46 = vadd.f32 %v2814_v41, %v2532_v60 }
 0x46a   : > { %3304 = vrot.lane.b32.xlu1 %v3296_v11, %s4212_s17  ;;  %3302 = vrot.lane.b32.xlu0 %v3295_v32, %s4212_s17  ;;  %v2815_v8 = vadd.f32 %v2813_v31, %v2531_v12 }
 0x471   : > { %v3088_v45 = vpop.permute.xlu1 %3087  ;;  %v3086_v51 = vpop.permute.xlu0 %3085 }
 0x472   : > { %3532 = vrot.lane.b32.xlu1 %v3524_v33, %s4211_s16  ;;  %3530 = vrot.lane.b32.xlu0 %v3523_v62, %s4211_s16  ;;  %v3092_v10 = vsel %vm1289_vm2, %v3088_v45, %v3090_v7  ;;  %v3091_v9 = vsel %vm1289_vm2, %v3086_v51, %v3088_v45  ;;  %v2737_v33 = vpop.permute.xlu2 %2736 }
 0x473   : > { %v3096_v52 = vmul.f32 %v3092_v10, %v3062_v58  ;;  %v3095_v22 = vmul.f32 %v3091_v9, %v3061_v5 }
 0x475   : > { %v3098_v20 = vadd.f32 %v3096_v52, %v2816_v46  ;;  %v3097_v13 = vadd.f32 %v3095_v22, %v2815_v8 }
 0x47a   : > { %3586 = vrot.lane.b32.xlu1 %v3578_v47, %s4212_s17  ;;  %3584 = vrot.lane.b32.xlu0 %v3577_v37, %s4212_s17  ;;  %v2965_v53 = vpop.permute.xlu2 %2964 }
 0x47c   : > { %v3370_v28 = vpop.permute.xlu1 %3369  ;;  %v3368_v43 = vpop.permute.xlu0 %3367 }
 0x47d   : > { %v3374_v42 = vsel %vm1642_vm15, %v3370_v28, %v3372_v56  ;;  %v3373_v48 = vsel %vm1642_vm15, %v3368_v43, %v3370_v28  ;;  %v5695_v43 = vld [vmem:[#allocation3 + $0x10] sm:$0xff] }
 0x47e   : > { %v3378_v57 = vmul.f32 %v3374_v42, %v3344_v14  ;;  %v3377_v0 = vmul.f32 %v3373_v48, %v3343_v23  ;;  %v2544_v41 = vmul.f32 %v5695_v43, %v5970_v17 }
 0x480   : > { %v3380_v21 = vadd.f32 %v3378_v57, %v3098_v20  ;;  %v3379_v29 = vadd.f32 %v3377_v0, %v3097_v13  ;;  %v2587_v10 = vadd.f32 %v5087_v18, %v2544_v41 }
 0x482   : > { %v2641_v9 = vadd.f32 %v5151_v63, %v2587_v10  ;;  %v3193_v48 = vpop.permute.xlu2 %3192  ;;  %v3108_v10 = vmul.f32 %v5695_v43, %v5611_v59 }
 0x484   : > { %v2695_v31 = vadd.f32 %v5164_v40, %v2641_v9 }
 0x48a   : > { %v5709_v40 = vpop.permute.xlu2 %3420 }
 0x48c   : > { %v3652_v15 = vpop.permute.xlu1 %3651  ;;  %v3650_v16 = vpop.permute.xlu0 %3649 }
 0x48d   : > { %v3656_v55 = vsel %vm1995_vm12, %v3652_v15, %v3654_v30  ;;  %v3655_v7 = vsel %vm1995_vm12, %v3650_v16, %v3652_v15 }
 0x48e   : > { %v3660_v32 = vmul.f32 %v3656_v55, %v3626_v61  ;;  %v3659_v11 = vmul.f32 %v3655_v7, %v3625_v19 }
 0x490   : > { %v3662_v56 = vadd.f32 %v3660_v32, %v3380_v21  ;;  %v3661_v62 = vadd.f32 %v3659_v11, %v3379_v29 }
 0x492   : > { %v3680_v24 = vadd.f32 %v5999_v1, %v3662_v56  ;;  %v3679_v37 = vadd.f32 %v5999_v1, %v3661_v62  ;;  %v3019_v0 = vpop.permute.xlu2 %3018 }
 0x494   : > { %v3682_v47 = vmax.f32 %v3680_v24, 0.0  ;;  %v3681_v45 = vmax.f32 %v3679_v37, 0.0  ;;  %v5689_v30 = vpop.permute.xlu1 %3138  ;;  %v2915_v51 = vpop.permute.xlu0 %2914 }
 0x495   : > { %v2917_v15 = vsel %vm652_vm9, %v5625_v49, %v2915_v51  ;;  %v2923_v16 = vadd.f32 %v2915_v51, %v5496_v3  ;;  %v3144_v9 = vsel %vm532_vm8, %v5689_v30, %v5661_v36 }
 0x496   : > { %3711 = vmatpush.msra.mxu2 %v3681_v45  ;;  %3731 = vmatpush.msra.mxu3 %v3682_v47  ;;  %v2922_v29 = vadd.f32 %v2917_v15, %v5547_v25  ;;  %v3685_v45 = vld [vmem:[%s5844_s5] sm:$0xff] }
 0x497   : > { %4142 = vmatmul.msk.f32.vlgmr.msra.gmra.mxu2 %vm3692_vm3, %v3685_v45  ;;  %4143 = vmatmul.msk.f32.vlgmr.msra.gmra.mxu3 %vm3692_vm3, %v3685_v45 }
 0x49a   : > { %v3247_v32 = vpop.permute.xlu2 %3246 }
 0x49c   : > { %v5691_v35 = vpop.permute.xlu1 %3385  ;;  %v5693_v28 = vpop.permute.xlu0 %3142 }
 0x4a2   : > { %v3475_v51 = vpop.permute.xlu2 %3474 }
 0x4a4   : > { %v2741_v60 = vpop.permute.xlu1 %2740  ;;  %v2739_v42 = vpop.permute.xlu0 %2738 }
 0x4a5   : > { %v2749_v12 = vadd.f32 %v2741_v60, %v2695_v31  ;;  %v2742_v52 = vsel %vm792_vm11, %v2737_v33, %v2739_v42  ;;  %v2743_v22 = vsel %vm792_vm11, %v2739_v42, %v2741_v60  ;;  %v3145_v31 = vsel %vm532_vm8, %v5661_v36, %v5693_v28  ;;  %v4196_v60 = vld [vmem:[#allocation3] sm:$0xff] }
 0x4a6   : > { %v2747_v46 = vadd.f32 %v2742_v52, %v5432_v27  ;;  %v2748_v8 = vadd.f32 %v2743_v22, %v5434_v54  ;;  %v6000_v27 = vld [vmem:[#allocation37_spill] sm:$0xff]  ;;  %v3106_v42 = vmul.f32 %v4196_v60, %v5611_v59 }
 0x4a7   : > { %2790 = vrot.lane.b32.xlu1 %v2749_v12, %s5952_s25  ;;  %v2916_v54 = vsel %vm652_vm9, %v6000_v27, %v5625_v49  ;;  %v4197_v12 = vld [vmem:[#allocation3 + $0x8] sm:$0xff] }
 0x4a8   : > { %2788 = vrot.lane.b32.xlu0 %v2748_v8, %s5952_s25  ;;  %2786 = vrot.lane.b32.xlu2 %v2747_v46, %s5952_s25  ;;  %v2921_v21 = vadd.f32 %v2916_v54, %v5545_v34  ;;  %v3107_v52 = vmul.f32 %v4197_v12, %v5611_v59  ;;  %v3151_v46 = vadd.f32 %v5693_v28, %v3108_v10 }
 0x4aa   : > { %v3301_v22 = vpop.permute.xlu2 %3300 }
 0x4ac   : > { %v2969_v18 = vpop.permute.xlu1 %2968  ;;  %v2967_v63 = vpop.permute.xlu0 %2966 }
 0x4ad   : > { %v2970_v55 = vsel %vm722_vm10, %v2965_v53, %v2967_v63  ;;  %v2971_v7 = vsel %vm722_vm10, %v2967_v63, %v2969_v18  ;;  %v2977_v11 = vadd.f32 %v2969_v18, %v2923_v16  ;;  %v3149_v63 = vadd.f32 %v3144_v9, %v3106_v42 }
 0x4ae   : > { %v2975_v56 = vadd.f32 %v2970_v55, %v2921_v21  ;;  %v2976_v62 = vadd.f32 %v2971_v7, %v2922_v29 }
 0x4b4   : > { %v3197_v17 = vpop.permute.xlu1 %3196  ;;  %v3195_v57 = vpop.permute.xlu0 %3194 }
 0x4b5   : > { %v3198_v8 = vsel %vm652_vm9, %v3193_v48, %v3195_v57  ;;  %v3199_v18 = vsel %vm652_vm9, %v3195_v57, %v3197_v17  ;;  %v3205_v30 = vadd.f32 %v3197_v17, %v3151_v46  ;;  %v3529_v17 = vpop.permute.xlu2 %3528  ;;  %v3686_v46 = vld [vmem:[%s5851_s12] sm:$0xff] }
 0x4b6   : > { %v3203_v54 = vadd.f32 %v3198_v8, %v3149_v63  ;;  %v3663_v8 = vld [vmem:[%s5849_s10] sm:$0xff] }
 0x4bc   : > { %v5711_v20 = vpop.permute.xlu1 %3424  ;;  %v5713_v13 = vpop.permute.xlu0 %3422 }
 0x4c4   : > { %v3023_v33 = vpop.permute.xlu1 %3022  ;;  %v3021_v1 = vpop.permute.xlu0 %3020 }
 0x4c5   : > { %v3031_v24 = vadd.f32 %v3023_v33, %v2977_v11  ;;  %v3024_v37 = vsel %vm792_vm11, %v3019_v0, %v3021_v1  ;;  %v3025_v49 = vsel %vm792_vm11, %v3021_v1, %v3023_v33  ;;  %v3150_v0 = vadd.f32 %v3145_v31, %v3107_v52 }
 0x4c6   : > { %v3029_v3 = vadd.f32 %v3024_v37, %v2975_v56  ;;  %v3030_v47 = vadd.f32 %v3025_v49, %v2976_v62  ;;  %v3390_v62 = vmul.f32 %v5695_v43, %v5691_v35  ;;  %v3426_v33 = vsel %vm532_vm8, %v5709_v40, %v5713_v13 }
 0x4c7   : > { %3072 = vrot.lane.b32.xlu1 %v3031_v24, %s5956_s27  ;;  %v3204_v15 = vadd.f32 %v3199_v18, %v3150_v0  ;;  %v3427_v1 = vsel %vm532_vm8, %v5713_v13, %v5711_v20  ;;  %v3388_v24 = vmul.f32 %v4196_v60, %v5691_v35  ;;  %v3389_v37 = vmul.f32 %v4197_v12, %v5691_v35  ;;  %v3583_v13 = vpop.permute.xlu2 %3582  ;;  %v3839_v18 = vld [vmem:[%s5853_s14] sm:$0xff] }
 0x4c8   : > { %3070 = vrot.lane.b32.xlu0 %v3030_v47, %s5956_s27  ;;  %3068 = vrot.lane.b32.xlu2 %v3029_v3, %s5956_s27  ;;  %v3433_v49 = vadd.f32 %v5711_v20, %v3390_v62 }
 0x4c9   : > { %v3431_v45 = vadd.f32 %v3426_v33, %v3388_v24  ;;  %v3432_v43 = vadd.f32 %v3427_v1, %v3389_v37 }
 0x4cc   : > { %v3251_v34 = vpop.permute.xlu1 %3250  ;;  %v3249_v25 = vpop.permute.xlu0 %3248 }
 0x4cd   : > { %v3252_v27 = vsel %vm722_vm10, %v3247_v32, %v3249_v25  ;;  %v3253_v36 = vsel %vm722_vm10, %v3249_v25, %v3251_v34  ;;  %v3259_v16 = vadd.f32 %v3251_v34, %v3205_v30 }
 0x4ce   : > { %v3257_v55 = vadd.f32 %v3252_v27, %v3203_v54  ;;  %v3258_v7 = vadd.f32 %v3253_v36, %v3204_v15 }
 0x4d4   : > { %v3479_v53 = vpop.permute.xlu1 %3478  ;;  %v3477_v41 = vpop.permute.xlu0 %3476 }
 0x4d5   : > { %v3480_v3 = vsel %vm652_vm9, %v3475_v51, %v3477_v41  ;;  %v3481_v47 = vsel %vm652_vm9, %v3477_v41, %v3479_v53  ;;  %v3487_v34 = vadd.f32 %v3479_v53, %v3433_v49  ;;  %v3828_v53 = vld [vmem:[%s5852_s13] sm:$0xf] }
 0x4d6   : > { %v3485_v10 = vadd.f32 %v3480_v3, %v3431_v45  ;;  %v3486_v9 = vadd.f32 %v3481_v47, %v3432_v43 }
 0x4dc   : > { %v3305_v59 = vpop.permute.xlu1 %3304  ;;  %v3303_v21 = vpop.permute.xlu0 %3302 }
 0x4dd   : > { %v3313_v29 = vadd.f32 %v3305_v59, %v3259_v16  ;;  %v3306_v28 = vsel %vm792_vm11, %v3301_v22, %v3303_v21  ;;  %v3307_v48 = vsel %vm792_vm11, %v3303_v21, %v3305_v59 }
 0x4de   : > { %v3311_v57 = vadd.f32 %v3306_v28, %v3257_v55  ;;  %v3312_v11 = vadd.f32 %v3307_v48, %v3258_v7 }
 0x4df   : > { %3354 = vrot.lane.b32.xlu1 %v3313_v29, %s5960_s21 }
 0x4e0   : > { %3352 = vrot.lane.b32.xlu0 %v3312_v11, %s5960_s21  ;;  %3350 = vrot.lane.b32.xlu2 %v3311_v57, %s5960_s21 }
 0x4e4   : > { %v3533_v32 = vpop.permute.xlu1 %3532  ;;  %v3531_v56 = vpop.permute.xlu0 %3530 }
 0x4e5   : > { %v3534_v25 = vsel %vm722_vm10, %v3529_v17, %v3531_v56  ;;  %v3535_v40 = vsel %vm722_vm10, %v3531_v56, %v3533_v32  ;;  %v3541_v31 = vadd.f32 %v3533_v32, %v3487_v34 }
 0x4e6   : > { %v3539_v60 = vadd.f32 %v3534_v25, %v3485_v10  ;;  %v3540_v42 = vadd.f32 %v3535_v40, %v3486_v9 }
 0x4ec   : > { %v3587_v35 = vpop.permute.xlu1 %3586  ;;  %v3585_v12 = vpop.permute.xlu0 %3584 }
 0x4ed   : > { %v3595_v20 = vadd.f32 %v3587_v35, %v3541_v31  ;;  %v3588_v51 = vsel %vm792_vm11, %v3583_v13, %v3585_v12  ;;  %v3589_v41 = vsel %vm792_vm11, %v3585_v12, %v3587_v35  ;;  %v3741_v13 = vld [vmem:[%s5846_s7] sm:$0xf] }
 0x4ee   : > { %v3593_v52 = vadd.f32 %v3588_v51, %v3539_v60  ;;  %v3594_v22 = vadd.f32 %v3589_v41, %v3540_v42 }
 0x4ef   : > { %3636 = vrot.lane.b32.xlu1 %v3595_v20, %s5964_s26 }
 0x4f0   : > { %3634 = vrot.lane.b32.xlu0 %v3594_v22, %s5964_s26  ;;  %3632 = vrot.lane.b32.xlu2 %v3593_v52, %s5964_s26 }
 0x4f7   : > { %3831 = vperm.xlu1 %4191, %v3828_v53  }
 0x4f8   : > { %3689 = vperm.xlu0 %4193, %v3686_v46   ;;  %3666 = vperm.xlu2 %4192, %v3663_v8   ;;  %v3838_v46 = vld [vmem:[%s5847_s8] sm:$0xff] }
 0x500   : > { %3842 = vperm.xlu2 %4192, %v3839_v18  }
 0x502   : > { %v2787_v63 = vpop.permute.xlu2 %2786 }
 0x519   : > { %v2791_v0 = vpop.permute.xlu1 %2790 }
 0x51a   : > { %v2789_v30 = vpop.permute.xlu0 %2788  ;;  %v3713_v45 = vpop.f32.mrf.mxu2 }
 0x51b   : > { %v2792_v16 = vsel %vm936_vm13, %v2787_v63, %v2789_v30  ;;  %v2793_v55 = vsel %vm936_vm13, %v2789_v30, %v2791_v0  ;;  %v3733_v43 = vpop.f32.mrf.mxu3 }
 0x51c   : > { %v2796_v28 = vmul.f32 %v2792_v16, %v2779_v50  ;;  %v2797_v48 = vmul.f32 %v2793_v55, %v2780_v44 }
 0x51e   : > { %v2798_v62 = vadd.f32 %v2796_v28, %v5390_v38  ;;  %v2799_v33 = vadd.f32 %v2797_v48, %v5394_v39 }
 0x522   : > { %v3069_v27 = vpop.permute.xlu2 %3068 }
 0x539   : > { %v3073_v36 = vpop.permute.xlu1 %3072 }
 0x53a   : > { %v3071_v54 = vpop.permute.xlu0 %3070  ;;  %v3351_v15 = vpop.permute.xlu2 %3350 }
 0x53b   : > { %v3074_v21 = vsel %vm1289_vm2, %v3069_v27, %v3071_v54  ;;  %v3075_v29 = vsel %vm1289_vm2, %v3071_v54, %v3073_v36 }
 0x53c   : > { %v3078_v32 = vmul.f32 %v3074_v21, %v3061_v5  ;;  %v3079_v56 = vmul.f32 %v3075_v29, %v3062_v58 }
 0x53e   : > { %v3080_v1 = vadd.f32 %v3078_v32, %v2798_v62  ;;  %v3081_v24 = vadd.f32 %v3079_v56, %v2799_v33 }
 0x54a   : > { %v3633_v57 = vpop.permute.xlu2 %3632 }
 0x551   : > { %v3355_v7 = vpop.permute.xlu1 %3354 }
 0x552   : > { %v3353_v59 = vpop.permute.xlu0 %3352 }
 0x553   : > { %v3356_v11 = vsel %vm1642_vm15, %v3351_v15, %v3353_v59  ;;  %v3357_v17 = vsel %vm1642_vm15, %v3353_v59, %v3355_v7 }
 0x554   : > { %v3360_v50 = vmul.f32 %v3356_v11, %v3343_v23  ;;  %v3361_v26 = vmul.f32 %v3357_v17, %v3344_v14  ;;  %v3667_v14 = vpop.permute.xlu2 %3666 }
 0x556   : > { %v3362_v4 = vadd.f32 %v3360_v50, %v3080_v1  ;;  %v3363_v58 = vadd.f32 %v3361_v26, %v3081_v24 }
 0x55c   : > { %v3843_v8 = vpop.permute.xlu2 %3842 }
 0x561   : > { %v3637_v44 = vpop.permute.xlu1 %3636 }
 0x562   : > { %v3635_v37 = vpop.permute.xlu0 %3634 }
 0x563   : > { %v3638_v49 = vsel %vm1995_vm12, %v3633_v57, %v3635_v37  ;;  %v3639_v5 = vsel %vm1995_vm12, %v3635_v37, %v3637_v44 }
 0x564   : > { %v3642_v38 = vmul.f32 %v3638_v49, %v3625_v19  ;;  %v3643_v39 = vmul.f32 %v3639_v5, %v3626_v61  ;;  %v3740_v19 = vld [vmem:[%s5845_s6] sm:$0xf] }
 0x566   : > { %v3644_v23 = vadd.f32 %v3642_v38, %v3362_v4  ;;  %v3645_v6 = vadd.f32 %v3643_v39, %v3363_v58 }
 0x568   : > { %v3669_v3 = vadd.f32 %v3667_v14, %v3644_v23  ;;  %v3670_v47 = vadd.f32 %v3667_v14, %v3645_v6 }
 0x569   : > { %v3832_v51 = vpop.permute.xlu1 %3831 }
 0x56a   : > { %v3671_v34 = vmax.f32 %v3669_v3, 0.0  ;;  %v3672_v25 = vmax.f32 %v3670_v47, 0.0  ;;  %v3690_v40 = vpop.permute.xlu0 %3689 }
 0x56b   : > { %v3714_v10 = vadd.f32 %v3713_v45, %v3690_v40  ;;  %v3734_v2 = vadd.f32 %v3733_v43, %v3690_v40 }
 0x56c   : > { %3683 = vst [vmem:[%s4881_s23 + $0x10] sm:$0xff] %v3671_v34  ;;  %3803 = vmatpush.msrb.mxu2 %v3671_v34  ;;  %3823 = vmatpush.msrb.mxu3 %v3672_v25 }
 0x56d   : > { %3684 = vst [vmem:[%s4881_s23 + $0x18] sm:$0xff] %v3672_v25  ;;  %v3736_v61 = vmax.f32 %v3714_v10, 0.0  ;;  %v3737_v9 = vmax.f32 %v3734_v2, 0.0  ;;  %4146 = vmatmul.msk.f32.vlgmr.msrb.gmra.mxu2 %vm3692_vm3, %v3740_v19  ;;  %4147 = vmatmul.msk.f32.vlgmr.msrb.gmra.mxu3 %vm3692_vm3, %v3740_v19 }
 0x56f   : > { %3738 = vst [vmem:[%s4881_s23 + $0x20] sm:$0xff] %v3736_v61  ;;  %3760 = vmatpush.msrb.mxu0 %v3736_v61  ;;  %3780 = vmatpush.msrb.mxu1 %v3737_v9 }
 0x570   : > { %3739 = vst [vmem:[%s4881_s23 + $0x28] sm:$0xff] %v3737_v9  ;;  %4144 = vmatmul.msk.f32.vlgmr.msrb.gmra.mxu0 %vm3692_vm3, %v3741_v13  ;;  %4145 = vmatmul.msk.f32.vlgmr.msrb.gmra.mxu1 %vm3692_vm3, %v3741_v13 }
 0x5ed   : > { %v3762_v31 = vpop.f32.mrf.mxu0  ;;  %v3782_v60 = vpop.f32.mrf.mxu1 }
 0x5f0   : > { %v3805_v42 = vpop.f32.mrf.mxu2  ;;  %v3825_v35 = vpop.f32.mrf.mxu3 }
 0x5f1   : > { %v3806_v12 = vadd.f32 %v3805_v42, %v3762_v31  ;;  %v3826_v20 = vadd.f32 %v3825_v35, %v3782_v60 }
 0x5f3   : > { %v3834_v41 = vadd.f32 %v3832_v51, %v3806_v12  ;;  %v3835_v52 = vadd.f32 %v3832_v51, %v3826_v20 }
 0x5f5   : > { %v3836_v22 = vmax.f32 %v3834_v41, 0.0  ;;  %v3837_v53 = vmax.f32 %v3835_v52, 0.0 }
 0x5f7   : > { %4148 = vmatpush.msk.msra.mxu0 %vm539_vm6, %v3836_v22  ;;  %4150 = vmatpush.msk.msra.mxu1 %vm539_vm6, %v3837_v53 }
 0x5f8   : > { %4149 = vmatmul.msk.f32.vlgmr.msra.gmra.mxu0 %vm535_vm7, %v3838_v46  ;;  %4151 = vmatmul.msk.f32.vlgmr.msra.gmra.mxu1 %vm535_vm7, %v3838_v46 }
 0x675   : > { %v3871_v18 = vpop.f32.mrf.mxu0  ;;  %v3891_v63 = vpop.f32.mrf.mxu1 }
 0x676   : > { %v3872_v0 = vadd.f32 %v3871_v18, %v3843_v8  ;;  %v3892_v30 = vadd.f32 %v3891_v63, %v3843_v8 }
 0x678   : > { %v3894_v27 = vmax.f32 %v3872_v0, 0.0  ;;  %v3895_v36 = vmax.f32 %v3892_v30, 0.0 }
 0x67a   : > { %3896 = vst [vmem:[%s4881_s23 + $0x30] sm:$0xff] %v3894_v27 }
 0x67b   : > { %3897 = vst [vmem:[%s4881_s23 + $0x38] sm:$0xff] %v3895_v36 }
 0x67c PF: > { %s25_s18 = sadd.s32 1, %s4204_s18  }
 0x67d   : > { %p22_p4 = scmp.ge.s32.totalorder %s25_s18, 4  }
 0x67f   :  { %24 = sbr.rel (!%p22_p4) target bundleno = 1 (0x1), region = 210 }

</bundles_post_ra>
